<compile_context>
chip_gen: v7x
topology: tpu7x:2x2x1
jax: 0.10.0
libtpu: 0.0.40
codegen_flags: <defaults>
</compile_context>

<pallas_src>
import functools

import jax
import jax.numpy as jnp
from jax import lax
from jax.experimental import pallas as pl
from jax.experimental.pallas import tpu as pltpu


# ---------------------------------------------------------------------------
# Pallas kernel: per tile of `tm` output pixels (flattened padded-NHWC order)
#   acc  = bias + sum_{ky,kx} X[row0+ky*Wp+kx : +tm, :] @ W[ky,kx]   (f32 acc)
#   out  = acc[:, :C_pad] * sigmoid(acc[:, C_pad:])                  (1.8 folded)
# ---------------------------------------------------------------------------
def _gated_conv_kernel(x_ref, w_ref, b_ref, o_ref, xwin_ref, *,
                       tm, c_in_p, ks, wp, c_pad, win):
    # x_ref   : (mx, c_in_p)            f32  whole flattened padded input (VMEM)
    # w_ref   : (ks*ks*c_in_p, 2*c_pad) bf16 fused [signal | gate] tap weights
    # b_ref   : (1, 2*c_pad)            f32  fused biases (1.8 folded into signal)
    # o_ref   : (tm, c_pad)             f32  gated output tile (lane-dense)
    # xwin_ref: (win, c_in_p)           f32  scratch: tile rows + conv halo
    row0 = pl.multiple_of(pl.program_id(0) * tm, tm)
    # Aligned dynamic-start copy of this tile's input window into scratch;
    # all per-tap shifts below are then static slices.
    xwin_ref[...] = x_ref[pl.ds(row0, win), :]

    acc = b_ref[...]                                  # (1, 2*c_pad) -> broadcasts
    for ky in range(ks):
        for kx in range(ks):
            off = ky * wp + kx                        # static per tap
            xs = xwin_ref[off:off + tm, :].astype(jnp.bfloat16)       # (tm, c_in_p)
            t0 = (ky * ks + kx) * c_in_p
            wt = w_ref[t0:t0 + c_in_p, :]                             # (c_in_p, 2*c_pad)
            acc = acc + jnp.dot(xs, wt, preferred_element_type=jnp.float32)

    sig = acc[:, :c_pad]
    gate = acc[:, c_pad:]
    o_ref[...] = (sig * jax.nn.sigmoid(gate)).astype(o_ref.dtype)


# ---------------------------------------------------------------------------
# Scaled weight standardization (matches torch.var_mean unbiased over (1,2,3))
# ---------------------------------------------------------------------------
def _standardize_weight(w, gain, eps=1e-4):
    # w: (out_ch, in_ch, kh, kw)
    fan_in = w.shape[1] * w.shape[2] * w.shape[3]
    mean = jnp.mean(w, axis=(1, 2, 3), keepdims=True)
    var = jnp.var(w, axis=(1, 2, 3), keepdims=True, ddof=1)
    scale = lax.rsqrt(jnp.maximum(var * fan_in, eps)) * gain.reshape(var.shape)
    shift = mean * scale
    return w * scale - shift


# ---------------------------------------------------------------------------
# Wrapper: layout plumbing + pallas_call
# ---------------------------------------------------------------------------
def gated_ws_conv_padded(x_nchw, params, *, ks, stride=1, tm=512):
    # Standardize weights; fold the 1.8 output gain into the signal path.
    w_s = _standardize_weight(params["w_signal"], params["gain_signal"]) * 1.8
    w_g = _standardize_weight(params["w_gate"], params["gain_gate"])
    b_s = params["b_signal"].astype(jnp.float32) * 1.8
    b_g = params["b_gate"].astype(jnp.float32)

    n, c_in, h, w = x_nchw.shape
    out_ch = w_s.shape[0]
    pad = (ks - 1) // 2
    if pad >= h or pad >= w:
        raise ValueError("reflection pad requires pad < H and pad < W")

    # NHWC + reflection pad (matches torch.nn.ReflectionPad2d).
    x = jnp.transpose(x_nchw, (0, 2, 3, 1)).astype(jnp.float32)
    x_pad = jnp.pad(x, ((0, 0), (pad, pad), (pad, pad), (0, 0)), mode="reflect")
    hp, wp = h + 2 * pad, w + 2 * pad
    h1, w1 = hp - ks + 1, wp - ks + 1            # stride-1 valid output extent

    # Padded sizes: lane-dense output channels, 16-aligned input channels.
    c_pad = ((out_ch + 127) // 128) * 128
    c_in_p = ((c_in + 15) // 16) * 16

    m = n * hp * wp                              # one row per padded pixel
    # Keep >= 2 grid steps (feeds both v7x TensorCores) without tiny tiles.
    while tm > 256 and m <= tm:
        tm //= 2
    m_pad = ((m + tm - 1) // tm) * tm
    halo = (ks - 1) * wp + (ks - 1)
    win = tm + ((halo + 7) // 8) * 8             # 8-aligned window length
    mx = m_pad + (win - tm)

    x_flat = x_pad.reshape(m, c_in)
    x_flat = jnp.pad(x_flat, ((0, mx - m), (0, c_in_p - c_in)))

    # Weights: (o, c, ky, kx) -> (ky, kx, c, o), zero-pad c and o, fuse
    # signal|gate along the output axis, flatten taps, cast bf16.
    def to_mat(wt):
        wt = jnp.transpose(wt, (2, 3, 1, 0))                       # (ks, ks, c, o)
        return jnp.pad(wt, ((0, 0), (0, 0),
                            (0, c_in_p - c_in), (0, c_pad - out_ch)))

    w_fused = jnp.concatenate([to_mat(w_s), to_mat(w_g)], axis=-1)
    w_fused = w_fused.reshape(ks * ks * c_in_p, 2 * c_pad).astype(jnp.bfloat16)

    b_fused = jnp.concatenate([jnp.pad(b_s, (0, c_pad - out_ch)),
                               jnp.pad(b_g, (0, c_pad - out_ch))])
    b_fused = b_fused.reshape(1, 2 * c_pad).astype(jnp.float32)

    kernel = functools.partial(_gated_conv_kernel, tm=tm, c_in_p=c_in_p,
                               ks=ks, wp=wp, c_pad=c_pad, win=win)

    cost = pl.CostEstimate(
        flops=int(2 * m_pad * (ks * ks * c_in_p) * (2 * c_pad)),
        transcendentals=int(m_pad * c_pad),
        bytes_accessed=int(x_flat.size * 4 + w_fused.size * 2
                           + b_fused.size * 4 + m_pad * c_pad * 4))

    out = pl.pallas_call(
        kernel,
        out_shape=jax.ShapeDtypeStruct((m_pad, c_pad), jnp.float32),
        grid_spec=pltpu.PrefetchScalarGridSpec(
            num_scalar_prefetch=0,
            grid=(m_pad // tm,),
            in_specs=[
                pl.BlockSpec((mx, c_in_p), lambda i: (0, 0)),            # resident
                pl.BlockSpec((ks * ks * c_in_p, 2 * c_pad), lambda i: (0, 0)),
                pl.BlockSpec((1, 2 * c_pad), lambda i: (0, 0)),
            ],
            out_specs=pl.BlockSpec((tm, c_pad), lambda i: (i, 0)),
            scratch_shapes=[pltpu.VMEM((win, c_in_p), jnp.float32)],
        ),
        compiler_params=pltpu.CompilerParams(
            dimension_semantics=("parallel",),
            vmem_limit_bytes=48 * 1024 * 1024),
        cost_estimate=cost,
    )(x_flat, w_fused, b_fused)

    # Drop row/channel padding, keep only valid (strided) conv positions.
    out = out[:m, :out_ch].reshape(n, hp, wp, out_ch)
    out = out[:, :h1:stride, :w1:stride, :]
    return jnp.transpose(out, (0, 3, 1, 2))      # back to NCHW


# ---------------------------------------------------------------------------
# Pure-JAX reference (module semantics). quantize_bf16=True mirrors the
# kernel's bf16 MXU operands for a tight numerical check.
# ---------------------------------------------------------------------------
def reference(x_nchw, params, *, ks, stride=1, quantize_bf16=False):
    w_s = _standardize_weight(params["w_signal"], params["gain_signal"]) * 1.8
    w_g = _standardize_weight(params["w_gate"], params["gain_gate"])
    b_s = params["b_signal"].astype(jnp.float32) * 1.8
    b_g = params["b_gate"].astype(jnp.float32)

    pad = (ks - 1) // 2
    xp = jnp.pad(x_nchw.astype(jnp.float32),
                 ((0, 0), (0, 0), (pad, pad), (pad, pad)), mode="reflect")
    if quantize_bf16:
        xp = xp.astype(jnp.bfloat16).astype(jnp.float32)
        w_s = w_s.astype(jnp.bfloat16).astype(jnp.float32)
        w_g = w_g.astype(jnp.bfloat16).astype(jnp.float32)

    dn = lax.conv_dimension_numbers(xp.shape, w_s.shape, ("NCHW", "OIHW", "NCHW"))
    conv = lambda wt: lax.conv_general_dilated(
        xp, wt, (stride, stride), "VALID", dimension_numbers=dn,
        precision=lax.Precision.HIGHEST)
    sig = conv(w_s) + b_s.reshape(1, -1, 1, 1)
    gate = conv(w_g) + b_g.reshape(1, -1, 1, 1)
    return sig * jax.nn.sigmoid(gate)            # 1.8 already folded into signal


if __name__ == "__main__":
    N, IN_CH, OUT_CH, H, W, KS, STRIDE = 2, 4, 8, 16, 16, 3, 1

    key = jax.random.PRNGKey(0)
    kx_, kw1, kb1, kw2, kb2 = jax.random.split(key, 5)

    x = jax.random.normal(kx_, (N, IN_CH, H, W), dtype=jnp.float32)
    params = {
        "w_signal": 0.1 * jax.random.normal(kw1, (OUT_CH, IN_CH, KS, KS), jnp.float32),
        "b_signal": 0.05 * jax.random.normal(kb1, (OUT_CH,), jnp.float32),
        "gain_signal": jnp.ones((OUT_CH, 1, 1, 1), jnp.float32),
        "w_gate": 0.1 * jax.random.normal(kw2, (OUT_CH, IN_CH, KS, KS), jnp.float32),
        "b_gate": 0.05 * jax.random.normal(kb2, (OUT_CH,), jnp.float32),
        "gain_gate": jnp.ones((OUT_CH, 1, 1, 1), jnp.float32),
    }

    out = jax.block_until_ready(gated_ws_conv_padded(x, params, ks=KS, stride=STRIDE))

    ref_q = jax.block_until_ready(reference(x, params, ks=KS, stride=STRIDE,
                                            quantize_bf16=True))
    ref_f = jax.block_until_ready(reference(x, params, ks=KS, stride=STRIDE,
                                            quantize_bf16=False))

    assert out.shape == ref_f.shape == (N, OUT_CH, H, W)
    # Tight check vs bf16-operand reference (kernel math / indexing).
    assert jnp.allclose(out, ref_q, rtol=1e-3, atol=1e-3), (
        f"max abs err vs bf16 ref {jnp.max(jnp.abs(out - ref_q))}")
    # Loose check vs full-f32 module semantics (bounds bf16 quantization error).
    assert jnp.allclose(out, ref_f, rtol=1e-1, atol=1e-1), (
        f"max abs err vs f32 ref {jnp.max(jnp.abs(out - ref_f))}")

    print("KERNEL_OK")
</pallas_src>

<mosaic_0001>
module attributes {stable_mosaic.version = 11 : i64} {
  func.func @_gated_conv_kernel(%arg0: i32, %arg1: memref<1064x16xf32, #tpu.memory_space<vmem>>, %arg2: memref<144x256xbf16, #tpu.memory_space<vmem>>, %arg3: memref<1x256xf32, #tpu.memory_space<vmem>>, %arg4: memref<512x128xf32, #tpu.memory_space<vmem>>, %arg5: memref<552x16xf32, #tpu.memory_space<vmem>>) attributes {dimension_semantics = [#tpu.dimension_semantics<parallel>], iteration_bounds = array<i64: 2>, scalar_prefetch = 0 : i64, scratch_operands = 1 : i64, tpu.core_type = #tpu.core_type<tc>, window_params = [{pipeline_mode = #tpu.pipeline_mode<synchronous>, transform_indices = @transform_0, window_bounds = array<i64: 1064, 16>}, {pipeline_mode = #tpu.pipeline_mode<synchronous>, transform_indices = @transform_1, window_bounds = array<i64: 144, 256>}, {pipeline_mode = #tpu.pipeline_mode<synchronous>, transform_indices = @transform_2, window_bounds = array<i64: 1, 256>}, {transform_indices = @transform_3, window_bounds = array<i64: 512, 128>}]} {
    %c512_i32 = arith.constant 512 : i32
    %0 = arith.muli %arg0, %c512_i32 : i32
    %1 = tpu.assume_multiple %0, 512 : i32
    %2 = arith.index_cast %1 : i32 to index
    %c0 = arith.constant 0 : index
    %3 = vector.load %arg1[%2, %c0] : memref<1064x16xf32, #tpu.memory_space<vmem>>, vector<552x16xf32>
    %c0_0 = arith.constant 0 : index
    %c0_1 = arith.constant 0 : index
    %4 = vector.load %arg5[%c0_0, %c0_1] : memref<552x16xf32, #tpu.memory_space<vmem>>, vector<552x16xf32>
    tpu.vector_store %arg5[%c0_0, %c0_1], %3 {strides = array<i32>} : memref<552x16xf32, #tpu.memory_space<vmem>>, vector<552x16xf32>,
    %c0_2 = arith.constant 0 : index
    %c0_3 = arith.constant 0 : index
    %5 = vector.load %arg3[%c0_2, %c0_3] : memref<1x256xf32, #tpu.memory_space<vmem>>, vector<1x256xf32>
    %c0_4 = arith.constant 0 : index
    %c0_5 = arith.constant 0 : index
    %6 = vector.load %arg5[%c0_4, %c0_5] : memref<552x16xf32, #tpu.memory_space<vmem>>, vector<512x16xf32>
    %7 = arith.truncf %6 : vector<512x16xf32> to vector<512x16xbf16>
    %c0_6 = arith.constant 0 : index
    %c0_7 = arith.constant 0 : index
    %8 = vector.load %arg2[%c0_6, %c0_7] : memref<144x256xbf16, #tpu.memory_space<vmem>>, vector<16x256xbf16>
    %cst = arith.constant dense<0.000000e+00> : vector<512x256xf32>
    %9 = tpu.matmul %7, %8, %cst {dimension_numbers = #tpu.dot_dimension_numbers<[1], [0], [0], [1], [0, 0, 1, 1], [], []>} : vector<512x16xbf16>, vector<16x256xbf16>, vector<512x256xf32> -> vector<512x256xf32>
    %10 = vector.broadcast %5 : vector<1x256xf32> to vector<512x256xf32>
    %11 = arith.addf %10, %9 : vector<512x256xf32>
    %c1 = arith.constant 1 : index
    %c0_8 = arith.constant 0 : index
    %12 = vector.load %arg5[%c1, %c0_8] : memref<552x16xf32, #tpu.memory_space<vmem>>, vector<512x16xf32>
    %13 = arith.truncf %12 : vector<512x16xf32> to vector<512x16xbf16>
    %c16 = arith.constant 16 : index
    %c0_9 = arith.constant 0 : index
    %14 = vector.load %arg2[%c16, %c0_9] : memref<144x256xbf16, #tpu.memory_space<vmem>>, vector<16x256xbf16>
    %cst_10 = arith.constant dense<0.000000e+00> : vector<512x256xf32>
    %15 = tpu.matmul %13, %14, %cst_10 {dimension_numbers = #tpu.dot_dimension_numbers<[1], [0], [0], [1], [0, 0, 1, 1], [], []>} : vector<512x16xbf16>, vector<16x256xbf16>, vector<512x256xf32> -> vector<512x256xf32>
    %16 = arith.addf %11, %15 : vector<512x256xf32>
    %c2 = arith.constant 2 : index
    %c0_11 = arith.constant 0 : index
    %17 = vector.load %arg5[%c2, %c0_11] : memref<552x16xf32, #tpu.memory_space<vmem>>, vector<512x16xf32>
    %18 = arith.truncf %17 : vector<512x16xf32> to vector<512x16xbf16>
    %c32 = arith.constant 32 : index
    %c0_12 = arith.constant 0 : index
    %19 = vector.load %arg2[%c32, %c0_12] : memref<144x256xbf16, #tpu.memory_space<vmem>>, vector<16x256xbf16>
    %cst_13 = arith.constant dense<0.000000e+00> : vector<512x256xf32>
    %20 = tpu.matmul %18, %19, %cst_13 {dimension_numbers = #tpu.dot_dimension_numbers<[1], [0], [0], [1], [0, 0, 1, 1], [], []>} : vector<512x16xbf16>, vector<16x256xbf16>, vector<512x256xf32> -> vector<512x256xf32>
    %21 = arith.addf %16, %20 : vector<512x256xf32>
    %c18 = arith.constant 18 : index
    %c0_14 = arith.constant 0 : index
    %22 = vector.load %arg5[%c18, %c0_14] : memref<552x16xf32, #tpu.memory_space<vmem>>, vector<512x16xf32>
    %23 = arith.truncf %22 : vector<512x16xf32> to vector<512x16xbf16>
    %c48 = arith.constant 48 : index
    %c0_15 = arith.constant 0 : index
    %24 = vector.load %arg2[%c48, %c0_15] : memref<144x256xbf16, #tpu.memory_space<vmem>>, vector<16x256xbf16>
    %cst_16 = arith.constant dense<0.000000e+00> : vector<512x256xf32>
    %25 = tpu.matmul %23, %24, %cst_16 {dimension_numbers = #tpu.dot_dimension_numbers<[1], [0], [0], [1], [0, 0, 1, 1], [], []>} : vector<512x16xbf16>, vector<16x256xbf16>, vector<512x256xf32> -> vector<512x256xf32>
    %26 = arith.addf %21, %25 : vector<512x256xf32>
    %c19 = arith.constant 19 : index
    %c0_17 = arith.constant 0 : index
    %27 = vector.load %arg5[%c19, %c0_17] : memref<552x16xf32, #tpu.memory_space<vmem>>, vector<512x16xf32>
    %28 = arith.truncf %27 : vector<512x16xf32> to vector<512x16xbf16>
    %c64 = arith.constant 64 : index
    %c0_18 = arith.constant 0 : index
    %29 = vector.load %arg2[%c64, %c0_18] : memref<144x256xbf16, #tpu.memory_space<vmem>>, vector<16x256xbf16>
    %cst_19 = arith.constant dense<0.000000e+00> : vector<512x256xf32>
    %30 = tpu.matmul %28, %29, %cst_19 {dimension_numbers = #tpu.dot_dimension_numbers<[1], [0], [0], [1], [0, 0, 1, 1], [], []>} : vector<512x16xbf16>, vector<16x256xbf16>, vector<512x256xf32> -> vector<512x256xf32>
    %31 = arith.addf %26, %30 : vector<512x256xf32>
    %c20 = arith.constant 20 : index
    %c0_20 = arith.constant 0 : index
    %32 = vector.load %arg5[%c20, %c0_20] : memref<552x16xf32, #tpu.memory_space<vmem>>, vector<512x16xf32>
    %33 = arith.truncf %32 : vector<512x16xf32> to vector<512x16xbf16>
    %c80 = arith.constant 80 : index
    %c0_21 = arith.constant 0 : index
    %34 = vector.load %arg2[%c80, %c0_21] : memref<144x256xbf16, #tpu.memory_space<vmem>>, vector<16x256xbf16>
    %cst_22 = arith.constant dense<0.000000e+00> : vector<512x256xf32>
    %35 = tpu.matmul %33, %34, %cst_22 {dimension_numbers = #tpu.dot_dimension_numbers<[1], [0], [0], [1], [0, 0, 1, 1], [], []>} : vector<512x16xbf16>, vector<16x256xbf16>, vector<512x256xf32> -> vector<512x256xf32>
    %36 = arith.addf %31, %35 : vector<512x256xf32>
    %c36 = arith.constant 36 : index
    %c0_23 = arith.constant 0 : index
    %37 = vector.load %arg5[%c36, %c0_23] : memref<552x16xf32, #tpu.memory_space<vmem>>, vector<512x16xf32>
    %38 = arith.truncf %37 : vector<512x16xf32> to vector<512x16xbf16>
    %c96 = arith.constant 96 : index
    %c0_24 = arith.constant 0 : index
    %39 = vector.load %arg2[%c96, %c0_24] : memref<144x256xbf16, #tpu.memory_space<vmem>>, vector<16x256xbf16>
    %cst_25 = arith.constant dense<0.000000e+00> : vector<512x256xf32>
    %40 = tpu.matmul %38, %39, %cst_25 {dimension_numbers = #tpu.dot_dimension_numbers<[1], [0], [0], [1], [0, 0, 1, 1], [], []>} : vector<512x16xbf16>, vector<16x256xbf16>, vector<512x256xf32> -> vector<512x256xf32>
    %41 = arith.addf %36, %40 : vector<512x256xf32>
    %c37 = arith.constant 37 : index
    %c0_26 = arith.constant 0 : index
    %42 = vector.load %arg5[%c37, %c0_26] : memref<552x16xf32, #tpu.memory_space<vmem>>, vector<512x16xf32>
    %43 = arith.truncf %42 : vector<512x16xf32> to vector<512x16xbf16>
    %c112 = arith.constant 112 : index
    %c0_27 = arith.constant 0 : index
    %44 = vector.load %arg2[%c112, %c0_27] : memref<144x256xbf16, #tpu.memory_space<vmem>>, vector<16x256xbf16>
    %cst_28 = arith.constant dense<0.000000e+00> : vector<512x256xf32>
    %45 = tpu.matmul %43, %44, %cst_28 {dimension_numbers = #tpu.dot_dimension_numbers<[1], [0], [0], [1], [0, 0, 1, 1], [], []>} : vector<512x16xbf16>, vector<16x256xbf16>, vector<512x256xf32> -> vector<512x256xf32>
    %46 = arith.addf %41, %45 : vector<512x256xf32>
    %c38 = arith.constant 38 : index
    %c0_29 = arith.constant 0 : index
    %47 = vector.load %arg5[%c38, %c0_29] : memref<552x16xf32, #tpu.memory_space<vmem>>, vector<512x16xf32>
    %48 = arith.truncf %47 : vector<512x16xf32> to vector<512x16xbf16>
    %c128 = arith.constant 128 : index
    %c0_30 = arith.constant 0 : index
    %49 = vector.load %arg2[%c128, %c0_30] : memref<144x256xbf16, #tpu.memory_space<vmem>>, vector<16x256xbf16>
    %cst_31 = arith.constant dense<0.000000e+00> : vector<512x256xf32>
    %50 = tpu.matmul %48, %49, %cst_31 {dimension_numbers = #tpu.dot_dimension_numbers<[1], [0], [0], [1], [0, 0, 1, 1], [], []>} : vector<512x16xbf16>, vector<16x256xbf16>, vector<512x256xf32> -> vector<512x256xf32>
    %51 = arith.addf %46, %50 : vector<512x256xf32>
    %52 = vector.extract_strided_slice %51 {offsets = [0, 0], sizes = [512, 128], strides = [1, 1]} : vector<512x256xf32> to vector<512x128xf32>
    %53 = vector.extract_strided_slice %51 {offsets = [0, 128], sizes = [512, 128], strides = [1, 1]} : vector<512x256xf32> to vector<512x128xf32>
    %54 = arith.negf %53 : vector<512x128xf32>
    %55 = math.exp %54 : vector<512x128xf32>
    %cst_32 = arith.constant 1.000000e+00 : f32
    %56 = vector.broadcast %cst_32 : f32 to vector<512x128xf32>
    %57 = arith.addf %56, %55 : vector<512x128xf32>
    %58 = arith.divf %56, %57 : vector<512x128xf32>
    %59 = arith.mulf %52, %58 : vector<512x128xf32>
    %c0_33 = arith.constant 0 : index
    %c0_34 = arith.constant 0 : index
    %60 = vector.load %arg4[%c0_33, %c0_34] : memref<512x128xf32, #tpu.memory_space<vmem>>, vector<512x128xf32>
    tpu.vector_store %arg4[%c0_33, %c0_34], %59 {strides = array<i32>} : memref<512x128xf32, #tpu.memory_space<vmem>>, vector<512x128xf32>,
    return
  }
  func.func @transform_0(%arg0: i32) -> (i32, i32) {
    %c0_i32 = arith.constant 0 : i32
    %c0_i32_0 = arith.constant 0 : i32
    %c0_i32_1 = arith.constant 0 : i32
    return %c0_i32, %c0_i32_0 : i32, i32
  }
  func.func @transform_1(%arg0: i32) -> (i32, i32) {
    %c0_i32 = arith.constant 0 : i32
    %c0_i32_0 = arith.constant 0 : i32
    %c0_i32_1 = arith.constant 0 : i32
    return %c0_i32, %c0_i32_0 : i32, i32
  }
  func.func @transform_2(%arg0: i32) -> (i32, i32) {
    %c0_i32 = arith.constant 0 : i32
    %c0_i32_0 = arith.constant 0 : i32
    %c0_i32_1 = arith.constant 0 : i32
    return %c0_i32, %c0_i32_0 : i32, i32
  }
  func.func @transform_3(%arg0: i32) -> (i32, i32) {
    %c0_i32 = arith.constant 0 : i32
    %c0_i32_0 = arith.constant 0 : i32
    return %arg0, %c0_i32 : i32, i32
  }
}

</mosaic_0001>

<bundles_post_ra>
// kernel: tpu_custom_call.1
= control target key start
LH: loop header
LB: loop body
LE: loop exit
PB: predicated region body
PF: predicated region fallthrough
CT: control target
= control target key end

     0   :  { %8 = vsyncpa [#allocation4], 0  ;;  %s10707_s0 = inlined_call_operand.vmem [shape: f32[1064,16], index: 0, kind: input, shape index: {}]   ;;  %s10708_s1 = inlined_call_operand.vmem [shape: bf16[144,256], index: 1, kind: input, shape index: {}]   ;;  %s10709_s2 = inlined_call_operand.vmem [shape: f32[1,256], index: 2, kind: input, shape index: {}]   ;;  %s10710_s3 = inlined_call_operand.hbm [shape: f32[1024,128], index: 3, kind: output, shape index: {}]  }
   0x1   :  { %10 = vsyncpa [#allocation4 + $0x1], 0  ;;  %s8997_s12 = smov 0   ;;  %s8999_s13 = smov 0  }
   0x2   :  { %s9001_s14 = smov 0   ;;  %s9003_s15 = smov 0  }
   0x3 LB: > { %s9018_s16 = sadd.s32 4294967295, %s8971_s15   ;;  %s7047_s17 = sadd.s32 4294967294, %s8971_s15   ;;  %s8971_s15 = sphi %s9003_s15, %s10761_s15   ;;  %s8967_s14 = sphi %s9001_s14, %s10760_s14   ;;  %s8963_s13 = sphi %s8999_s13, %s10759_s13   ;;  %s8959_s12 = sphi %s8997_s12, %s10758_s12  }
   0x4   : > { %s9022_s18 = sadd.s32 1, %s8971_s15   ;;  %s86_s19 = sadd.s32 1, %s8967_s14 }
   0x5   : > { %s83_s20 = ssub.s32 %s8971_s15, %s9022_s18  ;;  %p96_p0 = scmp.ne.s32.totalorder %s8967_s14, %s8963_s13 }
   0x6   : > { %p84_p1 = scmp.eq.s32.totalorder %s83_s20, 0  ;;  %p97_p2 = scmp.eq.s32.totalorder %s9018_s16, 1 }
   0x7   : > { %p102_p3 = scmp.ne.s32.totalorder %s8963_s13, %s8959_s12  ;;  %p103_p4 = scmp.eq.s32.totalorder %s7047_s17, 1 }
   0x8   : > { %s9033_s21 = scalar_select %p84_p1, %s8967_s14, %s86_s19  }
   0x9   : > { %p9035_p5 = por %p97_p2, %p96_p0  ;;  %p9039_p6 = por %p103_p4, %p102_p3 }
   0xa   : > { %p7049_p7 = scmp.ge.s32.totalorder %s8971_s15, 1  ;;  %p130_p8 = scmp.lt.s32.totalorder %s8971_s15, 3 }
   0xc   : > { %p131_p9 = pnand %p7049_p7, %p130_p8 }
   0xe   : > { %134 = sbr.rel (%p131_p9) target bundleno = 1444 (0x5a4), region = 32 }
  0x15   : > { %v8624_v0 = vld [vmem:[%s10708_s1 + $0x4] ss:$8 sps:$4 sm:$0xff]   ;;  %s7051_s26 = sshll.u32 %s9018_s16, 9  ;;  %v8626_v1 = vld [vmem:[%s10708_s1] ss:$8 sps:$4 sm:$0xff]   ;;  %v10711_v2 = vmov 0  }
  0x16   : > { %529 = vmatprep.mubr.bf16.mxu1 %v10711_v2  ;;  %3280 = vmatprep.mubr.bf16.mxu0 %v10711_v2  ;;  %s9057_s4 = scalar_lea.vmem %s10707_s0, %s7051_s26  ;;  %v8627_v3 = vld [vmem:[%s10708_s1 + $0x44] ss:$8 sps:$4 sm:$0xff]   ;;  %v8629_v4 = vld [vmem:[%s10708_s1 + $0x40] ss:$8 sps:$4 sm:$0xff]   ;;  %vm222_vm0 = vcmask 130048   ;;  %s146_s8 = sand.u32 1, %s8963_s13  }
  0x17   : > { %497 = vmatprep.subr.bf16.mxu1 %v8624_v0  ;;  %v8632_v5 = vld [vmem:[%s10708_s1 + $0x14] ss:$8 sps:$4 sm:$0xff]   ;;  %3248 = vmatprep.subr.bf16.mxu0 %v8627_v3  ;;  %v153_v6 = vld [vmem:[%s9057_s4] sm:$0xff]  ;;  %v154_v7 = vld [vmem:[%s9057_s4 + $0x8] sm:$0xff]  ;;  %s7050_s9 = sshll.u32 %s146_s8, 9  ;;  %s7427_s11 = sshll.u32 %s9018_s16, 13 }
  0x18   : > { %498 = vmatpush1.bf16.msra.mxu1 %v8626_v1  ;;  %v155_v8 = vld [vmem:[%s9057_s4 + $0x10] sm:$0xff]  ;;  %3249 = vmatpush1.bf16.msra.mxu0 %v8629_v4  ;;  %223 = vst.msk [vmem:[#allocation2] sm:$0xff] %vm222_vm0, %v153_v6  ;;  %224 = vst.msk [vmem:[#allocation2 + $0x8] sm:$0xff] %vm222_vm0, %v154_v7  ;;  %v156_v9 = vld [vmem:[%s9057_s4 + $0x18] sm:$0xff]  ;;  %s10262_s10 = scalar_lea.vmem [#allocation3], %s7050_s9  ;;  %s10658_s20 = scalar_lea.hbm %s10710_s3, %s7427_s11 }
  0x19   : > { %1193 = vmatprep.subr.bf16.mxu1 %v8632_v5  ;;  %v157_v10 = vld [vmem:[%s9057_s4 + $0x20] sm:$0xff]  ;;  %225 = vst.msk [vmem:[#allocation2 + $0x10] sm:$0xff] %vm222_vm0, %v155_v8  ;;  %226 = vst.msk [vmem:[#allocation2 + $0x18] sm:$0xff] %vm222_vm0, %v156_v9  ;;  %v8635_v11 = vld [vmem:[%s10708_s1 + $0x54] ss:$8 sps:$4 sm:$0xff]   ;;  %s6995_s17 = sshll.u32 %s10262_s10, 4  ;;  %s10660_s17 = int_to_ptr.vmem [resolvable:$true] %s6995_s17 }
  0x1a   : > { %227 = vst.msk [vmem:[#allocation2 + $0x20] sm:$0xff] %vm222_vm0, %v157_v10  ;;  %v158_v12 = vld [vmem:[%s9057_s4 + $0x28] sm:$0xff]  ;;  %v159_v13 = vld [vmem:[%s9057_s4 + $0x30] sm:$0xff]  ;;  %v160_v14 = vld [vmem:[%s9057_s4 + $0x38] sm:$0xff]  ;;  %3933 = vmatprep.subr.bf16.mxu0 %v8635_v11  ;;  %s10666_s24 = scalar_lea.sflag [#allocation4], %s146_s8  ;;  %s8909_s16 = scalar_lea.vmem %s10660_s17, 8192 }
  0x1b   : > { %228 = vst.msk [vmem:[#allocation2 + $0x28] sm:$0xff] %vm222_vm0, %v158_v12  ;;  %229 = vst.msk [vmem:[#allocation2 + $0x30] sm:$0xff] %vm222_vm0, %v159_v13  ;;  %v161_v15 = vld [vmem:[%s9057_s4 + $0x40] sm:$0xff]  ;;  %v162_v16 = vld [vmem:[%s9057_s4 + $0x48] sm:$0xff]  ;;  %p8910_p10 = scmp.ne.s32.totalorder %s10660_s17, %s8909_s16  ;;  %s8974_s25 = smov [#allocation3]  }
  0x1c   : > { %230 = vst.msk [vmem:[#allocation2 + $0x38] sm:$0xff] %vm222_vm0, %v160_v14  ;;  %v163_v17 = vld [vmem:[%s9057_s4 + $0x50] sm:$0xff]  ;;  %231 = vst.msk [vmem:[#allocation2 + $0x40] sm:$0xff] %vm222_vm0, %v161_v15  ;;  %v164_v18 = vld [vmem:[%s9057_s4 + $0x58] sm:$0xff]  ;;  %s8913_s26 = sshll.u32 %s8974_s25, 4  ;;  %s8914_s26 = int_to_ptr.vmem [resolvable:$false] %s8913_s26 }
  0x1d   : > { %232 = vst.msk [vmem:[#allocation2 + $0x48] sm:$0xff] %vm222_vm0, %v162_v16  ;;  %233 = vst.msk [vmem:[#allocation2 + $0x50] sm:$0xff] %vm222_vm0, %v163_v17  ;;  %v165_v19 = vld [vmem:[%s9057_s4 + $0x60] sm:$0xff]  ;;  %v166_v20 = vld [vmem:[%s9057_s4 + $0x68] sm:$0xff]  ;;  %p8911_p11 = pnand %p8910_p10, %p9035_p5  ;;  %s8915_s27 = scalar_lea.vmem %s8914_s26, 16384 }
  0x1e   : > { %234 = vst.msk [vmem:[#allocation2 + $0x58] sm:$0xff] %vm222_vm0, %v164_v18  ;;  %235 = vst.msk [vmem:[#allocation2 + $0x60] sm:$0xff] %vm222_vm0, %v165_v19  ;;  %v167_v21 = vld [vmem:[%s9057_s4 + $0x70] sm:$0xff]  ;;  %v168_v22 = vld [vmem:[%s9057_s4 + $0x78] sm:$0xff]  ;;  %p8916_p13 = scmp.lt.s32.totalorder %s10660_s17, %s8914_s26  ;;  %p8917_p0 = scmp.lt.s32.totalorder %s8915_s27, %s8909_s16 }
  0x1f   : > { %236 = vst.msk [vmem:[#allocation2 + $0x68] sm:$0xff] %vm222_vm0, %v166_v20  ;;  %v169_v23 = vld [vmem:[%s9057_s4 + $0x80] sm:$0xff]  ;;  %237 = vst.msk [vmem:[#allocation2 + $0x70] sm:$0xff] %vm222_vm0, %v167_v21  ;;  %v170_v24 = vld [vmem:[%s9057_s4 + $0x88] sm:$0xff]  ;;  %p8912_p12 = pneg %p8911_p11 }
  0x20   : > { %238 = vst.msk [vmem:[#allocation2 + $0x78] sm:$0xff] %vm222_vm0, %v168_v22  ;;  %239 = vst.msk [vmem:[#allocation2 + $0x80] sm:$0xff] %vm222_vm0, %v169_v23  ;;  %v171_v25 = vld [vmem:[%s9057_s4 + $0x90] sm:$0xff]  ;;  %v172_v26 = vld [vmem:[%s9057_s4 + $0x98] sm:$0xff]  ;;  %p8918_p1 = por %p8917_p0, %p8916_p13 }
  0x21   : > { %v8630_v27 = vld [vmem:[%s10708_s1 + $0x10] ss:$8 sps:$4 sm:$0xff]   ;;  %v293_v28 = vld [vmem:[#allocation2] sm:$0xff]  ;;  %240 = vst.msk [vmem:[#allocation2 + $0x88] sm:$0xff] %vm222_vm0, %v170_v24  ;;  %241 = vst.msk [vmem:[#allocation2 + $0x90] sm:$0xff] %vm222_vm0, %v171_v25 }
  0x22   : > { %v294_v29 = vld [vmem:[#allocation2 + $0x8] sm:$0xff]  ;;  %242 = vst.msk [vmem:[#allocation2 + $0x98] sm:$0xff] %vm222_vm0, %v172_v26  ;;  %v3044_v31 = vld [vmem:[#allocation2 + $0x13] sm:$0xff]  ;;  %v3045_v32 = vld [vmem:[#allocation2 + $0x1b] sm:$0xff]  ;;  %p8919_p2 = pnand %p8918_p1, %p8912_p12 }
  0x23   : > { %v357_v30 = vpack.c.bf16 %v294_v29, %v293_v28  ;;  %v8633_v33 = vld [vmem:[%s10708_s1 + $0x50] ss:$8 sps:$4 sm:$0xff]   ;;  %v3108_v34 = vpack.c.bf16 %v3045_v32, %v3044_v31  ;;  %v173_v35 = vld [vmem:[%s9057_s4 + $0xa0] sm:$0xff]  ;;  %v174_v36 = vld [vmem:[%s9057_s4 + $0xa8] sm:$0xff] }
  0x24   : > { %243 = vst.msk [vmem:[#allocation2 + $0xa0] sm:$0xff] %vm222_vm0, %v173_v35  ;;  %244 = vst.msk [vmem:[#allocation2 + $0xa8] sm:$0xff] %vm222_vm0, %v174_v36  ;;  %v295_v37 = vld [vmem:[#allocation2 + $0x10] sm:$0xff]  ;;  %v296_v38 = vld [vmem:[#allocation2 + $0x18] sm:$0xff] }
  0x25   : > { %7054 = vmatmul.mubr.msk.bf16.vlgmr.msra.gmra.mrb[0].mxu1 %vm222_vm0, %v357_v30  ;;  %7190 = vmatmul.mubr.msk.bf16.vlgmr.msra.gmra.mrb[0].mxu0 %vm222_vm0, %v3108_v34  ;;  %v3046_v39 = vld [vmem:[#allocation2 + $0x23] sm:$0xff]  ;;  %v3047_v40 = vld [vmem:[#allocation2 + $0x2b] sm:$0xff]  ;;  %v358_v41 = vpack.c.bf16 %v296_v38, %v295_v37  ;;  %v3048_v45 = vld [vmem:[#allocation2 + $0x33] sm:$0xff] }
  0x26   : > { %1194 = vmatpush1.bf16.msra.mxu1 %v8630_v27  ;;  %3934 = vmatpush1.bf16.msra.mxu0 %v8633_v33  ;;  %v3109_v42 = vpack.c.bf16 %v3047_v40, %v3046_v39  ;;  %v297_v43 = vld [vmem:[#allocation2 + $0x20] sm:$0xff]  ;;  %v298_v44 = vld [vmem:[#allocation2 + $0x28] sm:$0xff]  ;;  %v176_v48 = vld [vmem:[%s9057_s4 + $0xb8] sm:$0xff] }
  0x27   : > { %539 = vmatprep.mubr.bf16.mxu1 %v10711_v2  ;;  %3290 = vmatprep.mubr.bf16.mxu0 %v10711_v2  ;;  %v3049_v46 = vld [vmem:[#allocation2 + $0x3b] sm:$0xff]  ;;  %v175_v47 = vld [vmem:[%s9057_s4 + $0xb0] sm:$0xff]  ;;  %v359_v49 = vpack.c.bf16 %v298_v44, %v297_v43  ;;  %246 = vst.msk [vmem:[#allocation2 + $0xb8] sm:$0xff] %vm222_vm0, %v176_v48  ;;  %v180_v54 = vld [vmem:[%s9057_s4 + $0xd8] sm:$0xff] }
  0x28   : > { %245 = vst.msk [vmem:[#allocation2 + $0xb0] sm:$0xff] %vm222_vm0, %v175_v47  ;;  %v177_v50 = vld [vmem:[%s9057_s4 + $0xc0] sm:$0xff]  ;;  %v178_v51 = vld [vmem:[%s9057_s4 + $0xc8] sm:$0xff]  ;;  %v179_v52 = vld [vmem:[%s9057_s4 + $0xd0] sm:$0xff]  ;;  %v3110_v53 = vpack.c.bf16 %v3049_v46, %v3048_v45 }
  0x29   : > { %247 = vst.msk [vmem:[#allocation2 + $0xc0] sm:$0xff] %vm222_vm0, %v177_v50  ;;  %248 = vst.msk [vmem:[#allocation2 + $0xc8] sm:$0xff] %vm222_vm0, %v178_v51  ;;  %v181_v55 = vld [vmem:[%s9057_s4 + $0xe0] sm:$0xff]  ;;  %v182_v56 = vld [vmem:[%s9057_s4 + $0xe8] sm:$0xff] }
  0x2a   : > { %249 = vst.msk [vmem:[#allocation2 + $0xd0] sm:$0xff] %vm222_vm0, %v179_v52  ;;  %250 = vst.msk [vmem:[#allocation2 + $0xd8] sm:$0xff] %vm222_vm0, %v180_v54  ;;  %v183_v57 = vld [vmem:[%s9057_s4 + $0xf0] sm:$0xff]  ;;  %v184_v58 = vld [vmem:[%s9057_s4 + $0xf8] sm:$0xff] }
  0x2b   : > { %251 = vst.msk [vmem:[#allocation2 + $0xe0] sm:$0xff] %vm222_vm0, %v181_v55  ;;  %252 = vst.msk [vmem:[#allocation2 + $0xe8] sm:$0xff] %vm222_vm0, %v182_v56  ;;  %v185_v59 = vld [vmem:[%s9057_s4 + $0x100] sm:$0xff]  ;;  %v186_v60 = vld [vmem:[%s9057_s4 + $0x108] sm:$0xff] }
  0x2c   : > { %253 = vst.msk [vmem:[#allocation2 + $0xf0] sm:$0xff] %vm222_vm0, %v183_v57  ;;  %254 = vst.msk [vmem:[#allocation2 + $0xf8] sm:$0xff] %vm222_vm0, %v184_v58  ;;  %v187_v61 = vld [vmem:[%s9057_s4 + $0x110] sm:$0xff]  ;;  %v299_v62 = vld [vmem:[#allocation2 + $0x30] sm:$0xff] }
  0x2d   : > { %7055 = vmatmul.mubr.msk.bf16.gmra.mrb[4].mxu1 %vm222_vm0, %v358_v41  ;;  %7191 = vmatmul.mubr.msk.bf16.gmra.mrb[4].mxu0 %vm222_vm0, %v3109_v42  ;;  %255 = vst.msk [vmem:[#allocation2 + $0x100] sm:$0xff] %vm222_vm0, %v185_v59  ;;  %256 = vst.msk [vmem:[#allocation2 + $0x108] sm:$0xff] %vm222_vm0, %v186_v60  ;;  %v300_v63 = vld [vmem:[#allocation2 + $0x38] sm:$0xff]  ;;  %v188_v1 = vld [vmem:[%s9057_s4 + $0x118] sm:$0xff] }
  0x2e   : > { %549 = vmatprep.mubr.bf16.mxu1 %v10711_v2  ;;  %3300 = vmatprep.mubr.bf16.mxu0 %v10711_v2  ;;  %257 = vst.msk [vmem:[#allocation2 + $0x110] sm:$0xff] %vm222_vm0, %v187_v61  ;;  %v8638_v0 = vld [vmem:[%s10708_s1 + $0x64] ss:$8 sps:$4 sm:$0xff]   ;;  %v3051_v4 = vld [vmem:[#allocation2 + $0x4b] sm:$0xff]  ;;  %258 = vst.msk [vmem:[#allocation2 + $0x118] sm:$0xff] %vm222_vm0, %v188_v1  ;;  %v360_v5 = vpack.c.bf16 %v300_v63, %v299_v62 }
  0x2f   : > { %v3050_v3 = vld [vmem:[#allocation2 + $0x43] sm:$0xff]  ;;  %4618 = vmatprep.subr.bf16.mxu0 %v8638_v0  ;;  %v3052_v9 = vld [vmem:[#allocation2 + $0x53] sm:$0xff]  ;;  %v3053_v10 = vld [vmem:[#allocation2 + $0x5b] sm:$0xff] }
  0x30   : > { %v3111_v6 = vpack.c.bf16 %v3051_v4, %v3050_v3  ;;  %v301_v7 = vld [vmem:[#allocation2 + $0x40] sm:$0xff]  ;;  %v302_v8 = vld [vmem:[#allocation2 + $0x48] sm:$0xff]  ;;  %v189_v11 = vld [vmem:[%s9057_s4 + $0x120] sm:$0xff]  ;;  %v3112_v14 = vpack.c.bf16 %v3053_v10, %v3052_v9 }
  0x31   : > { %v361_v12 = vpack.c.bf16 %v302_v8, %v301_v7  ;;  %v190_v13 = vld [vmem:[%s9057_s4 + $0x128] sm:$0xff]  ;;  %259 = vst.msk [vmem:[#allocation2 + $0x120] sm:$0xff] %vm222_vm0, %v189_v11  ;;  %v191_v15 = vld [vmem:[%s9057_s4 + $0x130] sm:$0xff]  ;;  %v192_v16 = vld [vmem:[%s9057_s4 + $0x138] sm:$0xff] }
  0x32   : > { %260 = vst.msk [vmem:[#allocation2 + $0x128] sm:$0xff] %vm222_vm0, %v190_v13  ;;  %261 = vst.msk [vmem:[#allocation2 + $0x130] sm:$0xff] %vm222_vm0, %v191_v15  ;;  %v193_v17 = vld [vmem:[%s9057_s4 + $0x140] sm:$0xff]  ;;  %v194_v18 = vld [vmem:[%s9057_s4 + $0x148] sm:$0xff] }
  0x33   : > { %262 = vst.msk [vmem:[#allocation2 + $0x138] sm:$0xff] %vm222_vm0, %v192_v16  ;;  %v303_v19 = vld [vmem:[#allocation2 + $0x50] sm:$0xff]  ;;  %v304_v20 = vld [vmem:[#allocation2 + $0x58] sm:$0xff]  ;;  %263 = vst.msk [vmem:[#allocation2 + $0x140] sm:$0xff] %vm222_vm0, %v193_v17 }
  0x34   : > { %264 = vst.msk [vmem:[#allocation2 + $0x148] sm:$0xff] %vm222_vm0, %v194_v18  ;;  %v195_v21 = vld [vmem:[%s9057_s4 + $0x150] sm:$0xff]  ;;  %v196_v24 = vld [vmem:[%s9057_s4 + $0x158] sm:$0xff]  ;;  %v362_v25 = vpack.c.bf16 %v304_v20, %v303_v19  ;;  %v197_v27 = vld [vmem:[%s9057_s4 + $0x160] sm:$0xff] }
  0x35   : > { %7056 = vmatmul.mubr.msk.bf16.gmra.mrb[8].mxu1 %vm222_vm0, %v359_v49  ;;  %7192 = vmatmul.mubr.msk.bf16.gmra.mrb[8].mxu0 %vm222_vm0, %v3110_v53  ;;  %v3054_v22 = vld [vmem:[#allocation2 + $0x63] sm:$0xff]  ;;  %v3055_v23 = vld [vmem:[#allocation2 + $0x6b] sm:$0xff]  ;;  %265 = vst.msk [vmem:[#allocation2 + $0x150] sm:$0xff] %vm222_vm0, %v195_v21  ;;  %266 = vst.msk [vmem:[#allocation2 + $0x158] sm:$0xff] %vm222_vm0, %v196_v24 }
  0x36   : > { %559 = vmatprep.mubr.bf16.mxu1 %v10711_v2  ;;  %3310 = vmatprep.mubr.bf16.mxu0 %v10711_v2  ;;  %v3113_v26 = vpack.c.bf16 %v3055_v23, %v3054_v22  ;;  %v198_v28 = vld [vmem:[%s9057_s4 + $0x168] sm:$0xff]  ;;  %267 = vst.msk [vmem:[#allocation2 + $0x160] sm:$0xff] %vm222_vm0, %v197_v27  ;;  %v306_v30 = vld [vmem:[#allocation2 + $0x68] sm:$0xff]  ;;  %v3056_v31 = vld [vmem:[#allocation2 + $0x73] sm:$0xff] }
  0x37   : > { %v305_v29 = vld [vmem:[#allocation2 + $0x60] sm:$0xff]  ;;  %268 = vst.msk [vmem:[#allocation2 + $0x168] sm:$0xff] %vm222_vm0, %v198_v28  ;;  %v199_v35 = vld [vmem:[%s9057_s4 + $0x170] sm:$0xff]  ;;  %v200_v36 = vld [vmem:[%s9057_s4 + $0x178] sm:$0xff] }
  0x38   : > { %v3057_v32 = vld [vmem:[#allocation2 + $0x7b] sm:$0xff]  ;;  %v363_v33 = vpack.c.bf16 %v306_v30, %v305_v29  ;;  %269 = vst.msk [vmem:[#allocation2 + $0x170] sm:$0xff] %vm222_vm0, %v199_v35  ;;  %270 = vst.msk [vmem:[#allocation2 + $0x178] sm:$0xff] %vm222_vm0, %v200_v36  ;;  %v307_v37 = vld [vmem:[#allocation2 + $0x70] sm:$0xff] }
  0x39   : > { %v3114_v34 = vpack.c.bf16 %v3057_v32, %v3056_v31  ;;  %v308_v38 = vld [vmem:[#allocation2 + $0x78] sm:$0xff]  ;;  %v3058_v39 = vld [vmem:[#allocation2 + $0x83] sm:$0xff]  ;;  %v3059_v40 = vld [vmem:[#allocation2 + $0x8b] sm:$0xff] }
  0x3a   : > { %v364_v41 = vpack.c.bf16 %v308_v38, %v307_v37  ;;  %v3115_v42 = vpack.c.bf16 %v3059_v40, %v3058_v39  ;;  %v201_v43 = vld [vmem:[%s9057_s4 + $0x180] sm:$0xff]  ;;  %v202_v44 = vld [vmem:[%s9057_s4 + $0x188] sm:$0xff]  ;;  %v310_v46 = vld [vmem:[#allocation2 + $0x88] sm:$0xff] }
  0x3b   : > { %271 = vst.msk [vmem:[#allocation2 + $0x180] sm:$0xff] %vm222_vm0, %v201_v43  ;;  %272 = vst.msk [vmem:[#allocation2 + $0x188] sm:$0xff] %vm222_vm0, %v202_v44  ;;  %v309_v45 = vld [vmem:[#allocation2 + $0x80] sm:$0xff]  ;;  %v3060_v47 = vld [vmem:[#allocation2 + $0x93] sm:$0xff] }
  0x3c   : > { %v3061_v48 = vld [vmem:[#allocation2 + $0x9b] sm:$0xff]  ;;  %v365_v49 = vpack.c.bf16 %v310_v46, %v309_v45  ;;  %v203_v51 = vld [vmem:[%s9057_s4 + $0x190] sm:$0xff]  ;;  %v204_v52 = vld [vmem:[%s9057_s4 + $0x198] sm:$0xff] }
  0x3d   : > { %7057 = vmatmul.mubr.msk.bf16.gmra.mrb[12].mxu1 %vm222_vm0, %v360_v5  ;;  %7193 = vmatmul.mubr.msk.bf16.gmra.mrb[12].mxu0 %vm222_vm0, %v3111_v6  ;;  %v3116_v50 = vpack.c.bf16 %v3061_v48, %v3060_v47  ;;  %273 = vst.msk [vmem:[#allocation2 + $0x190] sm:$0xff] %vm222_vm0, %v203_v51  ;;  %274 = vst.msk [vmem:[#allocation2 + $0x198] sm:$0xff] %vm222_vm0, %v204_v52  ;;  %v311_v53 = vld [vmem:[#allocation2 + $0x90] sm:$0xff]  ;;  %v312_v54 = vld [vmem:[#allocation2 + $0x98] sm:$0xff] }
  0x3e   : > { %569 = vmatprep.mubr.bf16.mxu1 %v10711_v2  ;;  %3320 = vmatprep.mubr.bf16.mxu0 %v10711_v2  ;;  %v3062_v55 = vld [vmem:[#allocation2 + $0xa3] sm:$0xff]  ;;  %v3063_v56 = vld [vmem:[#allocation2 + $0xab] sm:$0xff]  ;;  %v366_v57 = vpack.c.bf16 %v312_v54, %v311_v53  ;;  %v205_v59 = vld [vmem:[%s9057_s4 + $0x1a0] sm:$0xff] }
  0x3f   : > { %v3117_v58 = vpack.c.bf16 %v3063_v56, %v3062_v55  ;;  %v206_v60 = vld [vmem:[%s9057_s4 + $0x1a8] sm:$0xff]  ;;  %275 = vst.msk [vmem:[#allocation2 + $0x1a0] sm:$0xff] %vm222_vm0, %v205_v59  ;;  %v314_v62 = vld [vmem:[#allocation2 + $0xa8] sm:$0xff]  ;;  %v3064_v63 = vld [vmem:[#allocation2 + $0xb3] sm:$0xff] }
  0x40   : > { %276 = vst.msk [vmem:[#allocation2 + $0x1a8] sm:$0xff] %vm222_vm0, %v206_v60  ;;  %v313_v61 = vld [vmem:[#allocation2 + $0xa0] sm:$0xff]  ;;  %v207_v4 = vld [vmem:[%s9057_s4 + $0x1b0] sm:$0xff]  ;;  %v208_v5 = vld [vmem:[%s9057_s4 + $0x1b8] sm:$0xff] }
  0x41   : > { %v3065_v0 = vld [vmem:[#allocation2 + $0xbb] sm:$0xff]  ;;  %v367_v1 = vpack.c.bf16 %v314_v62, %v313_v61  ;;  %277 = vst.msk [vmem:[#allocation2 + $0x1b0] sm:$0xff] %vm222_vm0, %v207_v4  ;;  %278 = vst.msk [vmem:[#allocation2 + $0x1b8] sm:$0xff] %vm222_vm0, %v208_v5  ;;  %v315_v6 = vld [vmem:[#allocation2 + $0xb0] sm:$0xff] }
  0x42   : > { %v3118_v3 = vpack.c.bf16 %v3065_v0, %v3064_v63  ;;  %v316_v7 = vld [vmem:[#allocation2 + $0xb8] sm:$0xff]  ;;  %v3066_v8 = vld [vmem:[#allocation2 + $0xc3] sm:$0xff]  ;;  %v3067_v9 = vld [vmem:[#allocation2 + $0xcb] sm:$0xff] }
  0x43   : > { %v368_v10 = vpack.c.bf16 %v316_v7, %v315_v6  ;;  %v3119_v11 = vpack.c.bf16 %v3067_v9, %v3066_v8  ;;  %v210_v13 = vld [vmem:[%s9057_s4 + $0x1c8] sm:$0xff]  ;;  %v318_v15 = vld [vmem:[#allocation2 + $0xc8] sm:$0xff]  ;;  %v3068_v16 = vld [vmem:[#allocation2 + $0xd3] sm:$0xff] }
  0x44   : > { %280 = vst.msk [vmem:[#allocation2 + $0x1c8] sm:$0xff] %vm222_vm0, %v210_v13  ;;  %v3069_v17 = vld [vmem:[#allocation2 + $0xdb] sm:$0xff]  ;;  %v211_v20 = vld [vmem:[%s9057_s4 + $0x1d0] sm:$0xff]  ;;  %v212_v21 = vld [vmem:[%s9057_s4 + $0x1d8] sm:$0xff] }
  0x45   : > { %7058 = vmatmul.mubr.msk.bf16.gmra.mrb[16].mxu1 %vm222_vm0, %v361_v12  ;;  %7194 = vmatmul.mubr.msk.bf16.gmra.mrb[16].mxu0 %vm222_vm0, %v3112_v14  ;;  %v209_v12 = vld [vmem:[%s9057_s4 + $0x1c0] sm:$0xff]  ;;  %v317_v14 = vld [vmem:[#allocation2 + $0xc0] sm:$0xff]  ;;  %v3120_v19 = vpack.c.bf16 %v3069_v17, %v3068_v16  ;;  %281 = vst.msk [vmem:[#allocation2 + $0x1d0] sm:$0xff] %vm222_vm0, %v211_v20  ;;  %282 = vst.msk [vmem:[#allocation2 + $0x1d8] sm:$0xff] %vm222_vm0, %v212_v21 }
  0x46   : > { %579 = vmatprep.mubr.bf16.mxu1 %v10711_v2  ;;  %3330 = vmatprep.mubr.bf16.mxu0 %v10711_v2  ;;  %279 = vst.msk [vmem:[#allocation2 + $0x1c0] sm:$0xff] %vm222_vm0, %v209_v12  ;;  %v369_v18 = vpack.c.bf16 %v318_v15, %v317_v14  ;;  %v319_v22 = vld [vmem:[#allocation2 + $0xd0] sm:$0xff]  ;;  %v320_v23 = vld [vmem:[#allocation2 + $0xd8] sm:$0xff]  ;;  %v3070_v24 = vld [vmem:[#allocation2 + $0xe3] sm:$0xff] }
  0x47   : > { %v213_v28 = vld [vmem:[%s9057_s4 + $0x1e0] sm:$0xff]  ;;  %v214_v29 = vld [vmem:[%s9057_s4 + $0x1e8] sm:$0xff]  ;;  %v322_v31 = vld [vmem:[#allocation2 + $0xe8] sm:$0xff] }
  0x48   : > { %283 = vst.msk [vmem:[#allocation2 + $0x1e0] sm:$0xff] %vm222_vm0, %v213_v28  ;;  %284 = vst.msk [vmem:[#allocation2 + $0x1e8] sm:$0xff] %vm222_vm0, %v214_v29  ;;  %v321_v30 = vld [vmem:[#allocation2 + $0xe0] sm:$0xff]  ;;  %v3072_v32 = vld [vmem:[#allocation2 + $0xf3] sm:$0xff] }
  0x49   : > { %v215_v36 = vld [vmem:[%s9057_s4 + $0x1f0] sm:$0xff]  ;;  %v216_v37 = vld [vmem:[%s9057_s4 + $0x1f8] sm:$0xff]  ;;  %v324_v39 = vld [vmem:[#allocation2 + $0xf8] sm:$0xff] }
  0x4a   : > { %285 = vst.msk [vmem:[#allocation2 + $0x1f0] sm:$0xff] %vm222_vm0, %v215_v36  ;;  %286 = vst.msk [vmem:[#allocation2 + $0x1f8] sm:$0xff] %vm222_vm0, %v216_v37  ;;  %v323_v38 = vld [vmem:[#allocation2 + $0xf0] sm:$0xff]  ;;  %v3074_v40 = vld [vmem:[#allocation2 + $0x103] sm:$0xff] }
  0x4b   : > { %v325_v44 = vld [vmem:[#allocation2 + $0x100] sm:$0xff]  ;;  %v326_v45 = vld [vmem:[#allocation2 + $0x108] sm:$0xff]  ;;  %v3729_v47 = vld [vmem:[#allocation2 + $0x14] sm:$0xff] }
  0x4c   : > { %v8641_v46 = vld [vmem:[%s10708_s1 + $0x24] ss:$8 sps:$4 sm:$0xff]   ;;  %v8636_v51 = vld [vmem:[%s10708_s1 + $0x60] ss:$8 sps:$4 sm:$0xff]   ;;  %v327_v52 = vld [vmem:[#allocation2 + $0x110] sm:$0xff] }
  0x4d   : > { %7059 = vmatmul.mubr.msk.bf16.gmra.mrb[20].mxu1 %vm222_vm0, %v362_v25  ;;  %7195 = vmatmul.mubr.msk.bf16.gmra.mrb[20].mxu0 %vm222_vm0, %v3113_v26  ;;  %v3071_v25 = vld [vmem:[#allocation2 + $0xeb] sm:$0xff]  ;;  %v370_v26 = vpack.c.bf16 %v320_v23, %v319_v22  ;;  %v3730_v48 = vld [vmem:[#allocation2 + $0x1c] sm:$0xff]  ;;  %v3733_v60 = vld [vmem:[#allocation2 + $0x34] sm:$0xff] }
  0x4e   : > { %589 = vmatprep.mubr.bf16.mxu1 %v10711_v2  ;;  %3340 = vmatprep.mubr.bf16.mxu0 %v10711_v2  ;;  %v3121_v27 = vpack.c.bf16 %v3071_v25, %v3070_v24  ;;  %v328_v53 = vld [vmem:[#allocation2 + $0x118] sm:$0xff]  ;;  %v3731_v54 = vld [vmem:[#allocation2 + $0x24] sm:$0xff]  ;;  %v3732_v55 = vld [vmem:[#allocation2 + $0x2c] sm:$0xff] }
  0x4f   : > { %1878 = vmatprep.subr.bf16.mxu1 %v8641_v46  ;;  %v374_v56 = vpack.c.bf16 %v328_v53, %v327_v52  ;;  %v330_v59 = vld [vmem:[#allocation2 + $0x128] sm:$0xff]  ;;  %v3734_v61 = vld [vmem:[#allocation2 + $0x3c] sm:$0xff]  ;;  %v331_v0 = vld [vmem:[#allocation2 + $0x130] sm:$0xff] }
  0x50   : > { %v9289_v63 = vpack.c.bf16 %v3734_v61, %v3733_v60  ;;  %v3736_v4 = vld [vmem:[#allocation2 + $0x4c] sm:$0xff]  ;;  %v333_v7 = vld [vmem:[#allocation2 + $0x140] sm:$0xff]  ;;  %v3737_v9 = vld [vmem:[#allocation2 + $0x54] sm:$0xff] }
  0x51   : > { %v334_v8 = vld [vmem:[#allocation2 + $0x148] sm:$0xff]  ;;  %v335_v13 = vld [vmem:[#allocation2 + $0x150] sm:$0xff]  ;;  %v336_v14 = vld [vmem:[#allocation2 + $0x158] sm:$0xff] }
  0x52   : > { %v3739_v15 = vld [vmem:[#allocation2 + $0x64] sm:$0xff]  ;;  %v3740_v16 = vld [vmem:[#allocation2 + $0x6c] sm:$0xff]  ;;  %v378_v17 = vpack.c.bf16 %v336_v14, %v335_v13  ;;  %v3741_v21 = vld [vmem:[#allocation2 + $0x74] sm:$0xff] }
  0x53   : > { %v338_v20 = vld [vmem:[#allocation2 + $0x168] sm:$0xff]  ;;  %v3742_v22 = vld [vmem:[#allocation2 + $0x7c] sm:$0xff]  ;;  %v339_v25 = vld [vmem:[#allocation2 + $0x170] sm:$0xff] }
  0x54   : > { %v9317_v24 = vpack.c.bf16 %v3742_v22, %v3741_v21  ;;  %v3744_v28 = vld [vmem:[#allocation2 + $0x8c] sm:$0xff]  ;;  %v3750_v46 = vld [vmem:[#allocation2 + $0xbc] sm:$0xff] }
  0x55   : > { %7060 = vmatmul.mubr.msk.bf16.gmra.mrb[24].mxu1 %vm222_vm0, %v363_v33  ;;  %7196 = vmatmul.mubr.msk.bf16.gmra.mrb[24].mxu0 %vm222_vm0, %v3114_v34  ;;  %v3073_v33 = vld [vmem:[#allocation2 + $0xfb] sm:$0xff]  ;;  %v371_v34 = vpack.c.bf16 %v322_v31, %v321_v30  ;;  %v343_v37 = vld [vmem:[#allocation2 + $0x190] sm:$0xff] }
  0x56   : > { %599 = vmatprep.mubr.bf16.mxu1 %v10711_v2  ;;  %3350 = vmatprep.mubr.bf16.mxu0 %v10711_v2  ;;  %v3122_v35 = vpack.c.bf16 %v3073_v33, %v3072_v32  ;;  %v341_v31 = vld [vmem:[#allocation2 + $0x180] sm:$0xff]  ;;  %v342_v32 = vld [vmem:[#allocation2 + $0x188] sm:$0xff]  ;;  %v3745_v33 = vld [vmem:[#allocation2 + $0x94] sm:$0xff] }
  0x57   : > { %v3752_v52 = vld [vmem:[#allocation2 + $0xcc] sm:$0xff] }
  0x58   : > { %v3760_v21 = vld [vmem:[#allocation2 + $0x10c] sm:$0xff] }
  0x5d   : > { %7061 = vmatmul.mubr.msk.bf16.gmra.mrb[28].mxu1 %vm222_vm0, %v364_v41  ;;  %7197 = vmatmul.mubr.msk.bf16.gmra.mrb[28].mxu0 %vm222_vm0, %v3115_v42  ;;  %v3075_v41 = vld [vmem:[#allocation2 + $0x10b] sm:$0xff]  ;;  %v372_v42 = vpack.c.bf16 %v324_v39, %v323_v38  ;;  %v344_v38 = vld [vmem:[#allocation2 + $0x198] sm:$0xff] }
  0x5e   : > { %609 = vmatprep.mubr.bf16.mxu1 %v10711_v2  ;;  %3360 = vmatprep.mubr.bf16.mxu0 %v10711_v2  ;;  %v3123_v43 = vpack.c.bf16 %v3075_v41, %v3074_v40  ;;  %v3747_v39 = vld [vmem:[#allocation2 + $0xa4] sm:$0xff]  ;;  %v3748_v40 = vld [vmem:[#allocation2 + $0xac] sm:$0xff]  ;;  %v382_v41 = vpack.c.bf16 %v344_v38, %v343_v37 }
  0x5f   : > { %v3763_v37 = vld [vmem:[#allocation2 + $0x124] sm:$0xff]  ;;  %v3764_v38 = vld [vmem:[#allocation2 + $0x12c] sm:$0xff] }
  0x65   : > { %7062 = vmatmul.mubr.msk.bf16.gmra.mrb[32].mxu1 %vm222_vm0, %v365_v49  ;;  %7198 = vmatmul.mubr.msk.bf16.gmra.mrb[32].mxu0 %vm222_vm0, %v3116_v50  ;;  %v373_v49 = vpack.c.bf16 %v326_v45, %v325_v44  ;;  %v3793_v50 = vpack.c.bf16 %v3730_v48, %v3729_v47  ;;  %v346_v44 = vld [vmem:[#allocation2 + $0x1a8] sm:$0xff]  ;;  %v3749_v45 = vld [vmem:[#allocation2 + $0xb4] sm:$0xff] }
  0x66   : > { %619 = vmatprep.mubr.bf16.mxu1 %v10711_v2  ;;  %3370 = vmatprep.mubr.bf16.mxu0 %v10711_v2  ;;  %v9345_v48 = vpack.c.bf16 %v3750_v46, %v3749_v45  ;;  %v3766_v45 = vld [vmem:[#allocation2 + $0x13c] sm:$0xff] }
  0x6d   : > { %7063 = vmatmul.mubr.msk.bf16.gmra.mrb[36].mxu1 %vm222_vm0, %v366_v57  ;;  %7199 = vmatmul.mubr.msk.bf16.gmra.mrb[36].mxu0 %vm222_vm0, %v3117_v58  ;;  %v9282_v57 = vpack.c.bf16 %v3732_v55, %v3731_v54  ;;  %v329_v58 = vld [vmem:[#allocation2 + $0x120] sm:$0xff] }
  0x6e   : > { %629 = vmatprep.mubr.bf16.mxu1 %v10711_v2  ;;  %3380 = vmatprep.mubr.bf16.mxu0 %v10711_v2  ;;  %v375_v62 = vpack.c.bf16 %v330_v59, %v329_v58  ;;  %v349_v55 = vld [vmem:[#allocation2 + $0x1c0] sm:$0xff]  ;;  %v3753_v58 = vld [vmem:[#allocation2 + $0xd4] sm:$0xff] }
  0x6f   : > { %v3754_v59 = vld [vmem:[#allocation2 + $0xdc] sm:$0xff] }
  0x70   : > { %v9359_v61 = vpack.c.bf16 %v3754_v59, %v3753_v58  ;;  %v998_v58 = vld [vmem:[#allocation2 + $0x49] sm:$0xff]  ;;  %v3769_v59 = vld [vmem:[#allocation2 + $0x154] sm:$0xff] }
  0x75   : > { %7064 = vmatmul.mubr.msk.bf16.gmra.mrb[40].mxu1 %vm222_vm0, %v367_v1  ;;  %7200 = vmatmul.mubr.msk.bf16.gmra.mrb[40].mxu0 %vm222_vm0, %v3118_v3  ;;  %v332_v1 = vld [vmem:[#allocation2 + $0x138] sm:$0xff]  ;;  %v3735_v3 = vld [vmem:[#allocation2 + $0x44] sm:$0xff] }
  0x76   : > { %639 = vmatprep.mubr.bf16.mxu1 %v10711_v2  ;;  %3390 = vmatprep.mubr.bf16.mxu0 %v10711_v2  ;;  %v376_v5 = vpack.c.bf16 %v332_v1, %v331_v0  ;;  %v9296_v6 = vpack.c.bf16 %v3736_v4, %v3735_v3  ;;  %v352_v0 = vld [vmem:[#allocation2 + $0x1d8] sm:$0xff]  ;;  %v3755_v1 = vld [vmem:[#allocation2 + $0xe4] sm:$0xff]  ;;  %v3756_v3 = vld [vmem:[#allocation2 + $0xec] sm:$0xff] }
  0x7d   : > { %7065 = vmatmul.mubr.msk.bf16.gmra.mrb[44].mxu1 %vm222_vm0, %v368_v10  ;;  %7201 = vmatmul.mubr.msk.bf16.gmra.mrb[44].mxu0 %vm222_vm0, %v3119_v11  ;;  %v3738_v10 = vld [vmem:[#allocation2 + $0x5c] sm:$0xff]  ;;  %v377_v11 = vpack.c.bf16 %v334_v8, %v333_v7 }
  0x7e   : > { %649 = vmatprep.mubr.bf16.mxu1 %v10711_v2  ;;  %3400 = vmatprep.mubr.bf16.mxu0 %v10711_v2  ;;  %v9303_v12 = vpack.c.bf16 %v3738_v10, %v3737_v9  ;;  %v217_v7 = vld [vmem:[%s9057_s4 + $0x200] sm:$0xff]  ;;  %v353_v8 = vld [vmem:[#allocation2 + $0x1e0] sm:$0xff]  ;;  %v354_v9 = vld [vmem:[#allocation2 + $0x1e8] sm:$0xff] }
  0x7f   : > { %287 = vst.msk [vmem:[#allocation2 + $0x200] sm:$0xff] %vm222_vm0, %v217_v7  ;;  %v3757_v10 = vld [vmem:[#allocation2 + $0xf4] sm:$0xff]  ;;  %v387_v13 = vpack.c.bf16 %v354_v9, %v353_v8  ;;  %v3772_v7 = vld [vmem:[#allocation2 + $0x16c] sm:$0xff] }
  0x85   : > { %7066 = vmatmul.mubr.msk.bf16.gmra.mrb[48].mxu1 %vm222_vm0, %v369_v18  ;;  %7202 = vmatmul.mubr.msk.bf16.gmra.mrb[48].mxu0 %vm222_vm0, %v3120_v19  ;;  %v9310_v18 = vpack.c.bf16 %v3740_v16, %v3739_v15  ;;  %v337_v19 = vld [vmem:[#allocation2 + $0x160] sm:$0xff]  ;;  %v219_v16 = vld [vmem:[%s9057_s4 + $0x210] sm:$0xff] }
  0x86   : > { %659 = vmatprep.mubr.bf16.mxu1 %v10711_v2  ;;  %3410 = vmatprep.mubr.bf16.mxu0 %v10711_v2  ;;  %v379_v23 = vpack.c.bf16 %v338_v20, %v337_v19  ;;  %v218_v15 = vld [vmem:[%s9057_s4 + $0x208] sm:$0xff]  ;;  %289 = vst.msk [vmem:[#allocation2 + $0x210] sm:$0xff] %vm222_vm0, %v219_v16  ;;  %v356_v19 = vld [vmem:[#allocation2 + $0x1f8] sm:$0xff] }
  0x87   : > { %288 = vst.msk [vmem:[#allocation2 + $0x208] sm:$0xff] %vm222_vm0, %v218_v15  ;;  %v3759_v20 = vld [vmem:[#allocation2 + $0x104] sm:$0xff]  ;;  %v3774_v15 = vld [vmem:[#allocation2 + $0x17c] sm:$0xff] }
  0x8d   : > { %7067 = vmatmul.mubr.msk.bf16.gmra.mrb[52].mxu1 %vm222_vm0, %v370_v26  ;;  %7203 = vmatmul.mubr.msk.bf16.gmra.mrb[52].mxu0 %vm222_vm0, %v3121_v27  ;;  %v340_v26 = vld [vmem:[#allocation2 + $0x178] sm:$0xff]  ;;  %v3743_v27 = vld [vmem:[#allocation2 + $0x84] sm:$0xff] }
  0x8e   : > { %669 = vmatprep.mubr.bf16.mxu1 %v10711_v2  ;;  %3420 = vmatprep.mubr.bf16.mxu0 %v10711_v2  ;;  %v380_v29 = vpack.c.bf16 %v340_v26, %v339_v25  ;;  %v9324_v30 = vpack.c.bf16 %v3744_v28, %v3743_v27  ;;  %v989_v25 = vld [vmem:[#allocation2 + $0x1] sm:$0xff]  ;;  %v990_v26 = vld [vmem:[#allocation2 + $0x9] sm:$0xff]  ;;  %v3761_v27 = vld [vmem:[#allocation2 + $0x114] sm:$0xff] }
  0x8f   : > { %v3762_v28 = vld [vmem:[#allocation2 + $0x11c] sm:$0xff] }
  0x95   : > { %7068 = vmatmul.mubr.msk.bf16.gmra.mrb[56].mxu1 %vm222_vm0, %v371_v34  ;;  %7204 = vmatmul.mubr.msk.bf16.gmra.mrb[56].mxu0 %vm222_vm0, %v3122_v35  ;;  %v3746_v34 = vld [vmem:[#allocation2 + $0x9c] sm:$0xff]  ;;  %v381_v35 = vpack.c.bf16 %v342_v32, %v341_v31  ;;  %v9396_v32 = vpack.c.bf16 %v3762_v28, %v3761_v27  ;;  %v1006_v28 = vld [vmem:[#allocation2 + $0x89] sm:$0xff] }
  0x96   : > { %679 = vmatprep.mubr.bf16.mxu1 %v10711_v2  ;;  %3430 = vmatprep.mubr.bf16.mxu0 %v10711_v2  ;;  %v9331_v36 = vpack.c.bf16 %v3746_v34, %v3745_v33  ;;  %v8639_v31 = vld [vmem:[%s10708_s1 + $0x20] ss:$8 sps:$4 sm:$0xff]  }
  0x97   : > { %v991_v33 = vld [vmem:[#allocation2 + $0x11] sm:$0xff]  ;;  %v992_v34 = vld [vmem:[#allocation2 + $0x19] sm:$0xff]  ;;  %v1005_v27 = vld [vmem:[#allocation2 + $0x81] sm:$0xff] }
  0x9d   : > { %7069 = vmatmul.mubr.msk.bf16.gmra.mrb[60].mxu1 %vm222_vm0, %v372_v42  ;;  %7205 = vmatmul.mubr.msk.bf16.gmra.mrb[60].mxu0 %vm222_vm0, %v3123_v43  ;;  %v9338_v42 = vpack.c.bf16 %v3748_v40, %v3747_v39  ;;  %v345_v43 = vld [vmem:[#allocation2 + $0x1a0] sm:$0xff]  ;;  %v1054_v39 = vpack.c.bf16 %v992_v34, %v991_v33  ;;  %v9406_v40 = vpack.c.bf16 %v3764_v38, %v3763_v37 }
  0x9e   : > { %689 = vmatprep.mubr.bf16.mxu1 %v10711_v2  ;;  %3965 = vmatprep.mubr.bf16.mxu0 %v10711_v2  ;;  %v383_v47 = vpack.c.bf16 %v346_v44, %v345_v43  ;;  %v994_v43 = vld [vmem:[#allocation2 + $0x29] sm:$0xff]  ;;  %v3765_v44 = vld [vmem:[#allocation2 + $0x134] sm:$0xff]  ;;  %v1061_v33 = vpack.c.bf16 %v1006_v28, %v1005_v27 }
  0x9f   : > { %v1008_v37 = vld [vmem:[#allocation2 + $0x99] sm:$0xff]  ;;  %v3779_v38 = vld [vmem:[#allocation2 + $0x1a4] sm:$0xff] }
  0xa5   : > { %7070 = vmatmul.mubr.msk.bf16.gmra.mrb[64].mxu1 %vm222_vm0, %v373_v49  ;;  %7224 = vmatmul.mubr.msk.bf16.vlgmr.msra.gmra.mrb[0].mxu0 %vm222_vm0, %v3793_v50  ;;  %v347_v49 = vld [vmem:[#allocation2 + $0x1b0] sm:$0xff]  ;;  %v348_v50 = vld [vmem:[#allocation2 + $0x1b8] sm:$0xff] }
  0xa6   : > { %699 = vmatprep.mubr.bf16.mxu1 %v10711_v2  ;;  %4619 = vmatpush1.bf16.msra.mxu0 %v8636_v51  ;;  %v3751_v51 = vld [vmem:[#allocation2 + $0xc4] sm:$0xff]  ;;  %v384_v53 = vpack.c.bf16 %v348_v50, %v347_v49  ;;  %v995_v49 = vld [vmem:[#allocation2 + $0x31] sm:$0xff]  ;;  %v996_v50 = vld [vmem:[#allocation2 + $0x39] sm:$0xff] }
  0xa7   : > { %3975 = vmatprep.mubr.bf16.mxu0 %v10711_v2  ;;  %v9352_v54 = vpack.c.bf16 %v3752_v52, %v3751_v51  ;;  %v3767_v51 = vld [vmem:[#allocation2 + $0x144] sm:$0xff]  ;;  %v3768_v52 = vld [vmem:[#allocation2 + $0x14c] sm:$0xff] }
  0xad   : > { %7071 = vmatmul.mubr.msk.bf16.gmra.mrb[68].mxu1 %vm222_vm0, %v374_v56  ;;  %7225 = vmatmul.mubr.msk.bf16.gmra.mrb[4].mxu0 %vm222_vm0, %v9282_v57  ;;  %v350_v56 = vld [vmem:[#allocation2 + $0x1c8] sm:$0xff] }
  0xae   : > { %709 = vmatprep.mubr.bf16.mxu1 %v10711_v2  ;;  %3985 = vmatprep.mubr.bf16.mxu0 %v10711_v2  ;;  %v385_v60 = vpack.c.bf16 %v350_v56, %v349_v55  ;;  %v9420_v55 = vpack.c.bf16 %v3768_v52, %v3767_v51  ;;  %v997_v56 = vld [vmem:[#allocation2 + $0x41] sm:$0xff]  ;;  %v1011_v52 = vld [vmem:[#allocation2 + $0xb1] sm:$0xff] }
  0xb5   : > { %7072 = vmatmul.mubr.msk.bf16.gmra.mrb[72].mxu1 %vm222_vm0, %v375_v62  ;;  %7226 = vmatmul.mubr.msk.bf16.gmra.mrb[8].mxu0 %vm222_vm0, %v9289_v63  ;;  %v351_v62 = vld [vmem:[#allocation2 + $0x1d0] sm:$0xff] }
  0xb6   : > { %719 = vmatprep.mubr.bf16.mxu1 %v10711_v2  ;;  %3995 = vmatprep.mubr.bf16.mxu0 %v10711_v2  ;;  %v386_v4 = vpack.c.bf16 %v352_v0, %v351_v62  ;;  %v1057_v62 = vpack.c.bf16 %v998_v58, %v997_v56  ;;  %v3783_v56 = vld [vmem:[#allocation2 + $0x1c4] sm:$0xff]  ;;  %v3784_v58 = vld [vmem:[#allocation2 + $0x1cc] sm:$0xff] }
  0xbd   : > { %7073 = vmatmul.mubr.msk.bf16.gmra.mrb[76].mxu1 %vm222_vm0, %v376_v5  ;;  %7227 = vmatmul.mubr.msk.bf16.gmra.mrb[12].mxu0 %vm222_vm0, %v9296_v6  ;;  %v9366_v5 = vpack.c.bf16 %v3756_v3, %v3755_v1  ;;  %v999_v1 = vld [vmem:[#allocation2 + $0x51] sm:$0xff]  ;;  %v1000_v3 = vld [vmem:[#allocation2 + $0x59] sm:$0xff] }
  0xbe   : > { %729 = vmatprep.mubr.bf16.mxu1 %v10711_v2  ;;  %4005 = vmatprep.mubr.bf16.mxu0 %v10711_v2  ;;  %v1058_v8 = vpack.c.bf16 %v1000_v3, %v999_v1  ;;  %v1014_v1 = vld [vmem:[#allocation2 + $0xc9] sm:$0xff]  ;;  %v3785_v3 = vld [vmem:[#allocation2 + $0x1d4] sm:$0xff] }
  0xc5   : > { %7074 = vmatmul.mubr.msk.bf16.gmra.mrb[80].mxu1 %vm222_vm0, %v377_v11  ;;  %7228 = vmatmul.mubr.msk.bf16.gmra.mrb[16].mxu0 %vm222_vm0, %v9303_v12  ;;  %v3758_v11 = vld [vmem:[#allocation2 + $0xfc] sm:$0xff] }
  0xc6   : > { %739 = vmatprep.mubr.bf16.mxu1 %v10711_v2  ;;  %4015 = vmatprep.mubr.bf16.mxu0 %v10711_v2  ;;  %v9375_v14 = vpack.c.bf16 %v3758_v11, %v3757_v10  ;;  %v1001_v10 = vld [vmem:[#allocation2 + $0x61] sm:$0xff]  ;;  %v1002_v11 = vld [vmem:[#allocation2 + $0x69] sm:$0xff] }
  0xc7   : > { %v1059_v16 = vpack.c.bf16 %v1002_v11, %v1001_v10  ;;  %v1015_v10 = vld [vmem:[#allocation2 + $0xd1] sm:$0xff]  ;;  %v1016_v11 = vld [vmem:[#allocation2 + $0xd9] sm:$0xff] }
  0xcd   : > { %7075 = vmatmul.mubr.msk.bf16.gmra.mrb[84].mxu1 %vm222_vm0, %v378_v17  ;;  %7229 = vmatmul.mubr.msk.bf16.gmra.mrb[20].mxu0 %vm222_vm0, %v9310_v18  ;;  %v355_v17 = vld [vmem:[#allocation2 + $0x1f0] sm:$0xff] }
  0xce   : > { %749 = vmatprep.mubr.bf16.mxu1 %v10711_v2  ;;  %4025 = vmatprep.mubr.bf16.mxu0 %v10711_v2  ;;  %v388_v22 = vpack.c.bf16 %v356_v19, %v355_v17  ;;  %v1003_v19 = vld [vmem:[#allocation2 + $0x71] sm:$0xff] }
  0xd5   : > { %7076 = vmatmul.mubr.msk.bf16.gmra.mrb[88].mxu1 %vm222_vm0, %v379_v23  ;;  %7230 = vmatmul.mubr.msk.bf16.gmra.mrb[24].mxu0 %vm222_vm0, %v9317_v24  ;;  %v9386_v23 = vpack.c.bf16 %v3760_v21, %v3759_v20  ;;  %v1004_v20 = vld [vmem:[#allocation2 + $0x79] sm:$0xff]  ;;  %v3775_v21 = vld [vmem:[#allocation2 + $0x184] sm:$0xff] }
  0xd6   : > { %759 = vmatprep.mubr.bf16.mxu1 %v10711_v2  ;;  %4035 = vmatprep.mubr.bf16.mxu0 %v10711_v2 }
  0xdd   : > { %7077 = vmatmul.mubr.msk.bf16.gmra.mrb[92].mxu1 %vm222_vm0, %v380_v29  ;;  %7231 = vmatmul.mubr.msk.bf16.gmra.mrb[28].mxu0 %vm222_vm0, %v9324_v30  ;;  %v1053_v29 = vpack.c.bf16 %v990_v26, %v989_v25  ;;  %v1060_v25 = vpack.c.bf16 %v1004_v20, %v1003_v19  ;;  %v1017_v20 = vld [vmem:[#allocation2 + $0xe1] sm:$0xff] }
  0xde   : > { %769 = vmatprep.mubr.bf16.mxu1 %v10711_v2  ;;  %4045 = vmatprep.mubr.bf16.mxu0 %v10711_v2 }
  0xe5   : > { %7078 = vmatmul.mubr.msk.bf16.gmra.mrb[96].mxu1 %vm222_vm0, %v381_v35  ;;  %7232 = vmatmul.mubr.msk.bf16.gmra.mrb[32].mxu0 %vm222_vm0, %v9331_v36  ;;  %v8644_v35 = vld [vmem:[%s10708_s1 + $0x74] ss:$8 sps:$4 sm:$0xff]  }
  0xe6   : > { %779 = vmatprep.mubr.bf16.mxu1 %v10711_v2  ;;  %4055 = vmatprep.mubr.bf16.mxu0 %v10711_v2 }
  0xe7   : > { %5303 = vmatprep.subr.bf16.mxu0 %v8644_v35  ;;  %v1007_v35 = vld [vmem:[#allocation2 + $0x91] sm:$0xff] }
  0xed   : > { %7079 = vmatmul.mubr.msk.bf16.gmra.mrb[100].mxu1 %vm222_vm0, %v382_v41  ;;  %7233 = vmatmul.mubr.msk.bf16.gmra.mrb[36].mxu0 %vm222_vm0, %v9338_v42  ;;  %v993_v41 = vld [vmem:[#allocation2 + $0x21] sm:$0xff] }
  0xee   : > { %789 = vmatprep.mubr.bf16.mxu1 %v10711_v2  ;;  %4065 = vmatprep.mubr.bf16.mxu0 %v10711_v2  ;;  %v1055_v46 = vpack.c.bf16 %v994_v43, %v993_v41  ;;  %v1062_v41 = vpack.c.bf16 %v1008_v37, %v1007_v35  ;;  %v3792_v35 = vld [vmem:[#allocation2 + $0x20c] sm:$0xff] }
  0xf5   : > { %7080 = vmatmul.mubr.msk.bf16.gmra.mrb[104].mxu1 %vm222_vm0, %v383_v47  ;;  %7234 = vmatmul.mubr.msk.bf16.gmra.mrb[40].mxu0 %vm222_vm0, %v9345_v48  ;;  %v9413_v47 = vpack.c.bf16 %v3766_v45, %v3765_v44  ;;  %v1009_v44 = vld [vmem:[#allocation2 + $0xa1] sm:$0xff]  ;;  %v1010_v45 = vld [vmem:[#allocation2 + $0xa9] sm:$0xff] }
  0xf6   : > { %799 = vmatprep.mubr.bf16.mxu1 %v10711_v2  ;;  %4075 = vmatprep.mubr.bf16.mxu0 %v10711_v2 }
  0xfd   : > { %7081 = vmatmul.mubr.msk.bf16.gmra.mrb[108].mxu1 %vm222_vm0, %v384_v53  ;;  %7235 = vmatmul.mubr.msk.bf16.gmra.mrb[44].mxu0 %vm222_vm0, %v9352_v54  ;;  %v1056_v53 = vpack.c.bf16 %v996_v50, %v995_v49  ;;  %v3782_v49 = vld [vmem:[#allocation2 + $0x1bc] sm:$0xff]  ;;  %v1063_v50 = vpack.c.bf16 %v1010_v45, %v1009_v44  ;;  %v8647_v44 = vld [vmem:[%s10708_s1 + $0x34] ss:$8 sps:$4 sm:$0xff]  }
  0xfe   : > { %809 = vmatprep.mubr.bf16.mxu1 %v10711_v2  ;;  %4085 = vmatprep.mubr.bf16.mxu0 %v10711_v2 }
 0x105   : > { %7082 = vmatmul.mubr.msk.bf16.gmra.mrb[112].mxu1 %vm222_vm0, %v385_v60  ;;  %7236 = vmatmul.mubr.msk.bf16.gmra.mrb[48].mxu0 %vm222_vm0, %v9359_v61  ;;  %v3770_v60 = vld [vmem:[#allocation2 + $0x15c] sm:$0xff] }
 0x106   : > { %819 = vmatprep.mubr.bf16.mxu1 %v10711_v2  ;;  %4095 = vmatprep.mubr.bf16.mxu0 %v10711_v2  ;;  %v9427_v0 = vpack.c.bf16 %v3770_v60, %v3769_v59  ;;  %v9476_v60 = vpack.c.bf16 %v3784_v58, %v3783_v56  ;;  %v1026_v56 = vld [vmem:[#allocation2 + $0x129] sm:$0xff]  ;;  %v1027_v58 = vld [vmem:[#allocation2 + $0x131] sm:$0xff] }
 0x10d   : > { %7083 = vmatmul.mubr.msk.bf16.gmra.mrb[116].mxu1 %vm222_vm0, %v386_v4  ;;  %7237 = vmatmul.mubr.msk.bf16.gmra.mrb[52].mxu0 %vm222_vm0, %v9366_v5  ;;  %v3771_v4 = vld [vmem:[#allocation2 + $0x164] sm:$0xff] }
 0x10e   : > { %829 = vmatprep.mubr.bf16.mxu1 %v10711_v2  ;;  %4105 = vmatprep.mubr.bf16.mxu0 %v10711_v2  ;;  %v9434_v9 = vpack.c.bf16 %v3772_v7, %v3771_v4  ;;  %v3786_v4 = vld [vmem:[#allocation2 + $0x1dc] sm:$0xff] }
 0x115   : > { %7084 = vmatmul.mubr.msk.bf16.gmra.mrb[120].mxu1 %vm222_vm0, %v387_v13  ;;  %7238 = vmatmul.mubr.msk.bf16.gmra.mrb[56].mxu0 %vm222_vm0, %v9375_v14  ;;  %v3773_v13 = vld [vmem:[#allocation2 + $0x174] sm:$0xff] }
 0x116   : > { %839 = vmatprep.mubr.bf16.mxu1 %v10711_v2  ;;  %4115 = vmatprep.mubr.bf16.mxu0 %v10711_v2  ;;  %v9441_v17 = vpack.c.bf16 %v3774_v15, %v3773_v13  ;;  %v3787_v13 = vld [vmem:[#allocation2 + $0x1e4] sm:$0xff]  ;;  %v3788_v15 = vld [vmem:[#allocation2 + $0x1ec] sm:$0xff] }
 0x117   : > { %v9490_v19 = vpack.c.bf16 %v3788_v15, %v3787_v13  ;;  %v1036_v13 = vld [vmem:[#allocation2 + $0x179] sm:$0xff] }
 0x11d   : > { %7085 = vmatmul.mubr.msk.bf16.gmra.mrb[124].mxu1 %vm222_vm0, %v388_v22  ;;  %7239 = vmatmul.mubr.msk.bf16.gmra.mrb[60].mxu0 %vm222_vm0, %v9386_v23  ;;  %v3776_v22 = vld [vmem:[#allocation2 + $0x18c] sm:$0xff] }
 0x11e   : > { %1225 = vmatprep.mubr.bf16.mxu1 %v10711_v2  ;;  %4125 = vmatprep.mubr.bf16.mxu0 %v10711_v2  ;;  %v9448_v26 = vpack.c.bf16 %v3776_v22, %v3775_v21  ;;  %v1018_v21 = vld [vmem:[#allocation2 + $0xe9] sm:$0xff]  ;;  %v3789_v22 = vld [vmem:[#allocation2 + $0x1f4] sm:$0xff] }
 0x11f   : > { %v1067_v27 = vpack.c.bf16 %v1018_v21, %v1017_v20  ;;  %v1040_v21 = vld [vmem:[#allocation2 + $0x199] sm:$0xff] }
 0x125   : > { %7088 = vmatmul.mubr.msk.bf16.vlgmr.msra.gmra.mrb[0].mxu1 %vm222_vm0, %v1053_v29  ;;  %7240 = vmatmul.mubr.msk.bf16.gmra.mrb[64].mxu0 %vm222_vm0, %v9396_v32  ;;  %v3777_v29 = vld [vmem:[#allocation2 + $0x194] sm:$0xff] }
 0x126   : > { %1879 = vmatpush1.bf16.msra.mxu1 %v8639_v31  ;;  %1235 = vmatprep.mubr.bf16.mxu1 %v10711_v2  ;;  %v3778_v31 = vld [vmem:[#allocation2 + $0x19c] sm:$0xff] }
 0x127   : > { %4135 = vmatprep.mubr.bf16.mxu0 %v10711_v2  ;;  %v9455_v34 = vpack.c.bf16 %v3778_v31, %v3777_v29  ;;  %v1019_v29 = vld [vmem:[#allocation2 + $0xf1] sm:$0xff]  ;;  %v1020_v31 = vld [vmem:[#allocation2 + $0xf9] sm:$0xff]  ;;  %2563 = vmatprep.subr.bf16.mxu1 %v8647_v44 }
 0x128   : > { %v1068_v37 = vpack.c.bf16 %v1020_v31, %v1019_v29  ;;  %v1044_v29 = vld [vmem:[#allocation2 + $0x1b9] sm:$0xff] }
 0x12d   : > { %7089 = vmatmul.mubr.msk.bf16.gmra.mrb[4].mxu1 %vm222_vm0, %v1054_v39  ;;  %7241 = vmatmul.mubr.msk.bf16.gmra.mrb[68].mxu0 %vm222_vm0, %v9406_v40  ;;  %v3780_v39 = vld [vmem:[#allocation2 + $0x1ac] sm:$0xff] }
 0x12e   : > { %1245 = vmatprep.mubr.bf16.mxu1 %v10711_v2  ;;  %4145 = vmatprep.mubr.bf16.mxu0 %v10711_v2  ;;  %v9462_v43 = vpack.c.bf16 %v3780_v39, %v3779_v38  ;;  %v1021_v39 = vld [vmem:[#allocation2 + $0x101] sm:$0xff] }
 0x135   : > { %7090 = vmatmul.mubr.msk.bf16.gmra.mrb[8].mxu1 %vm222_vm0, %v1055_v46  ;;  %7242 = vmatmul.mubr.msk.bf16.gmra.mrb[72].mxu0 %vm222_vm0, %v9413_v47  ;;  %v3781_v46 = vld [vmem:[#allocation2 + $0x1b4] sm:$0xff] }
 0x136   : > { %1255 = vmatprep.mubr.bf16.mxu1 %v10711_v2  ;;  %4155 = vmatprep.mubr.bf16.mxu0 %v10711_v2  ;;  %v9469_v51 = vpack.c.bf16 %v3782_v49, %v3781_v46  ;;  %v8642_v46 = vld [vmem:[%s10708_s1 + $0x70] ss:$8 sps:$4 sm:$0xff]  }
 0x137   : > { %v1023_v49 = vld [vmem:[#allocation2 + $0x111] sm:$0xff] }
 0x13d   : > { %7091 = vmatmul.mubr.msk.bf16.gmra.mrb[12].mxu1 %vm222_vm0, %v1056_v53  ;;  %7243 = vmatmul.mubr.msk.bf16.gmra.mrb[76].mxu0 %vm222_vm0, %v9420_v55  ;;  %v1012_v53 = vld [vmem:[#allocation2 + $0xb9] sm:$0xff] }
 0x13e   : > { %1265 = vmatprep.mubr.bf16.mxu1 %v10711_v2  ;;  %4165 = vmatprep.mubr.bf16.mxu0 %v10711_v2  ;;  %v1064_v59 = vpack.c.bf16 %v1012_v53, %v1011_v52  ;;  %v1025_v53 = vld [vmem:[#allocation2 + $0x121] sm:$0xff] }
 0x145   : > { %7092 = vmatmul.mubr.msk.bf16.gmra.mrb[16].mxu1 %vm222_vm0, %v1057_v62  ;;  %7244 = vmatmul.mubr.msk.bf16.gmra.mrb[80].mxu0 %vm222_vm0, %v9427_v0  ;;  %v1013_v62 = vld [vmem:[#allocation2 + $0xc1] sm:$0xff] }
 0x146   : > { %1275 = vmatprep.mubr.bf16.mxu1 %v10711_v2  ;;  %4175 = vmatprep.mubr.bf16.mxu0 %v10711_v2  ;;  %v1065_v7 = vpack.c.bf16 %v1014_v1, %v1013_v62  ;;  %v1030_v1 = vld [vmem:[#allocation2 + $0x149] sm:$0xff] }
 0x14d   : > { %7093 = vmatmul.mubr.msk.bf16.gmra.mrb[20].mxu1 %vm222_vm0, %v1058_v8  ;;  %7245 = vmatmul.mubr.msk.bf16.gmra.mrb[84].mxu0 %vm222_vm0, %v9434_v9  ;;  %v9483_v8 = vpack.c.bf16 %v3786_v4, %v3785_v3  ;;  %v1032_v4 = vld [vmem:[#allocation2 + $0x159] sm:$0xff] }
 0x14e   : > { %1285 = vmatprep.mubr.bf16.mxu1 %v10711_v2  ;;  %4185 = vmatprep.mubr.bf16.mxu0 %v10711_v2 }
 0x155   : > { %7094 = vmatmul.mubr.msk.bf16.gmra.mrb[24].mxu1 %vm222_vm0, %v1059_v16  ;;  %7246 = vmatmul.mubr.msk.bf16.gmra.mrb[88].mxu0 %vm222_vm0, %v9441_v17  ;;  %v1066_v16 = vpack.c.bf16 %v1016_v11, %v1015_v10  ;;  %v1034_v10 = vld [vmem:[#allocation2 + $0x169] sm:$0xff] }
 0x156   : > { %1295 = vmatprep.mubr.bf16.mxu1 %v10711_v2  ;;  %4195 = vmatprep.mubr.bf16.mxu0 %v10711_v2 }
 0x15d   : > { %7095 = vmatmul.mubr.msk.bf16.gmra.mrb[28].mxu1 %vm222_vm0, %v1060_v25  ;;  %7247 = vmatmul.mubr.msk.bf16.gmra.mrb[92].mxu0 %vm222_vm0, %v9448_v26  ;;  %v3790_v25 = vld [vmem:[#allocation2 + $0x1fc] sm:$0xff] }
 0x15e   : > { %1305 = vmatprep.mubr.bf16.mxu1 %v10711_v2  ;;  %4205 = vmatprep.mubr.bf16.mxu0 %v10711_v2  ;;  %v9497_v28 = vpack.c.bf16 %v3790_v25, %v3789_v22  ;;  %v1042_v25 = vld [vmem:[#allocation2 + $0x1a9] sm:$0xff] }
 0x165   : > { %7096 = vmatmul.mubr.msk.bf16.gmra.mrb[32].mxu1 %vm222_vm0, %v1061_v33  ;;  %7248 = vmatmul.mubr.msk.bf16.gmra.mrb[96].mxu0 %vm222_vm0, %v9455_v34  ;;  %v3791_v33 = vld [vmem:[#allocation2 + $0x204] sm:$0xff] }
 0x166   : > { %1315 = vmatprep.mubr.bf16.mxu1 %v10711_v2  ;;  %4215 = vmatprep.mubr.bf16.mxu0 %v10711_v2  ;;  %v9504_v38 = vpack.c.bf16 %v3792_v35, %v3791_v33  ;;  %v1046_v33 = vld [vmem:[#allocation2 + $0x1c9] sm:$0xff]  ;;  %v1047_v35 = vld [vmem:[#allocation2 + $0x1d1] sm:$0xff] }
 0x16d   : > { %7097 = vmatmul.mubr.msk.bf16.gmra.mrb[36].mxu1 %vm222_vm0, %v1062_v41  ;;  %7249 = vmatmul.mubr.msk.bf16.gmra.mrb[100].mxu0 %vm222_vm0, %v9462_v43  ;;  %v1022_v41 = vld [vmem:[#allocation2 + $0x109] sm:$0xff] }
 0x16e   : > { %1325 = vmatprep.mubr.bf16.mxu1 %v10711_v2  ;;  %4225 = vmatprep.mubr.bf16.mxu0 %v10711_v2  ;;  %v1069_v45 = vpack.c.bf16 %v1022_v41, %v1021_v39  ;;  %v1049_v39 = vld [vmem:[#allocation2 + $0x1e1] sm:$0xff]  ;;  %v1050_v41 = vld [vmem:[#allocation2 + $0x1e9] sm:$0xff] }
 0x16f   : > { %v1083_v44 = vpack.c.bf16 %v1050_v41, %v1049_v39  ;;  %v1706_v39 = vld [vmem:[#allocation2 + $0x102] sm:$0xff] }
 0x170   : > { %v5099_v41 = vld [vmem:[#allocation2 + $0x25] sm:$0xff] }
 0x175   : > { %7098 = vmatmul.mubr.msk.bf16.gmra.mrb[40].mxu1 %vm222_vm0, %v1063_v50  ;;  %7250 = vmatmul.mubr.msk.bf16.gmra.mrb[104].mxu0 %vm222_vm0, %v9469_v51  ;;  %v1024_v50 = vld [vmem:[#allocation2 + $0x119] sm:$0xff] }
 0x176   : > { %1335 = vmatprep.mubr.bf16.mxu1 %v10711_v2  ;;  %4235 = vmatprep.mubr.bf16.mxu0 %v10711_v2  ;;  %v1070_v52 = vpack.c.bf16 %v1024_v50, %v1023_v49  ;;  %v1674_v50 = vld [vmem:[#allocation2 + $0x2] sm:$0xff] }
 0x17d   : > { %7099 = vmatmul.mubr.msk.bf16.gmra.mrb[44].mxu1 %vm222_vm0, %v1064_v59  ;;  %7251 = vmatmul.mubr.msk.bf16.gmra.mrb[108].mxu0 %vm222_vm0, %v9476_v60  ;;  %v1028_v59 = vld [vmem:[#allocation2 + $0x139] sm:$0xff] }
 0x17e   : > { %1345 = vmatprep.mubr.bf16.mxu1 %v10711_v2  ;;  %4245 = vmatprep.mubr.bf16.mxu0 %v10711_v2  ;;  %v1072_v62 = vpack.c.bf16 %v1028_v59, %v1027_v58  ;;  %v8907_v58 = vld [vmem:[%s10708_s1 + $0x44] ss:$8 sps:$4 sm:$0xff]  }
 0x185   : > { %7100 = vmatmul.mubr.msk.bf16.gmra.mrb[48].mxu1 %vm222_vm0, %v1065_v7  ;;  %7252 = vmatmul.mubr.msk.bf16.gmra.mrb[112].mxu0 %vm222_vm0, %v9483_v8 }
 0x186   : > { %1355 = vmatprep.mubr.bf16.mxu1 %v10711_v2  ;;  %4255 = vmatprep.mubr.bf16.mxu0 %v10711_v2 }
 0x18d   : > { %7101 = vmatmul.mubr.msk.bf16.gmra.mrb[52].mxu1 %vm222_vm0, %v1066_v16  ;;  %7253 = vmatmul.mubr.msk.bf16.gmra.mrb[116].mxu0 %vm222_vm0, %v9490_v19  ;;  %v1038_v16 = vld [vmem:[#allocation2 + $0x189] sm:$0xff] }
 0x18e   : > { %1365 = vmatprep.mubr.bf16.mxu1 %v10711_v2  ;;  %4265 = vmatprep.mubr.bf16.mxu0 %v10711_v2 }
 0x195   : > { %7102 = vmatmul.mubr.msk.bf16.gmra.mrb[56].mxu1 %vm222_vm0, %v1067_v27  ;;  %7254 = vmatmul.mubr.msk.bf16.gmra.mrb[120].mxu0 %vm222_vm0, %v9497_v28 }
 0x196   : > { %1375 = vmatprep.mubr.bf16.mxu1 %v10711_v2  ;;  %4275 = vmatprep.mubr.bf16.mxu0 %v10711_v2 }
 0x19d   : > { %7103 = vmatmul.mubr.msk.bf16.gmra.mrb[60].mxu1 %vm222_vm0, %v1068_v37  ;;  %7255 = vmatmul.mubr.msk.bf16.gmra.mrb[124].mxu0 %vm222_vm0, %v9504_v38  ;;  %v1048_v37 = vld [vmem:[#allocation2 + $0x1d9] sm:$0xff] }
 0x19e   : > { %1385 = vmatprep.mubr.bf16.mxu1 %v10711_v2  ;;  %4650 = vmatprep.mubr.bf16.mxu0 %v10711_v2 }
 0x1a5   : > { %7104 = vmatmul.mubr.msk.bf16.gmra.mrb[64].mxu1 %vm222_vm0, %v1069_v45  ;;  %7258 = vmatmul.mubr.msk.bf16.vlgmr.msra.gmra.mrb[0].mxu0 %vm222_vm0, %v9282_v57  ;;  %v1071_v57 = vpack.c.bf16 %v1026_v56, %v1025_v53  ;;  %v221_v45 = vld [vmem:[%s9057_s4 + $0x220] sm:$0xff] }
 0x1a6   : > { %1395 = vmatprep.mubr.bf16.mxu1 %v10711_v2  ;;  %5304 = vmatpush1.bf16.msra.mxu0 %v8642_v46  ;;  %291 = vst.msk [vmem:[#allocation2 + $0x220] sm:$0xff] %vm222_vm0, %v221_v45  ;;  %v1052_v46 = vld [vmem:[#allocation2 + $0x1f9] sm:$0xff] }
 0x1a7   : > { %4660 = vmatprep.mubr.bf16.mxu0 %v10711_v2  ;;  %v1676_v56 = vld [vmem:[#allocation2 + $0x12] sm:$0xff] }
 0x1ad   : > { %7105 = vmatmul.mubr.msk.bf16.gmra.mrb[68].mxu1 %vm222_vm0, %v1070_v52  ;;  %7259 = vmatmul.mubr.msk.bf16.gmra.mrb[4].mxu0 %vm222_vm0, %v9289_v63  ;;  %v1029_v63 = vld [vmem:[#allocation2 + $0x141] sm:$0xff]  ;;  %v1675_v52 = vld [vmem:[#allocation2 + $0xa] sm:$0xff] }
 0x1ae   : > { %1405 = vmatprep.mubr.bf16.mxu1 %v10711_v2  ;;  %4670 = vmatprep.mubr.bf16.mxu0 %v10711_v2  ;;  %v1073_v3 = vpack.c.bf16 %v1030_v1, %v1029_v63  ;;  %v1738_v53 = vpack.c.bf16 %v1675_v52, %v1674_v50  ;;  %v1680_v1 = vld [vmem:[#allocation2 + $0x32] sm:$0xff]  ;;  %v5102_v52 = vld [vmem:[#allocation2 + $0x3d] sm:$0xff] }
 0x1af   : > { %v5101_v50 = vld [vmem:[#allocation2 + $0x35] sm:$0xff] }
 0x1b5   : > { %7106 = vmatmul.mubr.msk.bf16.gmra.mrb[72].mxu1 %vm222_vm0, %v1071_v57  ;;  %7260 = vmatmul.mubr.msk.bf16.gmra.mrb[8].mxu0 %vm222_vm0, %v9296_v6  ;;  %v1031_v6 = vld [vmem:[#allocation2 + $0x151] sm:$0xff]  ;;  %v1677_v57 = vld [vmem:[#allocation2 + $0x1a] sm:$0xff] }
 0x1b6   : > { %1415 = vmatprep.mubr.bf16.mxu1 %v10711_v2  ;;  %4680 = vmatprep.mubr.bf16.mxu0 %v10711_v2  ;;  %v1074_v7 = vpack.c.bf16 %v1032_v4, %v1031_v6  ;;  %v9615_v59 = vpack.c.bf16 %v1677_v57, %v1676_v56  ;;  %v1682_v6 = vld [vmem:[#allocation2 + $0x42] sm:$0xff]  ;;  %v1683_v4 = vld [vmem:[#allocation2 + $0x4a] sm:$0xff] }
 0x1b7   : > { %v1710_v56 = vld [vmem:[#allocation2 + $0x122] sm:$0xff]  ;;  %v1711_v57 = vld [vmem:[#allocation2 + $0x12a] sm:$0xff] }
 0x1bd   : > { %7107 = vmatmul.mubr.msk.bf16.gmra.mrb[76].mxu1 %vm222_vm0, %v1072_v62  ;;  %7261 = vmatmul.mubr.msk.bf16.gmra.mrb[12].mxu0 %vm222_vm0, %v9303_v12  ;;  %v1033_v12 = vld [vmem:[#allocation2 + $0x161] sm:$0xff]  ;;  %v1679_v62 = vld [vmem:[#allocation2 + $0x2a] sm:$0xff] }
 0x1be   : > { %1425 = vmatprep.mubr.bf16.mxu1 %v10711_v2  ;;  %4690 = vmatprep.mubr.bf16.mxu0 %v10711_v2  ;;  %v1075_v11 = vpack.c.bf16 %v1034_v10, %v1033_v12  ;;  %v1685_v12 = vld [vmem:[#allocation2 + $0x5a] sm:$0xff]  ;;  %v1686_v10 = vld [vmem:[#allocation2 + $0x62] sm:$0xff] }
 0x1c5   : > { %7108 = vmatmul.mubr.msk.bf16.gmra.mrb[80].mxu1 %vm222_vm0, %v1073_v3  ;;  %7262 = vmatmul.mubr.msk.bf16.gmra.mrb[16].mxu0 %vm222_vm0, %v9310_v18  ;;  %v1035_v18 = vld [vmem:[#allocation2 + $0x171] sm:$0xff]  ;;  %v1681_v3 = vld [vmem:[#allocation2 + $0x3a] sm:$0xff] }
 0x1c6   : > { %1435 = vmatprep.mubr.bf16.mxu1 %v10711_v2  ;;  %4700 = vmatprep.mubr.bf16.mxu0 %v10711_v2  ;;  %v1076_v15 = vpack.c.bf16 %v1036_v13, %v1035_v18  ;;  %v1688_v18 = vld [vmem:[#allocation2 + $0x72] sm:$0xff]  ;;  %v1689_v13 = vld [vmem:[#allocation2 + $0x7a] sm:$0xff] }
 0x1cd   : > { %7109 = vmatmul.mubr.msk.bf16.gmra.mrb[84].mxu1 %vm222_vm0, %v1074_v7  ;;  %7263 = vmatmul.mubr.msk.bf16.gmra.mrb[20].mxu0 %vm222_vm0, %v9317_v24  ;;  %v1037_v24 = vld [vmem:[#allocation2 + $0x181] sm:$0xff]  ;;  %v1684_v7 = vld [vmem:[#allocation2 + $0x52] sm:$0xff] }
 0x1ce   : > { %1445 = vmatprep.mubr.bf16.mxu1 %v10711_v2  ;;  %4710 = vmatprep.mubr.bf16.mxu0 %v10711_v2  ;;  %v1077_v20 = vpack.c.bf16 %v1038_v16, %v1037_v24  ;;  %v1691_v24 = vld [vmem:[#allocation2 + $0x8a] sm:$0xff]  ;;  %v1692_v16 = vld [vmem:[#allocation2 + $0x92] sm:$0xff] }
 0x1d5   : > { %7110 = vmatmul.mubr.msk.bf16.gmra.mrb[88].mxu1 %vm222_vm0, %v1075_v11  ;;  %7264 = vmatmul.mubr.msk.bf16.gmra.mrb[24].mxu0 %vm222_vm0, %v9324_v30  ;;  %v1039_v30 = vld [vmem:[#allocation2 + $0x191] sm:$0xff] }
 0x1d6   : > { %1455 = vmatprep.mubr.bf16.mxu1 %v10711_v2  ;;  %4720 = vmatprep.mubr.bf16.mxu0 %v10711_v2  ;;  %v1078_v22 = vpack.c.bf16 %v1040_v21, %v1039_v30  ;;  %v1687_v11 = vld [vmem:[#allocation2 + $0x6a] sm:$0xff]  ;;  %v1694_v30 = vld [vmem:[#allocation2 + $0xa2] sm:$0xff] }
 0x1d7   : > { %v1695_v21 = vld [vmem:[#allocation2 + $0xaa] sm:$0xff] }
 0x1dd   : > { %7111 = vmatmul.mubr.msk.bf16.gmra.mrb[92].mxu1 %vm222_vm0, %v1076_v15  ;;  %7265 = vmatmul.mubr.msk.bf16.gmra.mrb[28].mxu0 %vm222_vm0, %v9331_v36  ;;  %v1041_v36 = vld [vmem:[#allocation2 + $0x1a1] sm:$0xff] }
 0x1de   : > { %1465 = vmatprep.mubr.bf16.mxu1 %v10711_v2  ;;  %4730 = vmatprep.mubr.bf16.mxu0 %v10711_v2  ;;  %v1079_v27 = vpack.c.bf16 %v1042_v25, %v1041_v36  ;;  %v1690_v15 = vld [vmem:[#allocation2 + $0x82] sm:$0xff]  ;;  %v1697_v36 = vld [vmem:[#allocation2 + $0xba] sm:$0xff] }
 0x1df   : > { %v1698_v25 = vld [vmem:[#allocation2 + $0xc2] sm:$0xff] }
 0x1e5   : > { %7112 = vmatmul.mubr.msk.bf16.gmra.mrb[96].mxu1 %vm222_vm0, %v1077_v20  ;;  %7266 = vmatmul.mubr.msk.bf16.gmra.mrb[32].mxu0 %vm222_vm0, %v9338_v42  ;;  %v1043_v42 = vld [vmem:[#allocation2 + $0x1b1] sm:$0xff]  ;;  %v1693_v20 = vld [vmem:[#allocation2 + $0x9a] sm:$0xff] }
 0x1e6   : > { %1475 = vmatprep.mubr.bf16.mxu1 %v10711_v2  ;;  %4740 = vmatprep.mubr.bf16.mxu0 %v10711_v2  ;;  %v1080_v31 = vpack.c.bf16 %v1044_v29, %v1043_v42  ;;  %v1700_v42 = vld [vmem:[#allocation2 + $0xd2] sm:$0xff]  ;;  %v1701_v29 = vld [vmem:[#allocation2 + $0xda] sm:$0xff] }
 0x1ed   : > { %7113 = vmatmul.mubr.msk.bf16.gmra.mrb[100].mxu1 %vm222_vm0, %v1078_v22  ;;  %7267 = vmatmul.mubr.msk.bf16.gmra.mrb[36].mxu0 %vm222_vm0, %v9345_v48  ;;  %v1045_v48 = vld [vmem:[#allocation2 + $0x1c1] sm:$0xff]  ;;  %v1696_v22 = vld [vmem:[#allocation2 + $0xb2] sm:$0xff] }
 0x1ee   : > { %1485 = vmatprep.mubr.bf16.mxu1 %v10711_v2  ;;  %4750 = vmatprep.mubr.bf16.mxu0 %v10711_v2 }
 0x1f5   : > { %7114 = vmatmul.mubr.msk.bf16.gmra.mrb[104].mxu1 %vm222_vm0, %v1079_v27  ;;  %7268 = vmatmul.mubr.msk.bf16.gmra.mrb[40].mxu0 %vm222_vm0, %v9352_v54  ;;  %v1081_v54 = vpack.c.bf16 %v1046_v33, %v1045_v48  ;;  %v1699_v27 = vld [vmem:[#allocation2 + $0xca] sm:$0xff]  ;;  %v1704_v33 = vld [vmem:[#allocation2 + $0xf2] sm:$0xff] }
 0x1f6   : > { %1495 = vmatprep.mubr.bf16.mxu1 %v10711_v2  ;;  %4760 = vmatprep.mubr.bf16.mxu0 %v10711_v2  ;;  %v1703_v48 = vld [vmem:[#allocation2 + $0xea] sm:$0xff] }
 0x1fd   : > { %7115 = vmatmul.mubr.msk.bf16.gmra.mrb[108].mxu1 %vm222_vm0, %v1080_v31  ;;  %7269 = vmatmul.mubr.msk.bf16.gmra.mrb[44].mxu0 %vm222_vm0, %v9359_v61  ;;  %v1082_v61 = vpack.c.bf16 %v1048_v37, %v1047_v35  ;;  %v1702_v31 = vld [vmem:[#allocation2 + $0xe2] sm:$0xff] }
 0x1fe   : > { %1505 = vmatprep.mubr.bf16.mxu1 %v10711_v2  ;;  %4770 = vmatprep.mubr.bf16.mxu0 %v10711_v2 }
 0x205   : > { %7116 = vmatmul.mubr.msk.bf16.gmra.mrb[112].mxu1 %vm222_vm0, %v1081_v54  ;;  %7270 = vmatmul.mubr.msk.bf16.gmra.mrb[48].mxu0 %vm222_vm0, %v9366_v5  ;;  %v220_v5 = vld [vmem:[%s9057_s4 + $0x218] sm:$0xff]  ;;  %v1705_v54 = vld [vmem:[#allocation2 + $0xfa] sm:$0xff] }
 0x206   : > { %1515 = vmatprep.mubr.bf16.mxu1 %v10711_v2  ;;  %4780 = vmatprep.mubr.bf16.mxu0 %v10711_v2  ;;  %290 = vst.msk [vmem:[#allocation2 + $0x218] sm:$0xff] %vm222_vm0, %v220_v5  ;;  %v9727_v37 = vpack.c.bf16 %v1705_v54, %v1704_v33  ;;  %v1720_v33 = vld [vmem:[#allocation2 + $0x172] sm:$0xff]  ;;  %v1721_v54 = vld [vmem:[#allocation2 + $0x17a] sm:$0xff] }
 0x20d   : > { %7117 = vmatmul.mubr.msk.bf16.gmra.mrb[116].mxu1 %vm222_vm0, %v1082_v61  ;;  %7271 = vmatmul.mubr.msk.bf16.gmra.mrb[52].mxu0 %vm222_vm0, %v9375_v14  ;;  %v1051_v14 = vld [vmem:[#allocation2 + $0x1f1] sm:$0xff]  ;;  %v4477_v35 = vld [vmem:[#allocation2 + $0x21c] sm:$0xff] }
 0x20e   : > { %1525 = vmatprep.mubr.bf16.mxu1 %v10711_v2  ;;  %4790 = vmatprep.mubr.bf16.mxu0 %v10711_v2  ;;  %v1084_v49 = vpack.c.bf16 %v1052_v46, %v1051_v14  ;;  %v8648_v14 = vld [vmem:[%s10708_s1 + $0x80] ss:$8 sps:$4 sm:$0xff]  }
 0x20f   : > { %v1708_v46 = vld [vmem:[#allocation2 + $0x112] sm:$0xff] }
 0x215   : > { %7118 = vmatmul.mubr.msk.bf16.gmra.mrb[120].mxu1 %vm222_vm0, %v1083_v44  ;;  %7272 = vmatmul.mubr.msk.bf16.gmra.mrb[56].mxu0 %vm222_vm0, %v9386_v23  ;;  %v8645_v23 = vld [vmem:[%s10708_s1 + $0x30] ss:$8 sps:$4 sm:$0xff]  }
 0x216   : > { %1535 = vmatprep.mubr.bf16.mxu1 %v10711_v2  ;;  %4800 = vmatprep.mubr.bf16.mxu0 %v10711_v2  ;;  %v5100_v44 = vld [vmem:[#allocation2 + $0x2d] sm:$0xff] }
 0x217   : > { %v5163_v45 = vpack.c.bf16 %v5100_v44, %v5099_v41  ;;  %v1723_v41 = vld [vmem:[#allocation2 + $0x18a] sm:$0xff] }
 0x218   : > { %v5115_v44 = vld [vmem:[#allocation2 + $0xa5] sm:$0xff] }
 0x21d   : > { %7119 = vmatmul.mubr.msk.bf16.gmra.mrb[124].mxu1 %vm222_vm0, %v1084_v49  ;;  %7273 = vmatmul.mubr.msk.bf16.gmra.mrb[60].mxu0 %vm222_vm0, %v9396_v32  ;;  %v8650_v32 = vld [vmem:[%s10708_s1 + $0x84] ss:$8 sps:$4 sm:$0xff]  }
 0x21e   : > { %1910 = vmatprep.mubr.bf16.mxu1 %v10711_v2  ;;  %4810 = vmatprep.mubr.bf16.mxu0 %v10711_v2  ;;  %v1709_v49 = vld [vmem:[#allocation2 + $0x11a] sm:$0xff] }
 0x21f   : > { %5988 = vmatprep.subr.bf16.mxu0 %v8650_v32  ;;  %v5103_v32 = vld [vmem:[#allocation2 + $0x45] sm:$0xff] }
 0x225   : > { %7122 = vmatmul.mubr.msk.bf16.vlgmr.msra.gmra.mrb[0].mxu1 %vm222_vm0, %v1738_v53  ;;  %7274 = vmatmul.mubr.msk.bf16.gmra.mrb[64].mxu0 %vm222_vm0, %v9406_v40  ;;  %v1678_v40 = vld [vmem:[#allocation2 + $0x22] sm:$0xff]  ;;  %v9744_v53 = vpack.c.bf16 %v1709_v49, %v1708_v46  ;;  %v1724_v49 = vld [vmem:[#allocation2 + $0x192] sm:$0xff] }
 0x226   : > { %2564 = vmatpush1.bf16.msra.mxu1 %v8645_v23  ;;  %1920 = vmatprep.mubr.bf16.mxu1 %v10711_v2  ;;  %v9623_v63 = vpack.c.bf16 %v1679_v62, %v1678_v40  ;;  %v5164_v23 = vpack.c.bf16 %v5102_v52, %v5101_v50  ;;  %v9751_v40 = vpack.c.bf16 %v1711_v57, %v1710_v56  ;;  %v1725_v50 = vld [vmem:[#allocation2 + $0x19a] sm:$0xff] }
 0x227   : > { %4820 = vmatprep.mubr.bf16.mxu0 %v10711_v2  ;;  %7428 = vmatprep.subr.bf16.mxu1 %v8907_v58  ;;  %v5104_v58 = vld [vmem:[#allocation2 + $0x4d] sm:$0xff]  ;;  %v5117_v52 = vld [vmem:[#allocation2 + $0xb5] sm:$0xff]  ;;  %v9800_v56 = vpack.c.bf16 %v1725_v50, %v1724_v49  ;;  %v5130_v49 = vld [vmem:[#allocation2 + $0x11d] sm:$0xff] }
 0x228   : > { %v5165_v62 = vpack.c.bf16 %v5104_v58, %v5103_v32  ;;  %v1726_v32 = vld [vmem:[#allocation2 + $0x1a2] sm:$0xff]  ;;  %v1727_v58 = vld [vmem:[#allocation2 + $0x1aa] sm:$0xff] }
 0x22d   : > { %7123 = vmatmul.mubr.msk.bf16.gmra.mrb[4].mxu1 %vm222_vm0, %v9615_v59  ;;  %7275 = vmatmul.mubr.msk.bf16.gmra.mrb[68].mxu0 %vm222_vm0, %v9413_v47  ;;  %v9631_v47 = vpack.c.bf16 %v1681_v3, %v1680_v1  ;;  %v1712_v1 = vld [vmem:[#allocation2 + $0x132] sm:$0xff]  ;;  %v1713_v3 = vld [vmem:[#allocation2 + $0x13a] sm:$0xff] }
 0x22e   : > { %1930 = vmatprep.mubr.bf16.mxu1 %v10711_v2  ;;  %4830 = vmatprep.mubr.bf16.mxu0 %v10711_v2 }
 0x235   : > { %7124 = vmatmul.mubr.msk.bf16.gmra.mrb[8].mxu1 %vm222_vm0, %v9623_v63  ;;  %7276 = vmatmul.mubr.msk.bf16.gmra.mrb[72].mxu0 %vm222_vm0, %v9420_v55  ;;  %v9639_v55 = vpack.c.bf16 %v1683_v4, %v1682_v6  ;;  %v5105_v6 = vld [vmem:[#allocation2 + $0x55] sm:$0xff]  ;;  %v5106_v4 = vld [vmem:[#allocation2 + $0x5d] sm:$0xff] }
 0x236   : > { %1940 = vmatprep.mubr.bf16.mxu1 %v10711_v2  ;;  %4840 = vmatprep.mubr.bf16.mxu0 %v10711_v2 }
 0x23d   : > { %7125 = vmatmul.mubr.msk.bf16.gmra.mrb[12].mxu1 %vm222_vm0, %v9631_v47  ;;  %7277 = vmatmul.mubr.msk.bf16.gmra.mrb[76].mxu0 %vm222_vm0, %v9427_v0  ;;  %v9647_v0 = vpack.c.bf16 %v1685_v12, %v1684_v7  ;;  %v9758_v7 = vpack.c.bf16 %v1713_v3, %v1712_v1  ;;  %v5166_v12 = vpack.c.bf16 %v5106_v4, %v5105_v6  ;;  %v5120_v1 = vld [vmem:[#allocation2 + $0xcd] sm:$0xff] }
 0x23e   : > { %1950 = vmatprep.mubr.bf16.mxu1 %v10711_v2  ;;  %4850 = vmatprep.mubr.bf16.mxu0 %v10711_v2  ;;  %v9807_v3 = vpack.c.bf16 %v1727_v58, %v1726_v32  ;;  %v1728_v4 = vld [vmem:[#allocation2 + $0x1b2] sm:$0xff] }
 0x23f   : > { %v8908_v58 = vld [vmem:[%s10708_s1 + $0x40] ss:$8 sps:$4 sm:$0xff]  }
 0x245   : > { %7126 = vmatmul.mubr.msk.bf16.gmra.mrb[16].mxu1 %vm222_vm0, %v9639_v55  ;;  %7278 = vmatmul.mubr.msk.bf16.gmra.mrb[80].mxu0 %vm222_vm0, %v9434_v9  ;;  %v9655_v9 = vpack.c.bf16 %v1687_v11, %v1686_v10  ;;  %v1714_v10 = vld [vmem:[#allocation2 + $0x142] sm:$0xff]  ;;  %v1715_v11 = vld [vmem:[#allocation2 + $0x14a] sm:$0xff] }
 0x246   : > { %1960 = vmatprep.mubr.bf16.mxu1 %v10711_v2  ;;  %4860 = vmatprep.mubr.bf16.mxu0 %v10711_v2 }
 0x24d   : > { %7127 = vmatmul.mubr.msk.bf16.gmra.mrb[20].mxu1 %vm222_vm0, %v9647_v0  ;;  %7279 = vmatmul.mubr.msk.bf16.gmra.mrb[84].mxu0 %vm222_vm0, %v9441_v17  ;;  %v9663_v17 = vpack.c.bf16 %v1689_v13, %v1688_v18  ;;  %v5107_v18 = vld [vmem:[#allocation2 + $0x65] sm:$0xff]  ;;  %v5108_v13 = vld [vmem:[#allocation2 + $0x6d] sm:$0xff] }
 0x24e   : > { %1970 = vmatprep.mubr.bf16.mxu1 %v10711_v2  ;;  %4870 = vmatprep.mubr.bf16.mxu0 %v10711_v2 }
 0x255   : > { %7128 = vmatmul.mubr.msk.bf16.gmra.mrb[24].mxu1 %vm222_vm0, %v9655_v9  ;;  %7280 = vmatmul.mubr.msk.bf16.gmra.mrb[88].mxu0 %vm222_vm0, %v9448_v26  ;;  %v9671_v26 = vpack.c.bf16 %v1691_v24, %v1690_v15  ;;  %v9765_v15 = vpack.c.bf16 %v1715_v11, %v1714_v10  ;;  %v5167_v24 = vpack.c.bf16 %v5108_v13, %v5107_v18  ;;  %v5121_v10 = vld [vmem:[#allocation2 + $0xd5] sm:$0xff]  ;;  %v5122_v11 = vld [vmem:[#allocation2 + $0xdd] sm:$0xff] }
 0x256   : > { %1980 = vmatprep.mubr.bf16.mxu1 %v10711_v2  ;;  %4880 = vmatprep.mubr.bf16.mxu0 %v10711_v2  ;;  %v5174_v13 = vpack.c.bf16 %v5122_v11, %v5121_v10  ;;  %v5137_v10 = vld [vmem:[#allocation2 + $0x155] sm:$0xff] }
 0x25d   : > { %7129 = vmatmul.mubr.msk.bf16.gmra.mrb[28].mxu1 %vm222_vm0, %v9663_v17  ;;  %7281 = vmatmul.mubr.msk.bf16.gmra.mrb[92].mxu0 %vm222_vm0, %v9455_v34  ;;  %v9679_v34 = vpack.c.bf16 %v1693_v20, %v1692_v16  ;;  %v1716_v16 = vld [vmem:[#allocation2 + $0x152] sm:$0xff]  ;;  %v1717_v20 = vld [vmem:[#allocation2 + $0x15a] sm:$0xff] }
 0x25e   : > { %1990 = vmatprep.mubr.bf16.mxu1 %v10711_v2  ;;  %4890 = vmatprep.mubr.bf16.mxu0 %v10711_v2 }
 0x265   : > { %7130 = vmatmul.mubr.msk.bf16.gmra.mrb[32].mxu1 %vm222_vm0, %v9671_v26  ;;  %7282 = vmatmul.mubr.msk.bf16.gmra.mrb[96].mxu0 %vm222_vm0, %v9462_v43  ;;  %v9687_v43 = vpack.c.bf16 %v1695_v21, %v1694_v30  ;;  %v5109_v30 = vld [vmem:[#allocation2 + $0x75] sm:$0xff]  ;;  %v5110_v21 = vld [vmem:[#allocation2 + $0x7d] sm:$0xff] }
 0x266   : > { %2000 = vmatprep.mubr.bf16.mxu1 %v10711_v2  ;;  %4900 = vmatprep.mubr.bf16.mxu0 %v10711_v2 }
 0x26d   : > { %7131 = vmatmul.mubr.msk.bf16.gmra.mrb[36].mxu1 %vm222_vm0, %v9679_v34  ;;  %7283 = vmatmul.mubr.msk.bf16.gmra.mrb[100].mxu0 %vm222_vm0, %v9469_v51  ;;  %v9695_v51 = vpack.c.bf16 %v1697_v36, %v1696_v22  ;;  %v9772_v22 = vpack.c.bf16 %v1717_v20, %v1716_v16  ;;  %v5168_v36 = vpack.c.bf16 %v5110_v21, %v5109_v30  ;;  %v1731_v16 = vld [vmem:[#allocation2 + $0x1ca] sm:$0xff] }
 0x26e   : > { %2010 = vmatprep.mubr.bf16.mxu1 %v10711_v2  ;;  %4910 = vmatprep.mubr.bf16.mxu0 %v10711_v2  ;;  %v5123_v20 = vld [vmem:[#allocation2 + $0xe5] sm:$0xff]  ;;  %v5124_v30 = vld [vmem:[#allocation2 + $0xed] sm:$0xff] }
 0x275   : > { %7132 = vmatmul.mubr.msk.bf16.gmra.mrb[40].mxu1 %vm222_vm0, %v9687_v43  ;;  %7284 = vmatmul.mubr.msk.bf16.gmra.mrb[104].mxu0 %vm222_vm0, %v9476_v60  ;;  %v9703_v60 = vpack.c.bf16 %v1699_v27, %v1698_v25  ;;  %v1718_v25 = vld [vmem:[#allocation2 + $0x162] sm:$0xff]  ;;  %v1719_v27 = vld [vmem:[#allocation2 + $0x16a] sm:$0xff] }
 0x276   : > { %2020 = vmatprep.mubr.bf16.mxu1 %v10711_v2  ;;  %4920 = vmatprep.mubr.bf16.mxu0 %v10711_v2 }
 0x27d   : > { %7133 = vmatmul.mubr.msk.bf16.gmra.mrb[44].mxu1 %vm222_vm0, %v9695_v51  ;;  %7285 = vmatmul.mubr.msk.bf16.gmra.mrb[108].mxu0 %vm222_vm0, %v9483_v8  ;;  %v9711_v8 = vpack.c.bf16 %v1701_v29, %v1700_v42  ;;  %v5111_v42 = vld [vmem:[#allocation2 + $0x85] sm:$0xff]  ;;  %v5112_v29 = vld [vmem:[#allocation2 + $0x8d] sm:$0xff] }
 0x27e   : > { %2030 = vmatprep.mubr.bf16.mxu1 %v10711_v2  ;;  %4930 = vmatprep.mubr.bf16.mxu0 %v10711_v2 }
 0x285   : > { %7134 = vmatmul.mubr.msk.bf16.gmra.mrb[48].mxu1 %vm222_vm0, %v9703_v60  ;;  %7286 = vmatmul.mubr.msk.bf16.gmra.mrb[112].mxu0 %vm222_vm0, %v9490_v19  ;;  %v9719_v19 = vpack.c.bf16 %v1703_v48, %v1702_v31  ;;  %v9779_v31 = vpack.c.bf16 %v1719_v27, %v1718_v25  ;;  %v5169_v48 = vpack.c.bf16 %v5112_v29, %v5111_v42  ;;  %v1732_v25 = vld [vmem:[#allocation2 + $0x1d2] sm:$0xff]  ;;  %v1733_v27 = vld [vmem:[#allocation2 + $0x1da] sm:$0xff] }
 0x286   : > { %2040 = vmatprep.mubr.bf16.mxu1 %v10711_v2  ;;  %4940 = vmatprep.mubr.bf16.mxu0 %v10711_v2  ;;  %v5125_v42 = vld [vmem:[#allocation2 + $0xf5] sm:$0xff]  ;;  %v5126_v29 = vld [vmem:[#allocation2 + $0xfd] sm:$0xff] }
 0x28d   : > { %7135 = vmatmul.mubr.msk.bf16.gmra.mrb[52].mxu1 %vm222_vm0, %v9711_v8  ;;  %7287 = vmatmul.mubr.msk.bf16.gmra.mrb[116].mxu0 %vm222_vm0, %v9497_v28  ;;  %v4476_v28 = vld [vmem:[#allocation2 + $0x214] sm:$0xff] }
 0x28e   : > { %2050 = vmatprep.mubr.bf16.mxu1 %v10711_v2  ;;  %4950 = vmatprep.mubr.bf16.mxu0 %v10711_v2  ;;  %v4509_v61 = vpack.c.bf16 %v4477_v35, %v4476_v28  ;;  %v5113_v28 = vld [vmem:[#allocation2 + $0x95] sm:$0xff]  ;;  %v5114_v35 = vld [vmem:[#allocation2 + $0x9d] sm:$0xff] }
 0x295   : > { %7136 = vmatmul.mubr.msk.bf16.gmra.mrb[56].mxu1 %vm222_vm0, %v9719_v19  ;;  %7288 = vmatmul.mubr.msk.bf16.gmra.mrb[120].mxu0 %vm222_vm0, %v9504_v38  ;;  %v1707_v38 = vld [vmem:[#allocation2 + $0x10a] sm:$0xff] }
 0x296   : > { %2060 = vmatprep.mubr.bf16.mxu1 %v10711_v2  ;;  %4960 = vmatprep.mubr.bf16.mxu0 %v10711_v2  ;;  %v9734_v5 = vpack.c.bf16 %v1707_v38, %v1706_v39  ;;  %v5170_v39 = vpack.c.bf16 %v5114_v35, %v5113_v28  ;;  %v1722_v38 = vld [vmem:[#allocation2 + $0x182] sm:$0xff]  ;;  %v1735_v28 = vld [vmem:[#allocation2 + $0x1ea] sm:$0xff] }
 0x297   : > { %v5127_v35 = vld [vmem:[#allocation2 + $0x105] sm:$0xff] }
 0x29d   : > { %7137 = vmatmul.mubr.msk.bf16.gmra.mrb[60].mxu1 %vm222_vm0, %v9727_v37  ;;  %7289 = vmatmul.mubr.msk.bf16.gmra.mrb[124].mxu0 %vm222_vm0, %v4509_v61  ;;  %v9786_v61 = vpack.c.bf16 %v1721_v54, %v1720_v33  ;;  %v5176_v33 = vpack.c.bf16 %v5126_v29, %v5125_v42  ;;  %v1734_v54 = vld [vmem:[#allocation2 + $0x1e2] sm:$0xff] }
 0x29e   : > { %2070 = vmatprep.mubr.bf16.mxu1 %v10711_v2  ;;  %5335 = vmatprep.mubr.bf16.mxu0 %v10711_v2  ;;  %v5147_v42 = vld [vmem:[#allocation2 + $0x1a5] sm:$0xff] }
 0x2a5   : > { %7138 = vmatmul.mubr.msk.bf16.gmra.mrb[64].mxu1 %vm222_vm0, %v9734_v5  ;;  %7292 = vmatmul.mubr.msk.bf16.vlgmr.msra.gmra.mrb[0].mxu0 %vm222_vm0, %v5163_v45  ;;  %v5116_v45 = vld [vmem:[#allocation2 + $0xad] sm:$0xff] }
 0x2a6   : > { %2080 = vmatprep.mubr.bf16.mxu1 %v10711_v2  ;;  %5989 = vmatpush1.bf16.msra.mxu0 %v8648_v14  ;;  %v9793_v14 = vpack.c.bf16 %v1723_v41, %v1722_v38  ;;  %v5171_v46 = vpack.c.bf16 %v5116_v45, %v5115_v44  ;;  %v9835_v38 = vpack.c.bf16 %v1735_v28, %v1734_v54  ;;  %v1736_v44 = vld [vmem:[#allocation2 + $0x1f2] sm:$0xff]  ;;  %v1737_v45 = vld [vmem:[#allocation2 + $0x1fa] sm:$0xff]  ;;  %v5151_v28 = vld [vmem:[#allocation2 + $0x1c5] sm:$0xff] }
 0x2a7   : > { %5345 = vmatprep.mubr.bf16.mxu0 %v10711_v2  ;;  %v9842_v50 = vpack.c.bf16 %v1737_v45, %v1736_v44  ;;  %v5155_v44 = vld [vmem:[#allocation2 + $0x1e5] sm:$0xff] }
 0x2ad   : > { %7139 = vmatmul.mubr.msk.bf16.gmra.mrb[68].mxu1 %vm222_vm0, %v9744_v53  ;;  %7293 = vmatmul.mubr.msk.bf16.gmra.mrb[4].mxu0 %vm222_vm0, %v5164_v23  ;;  %v5118_v23 = vld [vmem:[#allocation2 + $0xbd] sm:$0xff] }
 0x2ae   : > { %2090 = vmatprep.mubr.bf16.mxu1 %v10711_v2  ;;  %5355 = vmatprep.mubr.bf16.mxu0 %v10711_v2  ;;  %v5172_v57 = vpack.c.bf16 %v5118_v23, %v5117_v52  ;;  %v5131_v23 = vld [vmem:[#allocation2 + $0x125] sm:$0xff] }
 0x2b5   : > { %7140 = vmatmul.mubr.msk.bf16.gmra.mrb[72].mxu1 %vm222_vm0, %v9751_v40  ;;  %7294 = vmatmul.mubr.msk.bf16.gmra.mrb[8].mxu0 %vm222_vm0, %v5165_v62  ;;  %v5119_v62 = vld [vmem:[#allocation2 + $0xc5] sm:$0xff] }
 0x2b6   : > { %2100 = vmatprep.mubr.bf16.mxu1 %v10711_v2  ;;  %5365 = vmatprep.mubr.bf16.mxu0 %v10711_v2  ;;  %v5173_v6 = vpack.c.bf16 %v5120_v1, %v5119_v62  ;;  %v5133_v62 = vld [vmem:[#allocation2 + $0x135] sm:$0xff]  ;;  %v5134_v1 = vld [vmem:[#allocation2 + $0x13d] sm:$0xff] }
 0x2bd   : > { %7141 = vmatmul.mubr.msk.bf16.gmra.mrb[76].mxu1 %vm222_vm0, %v9758_v7  ;;  %7295 = vmatmul.mubr.msk.bf16.gmra.mrb[12].mxu0 %vm222_vm0, %v5166_v12  ;;  %v1729_v12 = vld [vmem:[#allocation2 + $0x1ba] sm:$0xff] }
 0x2be   : > { %2110 = vmatprep.mubr.bf16.mxu1 %v10711_v2  ;;  %5375 = vmatprep.mubr.bf16.mxu0 %v10711_v2  ;;  %v9814_v18 = vpack.c.bf16 %v1729_v12, %v1728_v4  ;;  %v5136_v4 = vld [vmem:[#allocation2 + $0x14d] sm:$0xff] }
 0x2c5   : > { %7142 = vmatmul.mubr.msk.bf16.gmra.mrb[80].mxu1 %vm222_vm0, %v9765_v15  ;;  %7296 = vmatmul.mubr.msk.bf16.gmra.mrb[16].mxu0 %vm222_vm0, %v5167_v24  ;;  %v1730_v24 = vld [vmem:[#allocation2 + $0x1c2] sm:$0xff] }
 0x2c6   : > { %2120 = vmatprep.mubr.bf16.mxu1 %v10711_v2  ;;  %5385 = vmatprep.mubr.bf16.mxu0 %v10711_v2  ;;  %v9821_v21 = vpack.c.bf16 %v1731_v16, %v1730_v24  ;;  %v5141_v16 = vld [vmem:[#allocation2 + $0x175] sm:$0xff] }
 0x2cd   : > { %7143 = vmatmul.mubr.msk.bf16.gmra.mrb[84].mxu1 %vm222_vm0, %v9772_v22  ;;  %7297 = vmatmul.mubr.msk.bf16.gmra.mrb[20].mxu0 %vm222_vm0, %v5168_v36  ;;  %v5175_v36 = vpack.c.bf16 %v5124_v30, %v5123_v20  ;;  %v5143_v30 = vld [vmem:[#allocation2 + $0x185] sm:$0xff] }
 0x2ce   : > { %2130 = vmatprep.mubr.bf16.mxu1 %v10711_v2  ;;  %5395 = vmatprep.mubr.bf16.mxu0 %v10711_v2 }
 0x2d5   : > { %7144 = vmatmul.mubr.msk.bf16.gmra.mrb[88].mxu1 %vm222_vm0, %v9779_v31  ;;  %7298 = vmatmul.mubr.msk.bf16.gmra.mrb[24].mxu0 %vm222_vm0, %v5169_v48  ;;  %v9828_v48 = vpack.c.bf16 %v1733_v27, %v1732_v25  ;;  %v5145_v25 = vld [vmem:[#allocation2 + $0x195] sm:$0xff] }
 0x2d6   : > { %2140 = vmatprep.mubr.bf16.mxu1 %v10711_v2  ;;  %5405 = vmatprep.mubr.bf16.mxu0 %v10711_v2 }
 0x2dd   : > { %7145 = vmatmul.mubr.msk.bf16.gmra.mrb[92].mxu1 %vm222_vm0, %v9786_v61  ;;  %7299 = vmatmul.mubr.msk.bf16.gmra.mrb[28].mxu0 %vm222_vm0, %v5170_v39  ;;  %v5128_v39 = vld [vmem:[#allocation2 + $0x10d] sm:$0xff] }
 0x2de   : > { %2150 = vmatprep.mubr.bf16.mxu1 %v10711_v2  ;;  %5415 = vmatprep.mubr.bf16.mxu0 %v10711_v2  ;;  %v5177_v41 = vpack.c.bf16 %v5128_v39, %v5127_v35  ;;  %v5153_v39 = vld [vmem:[#allocation2 + $0x1d5] sm:$0xff] }
 0x2e5   : > { %7146 = vmatmul.mubr.msk.bf16.gmra.mrb[96].mxu1 %vm222_vm0, %v9793_v14  ;;  %7300 = vmatmul.mubr.msk.bf16.gmra.mrb[32].mxu0 %vm222_vm0, %v5171_v46  ;;  %v5129_v46 = vld [vmem:[#allocation2 + $0x115] sm:$0xff] }
 0x2e6   : > { %2160 = vmatprep.mubr.bf16.mxu1 %v10711_v2  ;;  %5425 = vmatprep.mubr.bf16.mxu0 %v10711_v2  ;;  %v5178_v52 = vpack.c.bf16 %v5130_v49, %v5129_v46  ;;  %v5157_v46 = vld [vmem:[#allocation2 + $0x1f5] sm:$0xff] }
 0x2ed   : > { %7147 = vmatmul.mubr.msk.bf16.gmra.mrb[100].mxu1 %vm222_vm0, %v9800_v56  ;;  %7301 = vmatmul.mubr.msk.bf16.gmra.mrb[36].mxu0 %vm222_vm0, %v5172_v57  ;;  %v5132_v57 = vld [vmem:[#allocation2 + $0x12d] sm:$0xff] }
 0x2ee   : > { %2170 = vmatprep.mubr.bf16.mxu1 %v10711_v2  ;;  %5435 = vmatprep.mubr.bf16.mxu0 %v10711_v2  ;;  %v5179_v32 = vpack.c.bf16 %v5132_v57, %v5131_v23  ;;  %v5161_v57 = vld [vmem:[#allocation2 + $0x215] sm:$0xff] }
 0x2f5   : > { %7148 = vmatmul.mubr.msk.bf16.gmra.mrb[104].mxu1 %vm222_vm0, %v9807_v3  ;;  %7302 = vmatmul.mubr.msk.bf16.gmra.mrb[40].mxu0 %vm222_vm0, %v5173_v6  ;;  %v5180_v6 = vpack.c.bf16 %v5134_v1, %v5133_v62  ;;  %v5786_v1 = vld [vmem:[#allocation2 + $0x36] sm:$0xff] }
 0x2f6   : > { %2180 = vmatprep.mubr.bf16.mxu1 %v10711_v2  ;;  %5445 = vmatprep.mubr.bf16.mxu0 %v10711_v2 }
 0x2fd   : > { %7149 = vmatmul.mubr.msk.bf16.gmra.mrb[108].mxu1 %vm222_vm0, %v9814_v18  ;;  %7303 = vmatmul.mubr.msk.bf16.gmra.mrb[44].mxu0 %vm222_vm0, %v5174_v13  ;;  %v5139_v13 = vld [vmem:[#allocation2 + $0x165] sm:$0xff] }
 0x2fe   : > { %2190 = vmatprep.mubr.bf16.mxu1 %v10711_v2  ;;  %5455 = vmatprep.mubr.bf16.mxu0 %v10711_v2 }
 0x305   : > { %7150 = vmatmul.mubr.msk.bf16.gmra.mrb[112].mxu1 %vm222_vm0, %v9821_v21  ;;  %7304 = vmatmul.mubr.msk.bf16.gmra.mrb[48].mxu0 %vm222_vm0, %v5175_v36 }
 0x306   : > { %2200 = vmatprep.mubr.bf16.mxu1 %v10711_v2  ;;  %5465 = vmatprep.mubr.bf16.mxu0 %v10711_v2 }
 0x30d   : > { %7151 = vmatmul.mubr.msk.bf16.gmra.mrb[116].mxu1 %vm222_vm0, %v9828_v48  ;;  %7305 = vmatmul.mubr.msk.bf16.gmra.mrb[52].mxu0 %vm222_vm0, %v5176_v33  ;;  %v5149_v33 = vld [vmem:[#allocation2 + $0x1b5] sm:$0xff] }
 0x30e   : > { %2210 = vmatprep.mubr.bf16.mxu1 %v10711_v2  ;;  %5475 = vmatprep.mubr.bf16.mxu0 %v10711_v2 }
 0x315   : > { %7152 = vmatmul.mubr.msk.bf16.gmra.mrb[120].mxu1 %vm222_vm0, %v9835_v38  ;;  %7306 = vmatmul.mubr.msk.bf16.gmra.mrb[56].mxu0 %vm222_vm0, %v5177_v41 }
 0x316   : > { %2220 = vmatprep.mubr.bf16.mxu1 %v10711_v2  ;;  %5485 = vmatprep.mubr.bf16.mxu0 %v10711_v2 }
 0x31d   : > { %7153 = vmatmul.mubr.msk.bf16.gmra.mrb[124].mxu1 %vm222_vm0, %v9842_v50  ;;  %7307 = vmatmul.mubr.msk.bf16.gmra.mrb[60].mxu0 %vm222_vm0, %v5178_v52  ;;  %v5159_v52 = vld [vmem:[#allocation2 + $0x205] sm:$0xff] }
 0x31e   : > { %2595 = vmatprep.mubr.bf16.mxu1 %v10711_v2  ;;  %5495 = vmatprep.mubr.bf16.mxu0 %v10711_v2 }
 0x325   : > { %7156 = vmatmul.mubr.msk.bf16.vlgmr.msra.gmra.mrb[0].mxu1 %vm222_vm0, %v9615_v59  ;;  %7308 = vmatmul.mubr.msk.bf16.gmra.mrb[64].mxu0 %vm222_vm0, %v5179_v32  ;;  %v5135_v59 = vld [vmem:[#allocation2 + $0x145] sm:$0xff] }
 0x326   : > { %7429 = vmatpush1.bf16.msra.mxu1 %v8908_v58  ;;  %2605 = vmatprep.mubr.bf16.mxu1 %v10711_v2  ;;  %v5181_v12 = vpack.c.bf16 %v5136_v4, %v5135_v59  ;;  %v5784_v58 = vld [vmem:[#allocation2 + $0x26] sm:$0xff] }
 0x327   : > { %5505 = vmatprep.mubr.bf16.mxu0 %v10711_v2  ;;  %v5788_v59 = vld [vmem:[#allocation2 + $0x46] sm:$0xff] }
 0x32d   : > { %7157 = vmatmul.mubr.msk.bf16.gmra.mrb[4].mxu1 %vm222_vm0, %v9623_v63  ;;  %7309 = vmatmul.mubr.msk.bf16.gmra.mrb[68].mxu0 %vm222_vm0, %v5180_v6  ;;  %v5138_v63 = vld [vmem:[#allocation2 + $0x15d] sm:$0xff] }
 0x32e   : > { %2615 = vmatprep.mubr.bf16.mxu1 %v10711_v2  ;;  %5515 = vmatprep.mubr.bf16.mxu0 %v10711_v2  ;;  %v5182_v11 = vpack.c.bf16 %v5138_v63, %v5137_v10  ;;  %v5792_v63 = vld [vmem:[#allocation2 + $0x66] sm:$0xff] }
 0x335   : > { %7158 = vmatmul.mubr.msk.bf16.gmra.mrb[8].mxu1 %vm222_vm0, %v9631_v47  ;;  %7310 = vmatmul.mubr.msk.bf16.gmra.mrb[72].mxu0 %vm222_vm0, %v5181_v12  ;;  %v5140_v47 = vld [vmem:[#allocation2 + $0x16d] sm:$0xff]  ;;  %v5790_v12 = vld [vmem:[#allocation2 + $0x56] sm:$0xff] }
 0x336   : > { %2625 = vmatprep.mubr.bf16.mxu1 %v10711_v2  ;;  %5525 = vmatprep.mubr.bf16.mxu0 %v10711_v2  ;;  %v5183_v24 = vpack.c.bf16 %v5140_v47, %v5139_v13  ;;  %v5794_v13 = vld [vmem:[#allocation2 + $0x76] sm:$0xff] }
 0x33d   : > { %7159 = vmatmul.mubr.msk.bf16.gmra.mrb[12].mxu1 %vm222_vm0, %v9639_v55  ;;  %7311 = vmatmul.mubr.msk.bf16.gmra.mrb[76].mxu0 %vm222_vm0, %v5182_v11  ;;  %v5142_v55 = vld [vmem:[#allocation2 + $0x17d] sm:$0xff] }
 0x33e   : > { %2635 = vmatprep.mubr.bf16.mxu1 %v10711_v2  ;;  %5535 = vmatprep.mubr.bf16.mxu0 %v10711_v2  ;;  %v5184_v20 = vpack.c.bf16 %v5142_v55, %v5141_v16  ;;  %v5798_v55 = vld [vmem:[#allocation2 + $0x96] sm:$0xff] }
 0x345   : > { %7160 = vmatmul.mubr.msk.bf16.gmra.mrb[16].mxu1 %vm222_vm0, %v9647_v0  ;;  %7312 = vmatmul.mubr.msk.bf16.gmra.mrb[80].mxu0 %vm222_vm0, %v5183_v24  ;;  %v5144_v0 = vld [vmem:[#allocation2 + $0x18d] sm:$0xff] }
 0x346   : > { %2645 = vmatprep.mubr.bf16.mxu1 %v10711_v2  ;;  %5545 = vmatprep.mubr.bf16.mxu0 %v10711_v2  ;;  %v5185_v36 = vpack.c.bf16 %v5144_v0, %v5143_v30  ;;  %v5796_v24 = vld [vmem:[#allocation2 + $0x86] sm:$0xff] }
 0x347   : > { %v5800_v30 = vld [vmem:[#allocation2 + $0xa6] sm:$0xff] }
 0x34d   : > { %7161 = vmatmul.mubr.msk.bf16.gmra.mrb[20].mxu1 %vm222_vm0, %v9655_v9  ;;  %7313 = vmatmul.mubr.msk.bf16.gmra.mrb[84].mxu0 %vm222_vm0, %v5184_v20  ;;  %v5146_v9 = vld [vmem:[#allocation2 + $0x19d] sm:$0xff] }
 0x34e   : > { %2655 = vmatprep.mubr.bf16.mxu1 %v10711_v2  ;;  %5555 = vmatprep.mubr.bf16.mxu0 %v10711_v2  ;;  %v5186_v27 = vpack.c.bf16 %v5146_v9, %v5145_v25  ;;  %v5804_v9 = vld [vmem:[#allocation2 + $0xc6] sm:$0xff] }
 0x355   : > { %7162 = vmatmul.mubr.msk.bf16.gmra.mrb[24].mxu1 %vm222_vm0, %v9663_v17  ;;  %7314 = vmatmul.mubr.msk.bf16.gmra.mrb[88].mxu0 %vm222_vm0, %v5185_v36  ;;  %v5148_v17 = vld [vmem:[#allocation2 + $0x1ad] sm:$0xff]  ;;  %v5802_v36 = vld [vmem:[#allocation2 + $0xb6] sm:$0xff] }
 0x356   : > { %2665 = vmatprep.mubr.bf16.mxu1 %v10711_v2  ;;  %5565 = vmatprep.mubr.bf16.mxu0 %v10711_v2  ;;  %v5187_v29 = vpack.c.bf16 %v5148_v17, %v5147_v42  ;;  %v5806_v42 = vld [vmem:[#allocation2 + $0xd6] sm:$0xff] }
 0x35d   : > { %7163 = vmatmul.mubr.msk.bf16.gmra.mrb[28].mxu1 %vm222_vm0, %v9671_v26  ;;  %7315 = vmatmul.mubr.msk.bf16.gmra.mrb[92].mxu0 %vm222_vm0, %v5186_v27  ;;  %v5150_v26 = vld [vmem:[#allocation2 + $0x1bd] sm:$0xff] }
 0x35e   : > { %2675 = vmatprep.mubr.bf16.mxu1 %v10711_v2  ;;  %5575 = vmatprep.mubr.bf16.mxu0 %v10711_v2  ;;  %v5188_v54 = vpack.c.bf16 %v5150_v26, %v5149_v33 }
 0x365   : > { %7164 = vmatmul.mubr.msk.bf16.gmra.mrb[32].mxu1 %vm222_vm0, %v9679_v34  ;;  %7316 = vmatmul.mubr.msk.bf16.gmra.mrb[96].mxu0 %vm222_vm0, %v5187_v29  ;;  %v5152_v34 = vld [vmem:[#allocation2 + $0x1cd] sm:$0xff] }
 0x366   : > { %2685 = vmatprep.mubr.bf16.mxu1 %v10711_v2  ;;  %5585 = vmatprep.mubr.bf16.mxu0 %v10711_v2  ;;  %v5189_v35 = vpack.c.bf16 %v5152_v34, %v5151_v28  ;;  %v5809_v28 = vld [vmem:[#allocation2 + $0xee] sm:$0xff] }
 0x36d   : > { %7165 = vmatmul.mubr.msk.bf16.gmra.mrb[36].mxu1 %vm222_vm0, %v9687_v43  ;;  %7317 = vmatmul.mubr.msk.bf16.gmra.mrb[100].mxu0 %vm222_vm0, %v5188_v54  ;;  %v5154_v43 = vld [vmem:[#allocation2 + $0x1dd] sm:$0xff] }
 0x36e   : > { %2695 = vmatprep.mubr.bf16.mxu1 %v10711_v2  ;;  %5595 = vmatprep.mubr.bf16.mxu0 %v10711_v2  ;;  %v5190_v41 = vpack.c.bf16 %v5154_v43, %v5153_v39 }
 0x375   : > { %7166 = vmatmul.mubr.msk.bf16.gmra.mrb[40].mxu1 %vm222_vm0, %v9695_v51  ;;  %7318 = vmatmul.mubr.msk.bf16.gmra.mrb[104].mxu0 %vm222_vm0, %v5189_v35  ;;  %v5156_v51 = vld [vmem:[#allocation2 + $0x1ed] sm:$0xff] }
 0x376   : > { %2705 = vmatprep.mubr.bf16.mxu1 %v10711_v2  ;;  %5605 = vmatprep.mubr.bf16.mxu0 %v10711_v2  ;;  %v5191_v45 = vpack.c.bf16 %v5156_v51, %v5155_v44  ;;  %v5811_v44 = vld [vmem:[#allocation2 + $0xfe] sm:$0xff] }
 0x37d   : > { %7167 = vmatmul.mubr.msk.bf16.gmra.mrb[44].mxu1 %vm222_vm0, %v9703_v60  ;;  %7319 = vmatmul.mubr.msk.bf16.gmra.mrb[108].mxu0 %vm222_vm0, %v5190_v41  ;;  %v5158_v60 = vld [vmem:[#allocation2 + $0x1fd] sm:$0xff] }
 0x37e   : > { %2715 = vmatprep.mubr.bf16.mxu1 %v10711_v2  ;;  %5615 = vmatprep.mubr.bf16.mxu0 %v10711_v2  ;;  %v5192_v49 = vpack.c.bf16 %v5158_v60, %v5157_v46 }
 0x385   : > { %7168 = vmatmul.mubr.msk.bf16.gmra.mrb[48].mxu1 %vm222_vm0, %v9711_v8  ;;  %7320 = vmatmul.mubr.msk.bf16.gmra.mrb[112].mxu0 %vm222_vm0, %v5191_v45  ;;  %v5160_v8 = vld [vmem:[#allocation2 + $0x20d] sm:$0xff] }
 0x386   : > { %2725 = vmatprep.mubr.bf16.mxu1 %v10711_v2  ;;  %5625 = vmatprep.mubr.bf16.mxu0 %v10711_v2  ;;  %v5193_v23 = vpack.c.bf16 %v5160_v8, %v5159_v52  ;;  %v5813_v52 = vld [vmem:[#allocation2 + $0x10e] sm:$0xff] }
 0x38d   : > { %7169 = vmatmul.mubr.msk.bf16.gmra.mrb[52].mxu1 %vm222_vm0, %v9719_v19  ;;  %7321 = vmatmul.mubr.msk.bf16.gmra.mrb[116].mxu0 %vm222_vm0, %v5192_v49  ;;  %v5162_v19 = vld [vmem:[#allocation2 + $0x21d] sm:$0xff] }
 0x38e   : > { %2735 = vmatprep.mubr.bf16.mxu1 %v10711_v2  ;;  %5635 = vmatprep.mubr.bf16.mxu0 %v10711_v2  ;;  %v5194_v32 = vpack.c.bf16 %v5162_v19, %v5161_v57 }
 0x395   : > { %7170 = vmatmul.mubr.msk.bf16.gmra.mrb[56].mxu1 %vm222_vm0, %v9727_v37  ;;  %7322 = vmatmul.mubr.msk.bf16.gmra.mrb[120].mxu0 %vm222_vm0, %v5193_v23  ;;  %v5785_v37 = vld [vmem:[#allocation2 + $0x2e] sm:$0xff] }
 0x396   : > { %2745 = vmatprep.mubr.bf16.mxu1 %v10711_v2  ;;  %5645 = vmatprep.mubr.bf16.mxu0 %v10711_v2  ;;  %v5848_v62 = vpack.c.bf16 %v5785_v37, %v5784_v58  ;;  %v2422_v58 = vld [vmem:[#allocation2 + $0x20a] sm:$0xff]  ;;  %v5814_v37 = vld [vmem:[#allocation2 + $0x116] sm:$0xff] }
 0x39d   : > { %7171 = vmatmul.mubr.msk.bf16.gmra.mrb[60].mxu1 %vm222_vm0, %v9734_v5  ;;  %7323 = vmatmul.mubr.msk.bf16.gmra.mrb[124].mxu0 %vm222_vm0, %v5194_v32  ;;  %v5787_v5 = vld [vmem:[#allocation2 + $0x3e] sm:$0xff] }
 0x39e   : > { %2755 = vmatprep.mubr.bf16.mxu1 %v10711_v2  ;;  %6020 = vmatprep.mubr.bf16.mxu0 %v10711_v2  ;;  %v5849_v6 = vpack.c.bf16 %v5787_v5, %v5786_v1 }
 0x3a5   : > { %7172 = vmatmul.mubr.msk.bf16.gmra.mrb[64].mxu1 %vm222_vm0, %v9744_v53  ;;  %7326 = vmatmul.mubr.msk.bf16.vlgmr.msra.gmra.mrb[0].mxu0 %vm222_vm0, %v5848_v62  ;;  %v5789_v53 = vld [vmem:[#allocation2 + $0x4e] sm:$0xff]  ;;  %v5815_v62 = vld [vmem:[#allocation2 + $0x11e] sm:$0xff] }
 0x3a6   : > { %2765 = vmatprep.mubr.bf16.mxu1 %v10711_v2  ;;  %6030 = vmatprep.mubr.bf16.mxu0 %v10711_v2  ;;  %v5850_v4 = vpack.c.bf16 %v5789_v53, %v5788_v59  ;;  %v5863_v53 = vpack.c.bf16 %v5815_v62, %v5814_v37  ;;  %v3084_v62 = vld [vmem:[#allocation2 + $0x153] sm:$0xff] }
 0x3ad   : > { %7173 = vmatmul.mubr.msk.bf16.gmra.mrb[68].mxu1 %vm222_vm0, %v9751_v40  ;;  %7327 = vmatmul.mubr.msk.bf16.gmra.mrb[4].mxu0 %vm222_vm0, %v5849_v6  ;;  %v5791_v40 = vld [vmem:[#allocation2 + $0x5e] sm:$0xff] }
 0x3ae   : > { %2775 = vmatprep.mubr.bf16.mxu1 %v10711_v2  ;;  %6040 = vmatprep.mubr.bf16.mxu0 %v10711_v2  ;;  %v5851_v10 = vpack.c.bf16 %v5791_v40, %v5790_v12  ;;  %v3077_v12 = vld [vmem:[#allocation2 + $0x11b] sm:$0xff]  ;;  %v5816_v40 = vld [vmem:[#allocation2 + $0x126] sm:$0xff] }
 0x3b5   : > { %7174 = vmatmul.mubr.msk.bf16.gmra.mrb[72].mxu1 %vm222_vm0, %v9758_v7  ;;  %7328 = vmatmul.mubr.msk.bf16.gmra.mrb[8].mxu0 %vm222_vm0, %v5850_v4  ;;  %v5793_v7 = vld [vmem:[#allocation2 + $0x6e] sm:$0xff] }
 0x3b6   : > { %2785 = vmatprep.mubr.bf16.mxu1 %v10711_v2  ;;  %6050 = vmatprep.mubr.bf16.mxu0 %v10711_v2  ;;  %v5852_v11 = vpack.c.bf16 %v5793_v7, %v5792_v63 }
 0x3bd   : > { %7175 = vmatmul.mubr.msk.bf16.gmra.mrb[76].mxu1 %vm222_vm0, %v9765_v15  ;;  %7329 = vmatmul.mubr.msk.bf16.gmra.mrb[12].mxu0 %vm222_vm0, %v5851_v10  ;;  %v5795_v15 = vld [vmem:[#allocation2 + $0x7e] sm:$0xff]  ;;  %v5817_v10 = vld [vmem:[#allocation2 + $0x12e] sm:$0xff] }
 0x3be   : > { %2795 = vmatprep.mubr.bf16.mxu1 %v10711_v2  ;;  %6060 = vmatprep.mubr.bf16.mxu0 %v10711_v2  ;;  %v5853_v47 = vpack.c.bf16 %v5795_v15, %v5794_v13  ;;  %v5864_v15 = vpack.c.bf16 %v5817_v10, %v5816_v40 }
 0x3c5   : > { %7176 = vmatmul.mubr.msk.bf16.gmra.mrb[80].mxu1 %vm222_vm0, %v9772_v22  ;;  %7330 = vmatmul.mubr.msk.bf16.gmra.mrb[16].mxu0 %vm222_vm0, %v5852_v11  ;;  %v5797_v22 = vld [vmem:[#allocation2 + $0x8e] sm:$0xff] }
 0x3c6   : > { %2805 = vmatprep.mubr.bf16.mxu1 %v10711_v2  ;;  %6070 = vmatprep.mubr.bf16.mxu0 %v10711_v2  ;;  %v5854_v16 = vpack.c.bf16 %v5797_v22, %v5796_v24  ;;  %v3078_v24 = vld [vmem:[#allocation2 + $0x123] sm:$0xff]  ;;  %v3079_v22 = vld [vmem:[#allocation2 + $0x12b] sm:$0xff] }
 0x3cd   : > { %7177 = vmatmul.mubr.msk.bf16.gmra.mrb[84].mxu1 %vm222_vm0, %v9779_v31  ;;  %7331 = vmatmul.mubr.msk.bf16.gmra.mrb[20].mxu0 %vm222_vm0, %v5853_v47  ;;  %v5799_v31 = vld [vmem:[#allocation2 + $0x9e] sm:$0xff] }
 0x3ce   : > { %2815 = vmatprep.mubr.bf16.mxu1 %v10711_v2  ;;  %6080 = vmatprep.mubr.bf16.mxu0 %v10711_v2  ;;  %v5855_v20 = vpack.c.bf16 %v5799_v31, %v5798_v55  ;;  %v5819_v55 = vld [vmem:[#allocation2 + $0x13e] sm:$0xff] }
 0x3d5   : > { %7178 = vmatmul.mubr.msk.bf16.gmra.mrb[88].mxu1 %vm222_vm0, %v9786_v61  ;;  %7332 = vmatmul.mubr.msk.bf16.gmra.mrb[24].mxu0 %vm222_vm0, %v5854_v16  ;;  %v5801_v61 = vld [vmem:[#allocation2 + $0xae] sm:$0xff]  ;;  %v5818_v16 = vld [vmem:[#allocation2 + $0x136] sm:$0xff] }
 0x3d6   : > { %2825 = vmatprep.mubr.bf16.mxu1 %v10711_v2  ;;  %6090 = vmatprep.mubr.bf16.mxu0 %v10711_v2  ;;  %v5856_v0 = vpack.c.bf16 %v5801_v61, %v5800_v30  ;;  %v3125_v30 = vpack.c.bf16 %v3079_v22, %v3078_v24  ;;  %v3086_v22 = vld [vmem:[#allocation2 + $0x163] sm:$0xff] }
 0x3dd   : > { %7179 = vmatmul.mubr.msk.bf16.gmra.mrb[92].mxu1 %vm222_vm0, %v9793_v14  ;;  %7333 = vmatmul.mubr.msk.bf16.gmra.mrb[28].mxu0 %vm222_vm0, %v5855_v20  ;;  %v5803_v14 = vld [vmem:[#allocation2 + $0xbe] sm:$0xff] }
 0x3de   : > { %2835 = vmatprep.mubr.bf16.mxu1 %v10711_v2  ;;  %6100 = vmatprep.mubr.bf16.mxu0 %v10711_v2  ;;  %v5857_v25 = vpack.c.bf16 %v5803_v14, %v5802_v36  ;;  %v3080_v14 = vld [vmem:[#allocation2 + $0x133] sm:$0xff] }
 0x3e5   : > { %7180 = vmatmul.mubr.msk.bf16.gmra.mrb[96].mxu1 %vm222_vm0, %v9800_v56  ;;  %7334 = vmatmul.mubr.msk.bf16.gmra.mrb[32].mxu0 %vm222_vm0, %v5856_v0  ;;  %v5805_v56 = vld [vmem:[#allocation2 + $0xce] sm:$0xff]  ;;  %v5865_v0 = vpack.c.bf16 %v5819_v55, %v5818_v16  ;;  %v5826_v55 = vld [vmem:[#allocation2 + $0x176] sm:$0xff] }
 0x3e6   : > { %2845 = vmatprep.mubr.bf16.mxu1 %v10711_v2  ;;  %6110 = vmatprep.mubr.bf16.mxu0 %v10711_v2  ;;  %v5858_v27 = vpack.c.bf16 %v5805_v56, %v5804_v9  ;;  %v5820_v9 = vld [vmem:[#allocation2 + $0x146] sm:$0xff]  ;;  %v5821_v56 = vld [vmem:[#allocation2 + $0x14e] sm:$0xff] }
 0x3e7   : > { %v3087_v16 = vld [vmem:[#allocation2 + $0x16b] sm:$0xff] }
 0x3ed   : > { %7181 = vmatmul.mubr.msk.bf16.gmra.mrb[100].mxu1 %vm222_vm0, %v9807_v3  ;;  %7335 = vmatmul.mubr.msk.bf16.gmra.mrb[36].mxu0 %vm222_vm0, %v5857_v25  ;;  %v5807_v3 = vld [vmem:[#allocation2 + $0xde] sm:$0xff] }
 0x3ee   : > { %2855 = vmatprep.mubr.bf16.mxu1 %v10711_v2  ;;  %6120 = vmatprep.mubr.bf16.mxu0 %v10711_v2  ;;  %v5859_v26 = vpack.c.bf16 %v5807_v3, %v5806_v42  ;;  %v3081_v25 = vld [vmem:[#allocation2 + $0x13b] sm:$0xff] }
 0x3ef   : > { %v3126_v3 = vpack.c.bf16 %v3081_v25, %v3080_v14  ;;  %v3129_v25 = vpack.c.bf16 %v3087_v16, %v3086_v22  ;;  %v5831_v22 = vld [vmem:[#allocation2 + $0x19e] sm:$0xff] }
 0x3f5   : > { %7182 = vmatmul.mubr.msk.bf16.gmra.mrb[104].mxu1 %vm222_vm0, %v9814_v18  ;;  %7336 = vmatmul.mubr.msk.bf16.gmra.mrb[40].mxu0 %vm222_vm0, %v5858_v27  ;;  %v5808_v18 = vld [vmem:[#allocation2 + $0xe6] sm:$0xff] }
 0x3f6   : > { %2865 = vmatprep.mubr.bf16.mxu1 %v10711_v2  ;;  %6130 = vmatprep.mubr.bf16.mxu0 %v10711_v2  ;;  %v5860_v43 = vpack.c.bf16 %v5809_v28, %v5808_v18  ;;  %v5866_v18 = vpack.c.bf16 %v5821_v56, %v5820_v9 }
 0x3f8   : > { %v9987_v17 = vpop.f32.mrb[0].mxu1 }
 0x3f9   : > { %v9989_v29 = vpop.f32.mrb[1].mxu1 }
 0x3fa   : > { %v9991_v33 = vpop.f32.mrb[2].mxu1 }
 0x3fb   : > { %v9993_v54 = vpop.f32.mrb[3].mxu1 }
 0x3fd   : > { %7183 = vmatmul.mubr.msk.bf16.gmra.mrb[108].mxu1 %vm222_vm0, %v9821_v21  ;;  %7337 = vmatmul.mubr.msk.bf16.gmra.mrb[44].mxu0 %vm222_vm0, %v5859_v26  ;;  %v5810_v21 = vld [vmem:[#allocation2 + $0xf6] sm:$0xff] }
 0x3fe   : > { %2875 = vmatprep.mubr.bf16.mxu1 %v10711_v2  ;;  %6140 = vmatprep.mubr.bf16.mxu0 %v10711_v2  ;;  %v5861_v60 = vpack.c.bf16 %v5811_v44, %v5810_v21  ;;  %v3083_v21 = vld [vmem:[#allocation2 + $0x14b] sm:$0xff]  ;;  %v5822_v44 = vld [vmem:[#allocation2 + $0x156] sm:$0xff] }
 0x400   : > { %v10000_v34 = vpop.f32.mrb[4].mxu1 }
 0x401   : > { %v10002_v35 = vpop.f32.mrb[5].mxu1 }
 0x402   : > { %v10004_v39 = vpop.f32.mrb[6].mxu1 }
 0x403   : > { %v10006_v41 = vpop.f32.mrb[7].mxu1 }
 0x405   : > { %7184 = vmatmul.mubr.msk.bf16.gmra.mrb[112].mxu1 %vm222_vm0, %v9828_v48  ;;  %7338 = vmatmul.mubr.msk.bf16.gmra.mrb[48].mxu0 %vm222_vm0, %v5860_v43  ;;  %v5812_v48 = vld [vmem:[#allocation2 + $0x106] sm:$0xff] }
 0x406   : > { %2885 = vmatprep.mubr.bf16.mxu1 %v10711_v2  ;;  %6150 = vmatprep.mubr.bf16.mxu0 %v10711_v2  ;;  %v5862_v19 = vpack.c.bf16 %v5813_v52, %v5812_v48  ;;  %v3082_v43 = vld [vmem:[#allocation2 + $0x143] sm:$0xff] }
 0x408   : > { %v10013_v51 = vpop.f32.mrb[8].mxu1 }
 0x409   : > { %v10015_v45 = vpop.f32.mrb[9].mxu1 }
 0x40a   : > { %v10017_v46 = vpop.f32.mrb[10].mxu1 }
 0x40b   : > { %v10019_v49 = vpop.f32.mrb[11].mxu1 }
 0x40d   : > { %7185 = vmatmul.mubr.msk.bf16.gmra.mrb[116].mxu1 %vm222_vm0, %v9835_v38  ;;  %7339 = vmatmul.mubr.msk.bf16.gmra.mrb[52].mxu0 %vm222_vm0, %v5861_v60  ;;  %v2421_v38 = vld [vmem:[#allocation2 + $0x202] sm:$0xff] }
 0x40e   : > { %2895 = vmatprep.mubr.bf16.mxu1 %v10711_v2  ;;  %6160 = vmatprep.mubr.bf16.mxu0 %v10711_v2  ;;  %v2454_v6 = vpack.c.bf16 %v2422_v58, %v2421_v38  ;;  %v5823_v60 = vld [vmem:[#allocation2 + $0x15e] sm:$0xff] }
 0x40f   : > { %v5867_v58 = vpack.c.bf16 %v5823_v60, %v5822_v44  ;;  %v5829_v44 = vld [vmem:[#allocation2 + $0x18e] sm:$0xff] }
 0x410   : > { %v10026_v8 = vpop.f32.mrb[12].mxu1 }
 0x411   : > { %v10028_v23 = vpop.f32.mrb[13].mxu1 }
 0x412   : > { %v10030_v57 = vpop.f32.mrb[14].mxu1 }
 0x413   : > { %v10032_v32 = vpop.f32.mrb[15].mxu1 }
 0x415   : > { %7186 = vmatmul.mubr.msk.bf16.gmra.mrb[120].mxu1 %vm222_vm0, %v9842_v50  ;;  %7340 = vmatmul.mubr.msk.bf16.gmra.mrb[56].mxu0 %vm222_vm0, %v5862_v19  ;;  %v3076_v50 = vld [vmem:[#allocation2 + $0x113] sm:$0xff]  ;;  %v3127_v19 = vpack.c.bf16 %v3083_v21, %v3082_v43  ;;  %v3089_v43 = vld [vmem:[#allocation2 + $0x17b] sm:$0xff]  ;;  %v5828_v21 = vld [vmem:[#allocation2 + $0x186] sm:$0xff] }
 0x416   : > { %2905 = vmatprep.mubr.bf16.mxu1 %v10711_v2  ;;  %6170 = vmatprep.mubr.bf16.mxu0 %v10711_v2  ;;  %v3124_v11 = vpack.c.bf16 %v3077_v12, %v3076_v50  ;;  %v5825_v50 = vld [vmem:[#allocation2 + $0x16e] sm:$0xff] }
 0x418   : > { %v10039_v1 = vpop.f32.mrb[16].mxu1 }
 0x419   : > { %v10041_v5 = vpop.f32.mrb[17].mxu1 }
 0x41a   : > { %v10043_v59 = vpop.f32.mrb[18].mxu1 }
 0x41b   : > { %v10045_v4 = vpop.f32.mrb[19].mxu1 }
 0x41d   : > { %7187 = vmatmul.mubr.msk.bf16.gmra.mrb[124].mxu1 %vm222_vm0, %v2454_v6  ;;  %7341 = vmatmul.mubr.msk.bf16.gmra.mrb[60].mxu0 %vm222_vm0, %v5863_v53  ;;  %v3085_v6 = vld [vmem:[#allocation2 + $0x15b] sm:$0xff]  ;;  %v5824_v53 = vld [vmem:[#allocation2 + $0x166] sm:$0xff] }
 0x41e   : > { %3440 = vmatprep.mubr.bf16.mxu1 %v10711_v2  ;;  %6180 = vmatprep.mubr.bf16.mxu0 %v10711_v2  ;;  %v3128_v10 = vpack.c.bf16 %v3085_v6, %v3084_v62  ;;  %v5870_v6 = vpack.c.bf16 %v5829_v44, %v5828_v21  ;;  %v3093_v21 = vld [vmem:[#allocation2 + $0x19b] sm:$0xff]  ;;  %v5832_v44 = vld [vmem:[#allocation2 + $0x1a6] sm:$0xff] }
 0x420   : > { %v10051_v63 = vpop.f32.mrb[20].mxu1 }
 0x421   : > { %v10053_v7 = vpop.f32.mrb[21].mxu1 }
 0x422   : > { %v10055_v13 = vpop.f32.mrb[22].mxu1 }
 0x423   : > { %v10057_v47 = vpop.f32.mrb[23].mxu1 }
 0x425   : > { %7206 = vmatmul.mubr.msk.bf16.vlgmr.msra.gmra.mrb[64].mxu1 %vm222_vm0, %v3124_v11  ;;  %7342 = vmatmul.mubr.msk.bf16.gmra.mrb[64].mxu0 %vm222_vm0, %v5864_v15  ;;  %v5868_v15 = vpack.c.bf16 %v5825_v50, %v5824_v53  ;;  %v3090_v50 = vld [vmem:[#allocation2 + $0x183] sm:$0xff] }
 0x426   : > { %3450 = vmatprep.mubr.bf16.mxu1 %v10711_v2  ;;  %6190 = vmatprep.mubr.bf16.mxu0 %v10711_v2 }
 0x428   : > { %v10063_v31 = vpop.f32.mrb[24].mxu1 }
 0x429   : > { %v10065_v20 = vpop.f32.mrb[25].mxu1 }
 0x42a   : > { %v10067_v61 = vpop.f32.mrb[26].mxu1 }
 0x42b   : > { %v10069_v36 = vpop.f32.mrb[27].mxu1 }
 0x42d   : > { %7207 = vmatmul.mubr.msk.bf16.gmra.mrb[68].mxu1 %vm222_vm0, %v3125_v30  ;;  %7343 = vmatmul.mubr.msk.bf16.gmra.mrb[68].mxu0 %vm222_vm0, %v5865_v0  ;;  %v5827_v30 = vld [vmem:[#allocation2 + $0x17e] sm:$0xff] }
 0x42e   : > { %3460 = vmatprep.mubr.bf16.mxu1 %v10711_v2  ;;  %6200 = vmatprep.mubr.bf16.mxu0 %v10711_v2  ;;  %v5869_v56 = vpack.c.bf16 %v5827_v30, %v5826_v55 }
 0x430   : > { %v10075_v27 = vpop.f32.mrb[28].mxu1 }
 0x431   : > { %v10077_v42 = vpop.f32.mrb[29].mxu1 }
 0x432   : > { %v10079_v26 = vpop.f32.mrb[30].mxu1 }
 0x433   : > { %v10081_v28 = vpop.f32.mrb[31].mxu1 }
 0x435   : > { %7208 = vmatmul.mubr.msk.bf16.gmra.mrb[72].mxu1 %vm222_vm0, %v3126_v3  ;;  %7344 = vmatmul.mubr.msk.bf16.gmra.mrb[72].mxu0 %vm222_vm0, %v5866_v18  ;;  %v3088_v18 = vld [vmem:[#allocation2 + $0x173] sm:$0xff] }
 0x436   : > { %3470 = vmatprep.mubr.bf16.mxu1 %v10711_v2  ;;  %6210 = vmatprep.mubr.bf16.mxu0 %v10711_v2 }
 0x438   : > { %v10087_v48 = vpop.f32.mrb[32].mxu1 }
 0x439   : > { %v10089_v52 = vpop.f32.mrb[33].mxu1 }
 0x43a   : > { %v10091_v38 = vpop.f32.mrb[34].mxu1 }
 0x43b   : > { %v10093_v37 = vpop.f32.mrb[35].mxu1 }
 0x43d   : > { %7209 = vmatmul.mubr.msk.bf16.gmra.mrb[76].mxu1 %vm222_vm0, %v3127_v19  ;;  %7345 = vmatmul.mubr.msk.bf16.gmra.mrb[76].mxu0 %vm222_vm0, %v5867_v58  ;;  %v3130_v58 = vpack.c.bf16 %v3089_v43, %v3088_v18  ;;  %v3092_v43 = vld [vmem:[#allocation2 + $0x193] sm:$0xff] }
 0x43e   : > { %3480 = vmatprep.mubr.bf16.mxu1 %v10711_v2  ;;  %6220 = vmatprep.mubr.bf16.mxu0 %v10711_v2 }
 0x440   : > { %v10099_v12 = vpop.f32.mrb[36].mxu1 }
 0x441   : > { %v10101_v40 = vpop.f32.mrb[37].mxu1 }
 0x442   : > { %v10103_v11 = vpop.f32.mrb[38].mxu1 }
 0x443   : > { %v10105_v24 = vpop.f32.mrb[39].mxu1 }
 0x445   : > { %7210 = vmatmul.mubr.msk.bf16.gmra.mrb[80].mxu1 %vm222_vm0, %v3128_v10  ;;  %7346 = vmatmul.mubr.msk.bf16.gmra.mrb[80].mxu0 %vm222_vm0, %v5868_v15  ;;  %v3091_v10 = vld [vmem:[#allocation2 + $0x18b] sm:$0xff]  ;;  %v5830_v15 = vld [vmem:[#allocation2 + $0x196] sm:$0xff] }
 0x446   : > { %3490 = vmatprep.mubr.bf16.mxu1 %v10711_v2  ;;  %6230 = vmatprep.mubr.bf16.mxu0 %v10711_v2  ;;  %v3131_v30 = vpack.c.bf16 %v3091_v10, %v3090_v50  ;;  %v3132_v10 = vpack.c.bf16 %v3093_v21, %v3092_v43 }
 0x448   : > { %v10111_v0 = vpop.f32.mrb[40].mxu1 }
 0x449   : > { %v10113_v14 = vpop.f32.mrb[41].mxu1 }
 0x44a   : > { %v10115_v9 = vpop.f32.mrb[42].mxu1 }
 0x44b   : > { %v10117_v3 = vpop.f32.mrb[43].mxu1 }
 0x44c   : > { %10715 = vst [vmem:[#allocation6_spill] sm:$0xff] %v10117_v3 }
 0x44d   : > { %7211 = vmatmul.mubr.msk.bf16.gmra.mrb[84].mxu1 %vm222_vm0, %v3129_v25  ;;  %7347 = vmatmul.mubr.msk.bf16.gmra.mrb[84].mxu0 %vm222_vm0, %v5869_v56  ;;  %v5871_v56 = vpack.c.bf16 %v5831_v22, %v5830_v15 }
 0x44e   : > { %3500 = vmatprep.mubr.bf16.mxu1 %v10711_v2  ;;  %6240 = vmatprep.mubr.bf16.mxu0 %v10711_v2 }
 0x450   : > { %v10123_v60 = vpop.f32.mrb[44].mxu1 }
 0x451   : > { %10716 = vst [vmem:[#allocation7_spill] sm:$0xff] %v10123_v60  ;;  %v10125_v19 = vpop.f32.mrb[45].mxu1 }
 0x452   : > { %10717 = vst [vmem:[#allocation8_spill] sm:$0xff] %v10125_v19  ;;  %v10127_v62 = vpop.f32.mrb[46].mxu1 }
 0x453   : > { %10718 = vst [vmem:[#allocation9_spill] sm:$0xff] %v10127_v62  ;;  %v10129_v53 = vpop.f32.mrb[47].mxu1 }
 0x454   : > { %10719 = vst [vmem:[#allocation10_spill] sm:$0xff] %v10129_v53  ;;  %v3098_v53 = vld [vmem:[#allocation2 + $0x1c3] sm:$0xff] }
 0x455   : > { %7212 = vmatmul.mubr.msk.bf16.gmra.mrb[88].mxu1 %vm222_vm0, %v3130_v58  ;;  %7348 = vmatmul.mubr.msk.bf16.gmra.mrb[88].mxu0 %vm222_vm0, %v5870_v6  ;;  %v5833_v58 = vld [vmem:[#allocation2 + $0x1ae] sm:$0xff] }
 0x456   : > { %3510 = vmatprep.mubr.bf16.mxu1 %v10711_v2  ;;  %6250 = vmatprep.mubr.bf16.mxu0 %v10711_v2  ;;  %v5872_v22 = vpack.c.bf16 %v5833_v58, %v5832_v44 }
 0x458   : > { %v10135_v16 = vpop.f32.mrb[48].mxu1 }
 0x459   : > { %10720 = vst [vmem:[#allocation11_spill] sm:$0xff] %v10135_v16  ;;  %v10137_v55 = vpop.f32.mrb[49].mxu1  ;;  %v5837_v16 = vld [vmem:[#allocation2 + $0x1ce] sm:$0xff] }
 0x45a   : > { %10721 = vst [vmem:[#allocation12_spill] sm:$0xff] %v10137_v55  ;;  %v10139_v25 = vpop.f32.mrb[50].mxu1  ;;  %v851_v55 = vlaneseq }
 0x45b   : > { %10722 = vst [vmem:[#allocation13_spill] sm:$0xff] %v10139_v25  ;;  %v10141_v18 = vpop.f32.mrb[51].mxu1  ;;  %v5834_v25 = vld [vmem:[#allocation2 + $0x1b6] sm:$0xff] }
 0x45c   : > { %10723 = vst [vmem:[#allocation14_spill] sm:$0xff] %v10141_v18 }
 0x45d   : > { %7213 = vmatmul.mubr.msk.bf16.gmra.mrb[92].mxu1 %vm222_vm0, %v3131_v30  ;;  %7349 = vmatmul.mubr.msk.bf16.gmra.mrb[92].mxu0 %vm222_vm0, %v5871_v56  ;;  %v3094_v30 = vld [vmem:[#allocation2 + $0x1a3] sm:$0xff]  ;;  %v3095_v56 = vld [vmem:[#allocation2 + $0x1ab] sm:$0xff] }
 0x45e   : > { %3520 = vmatprep.mubr.bf16.mxu1 %v10711_v2  ;;  %6260 = vmatprep.mubr.bf16.mxu0 %v10711_v2  ;;  %v3133_v21 = vpack.c.bf16 %v3095_v56, %v3094_v30 }
 0x460   : > { %v10147_v6 = vpop.f32.mrb[52].mxu1 }
 0x461   : > { %10724 = vst [vmem:[#allocation15_spill] sm:$0xff] %v10147_v6  ;;  %v10149_v50 = vpop.f32.mrb[53].mxu1  ;;  %v5835_v6 = vld [vmem:[#allocation2 + $0x1be] sm:$0xff] }
 0x462   : > { %10725 = vst [vmem:[#allocation16_spill] sm:$0xff] %v10149_v50  ;;  %v10151_v15 = vpop.f32.mrb[54].mxu1  ;;  %v5873_v58 = vpack.c.bf16 %v5835_v6, %v5834_v25  ;;  %v292_v25 = vld [vmem:[%s10709_s2] sm:$0x3] }
 0x463   : > { %10726 = vst [vmem:[#allocation17_spill] sm:$0xff] %v10151_v15  ;;  %v10153_v18 = vpop.f32.mrb[55].mxu1  ;;  %v3097_v15 = vld [vmem:[#allocation2 + $0x1bb] sm:$0xff] }
 0x464   : > { %10727 = vst [vmem:[#allocation18_spill] sm:$0xff] %v10153_v18  ;;  %v3096_v18 = vld [vmem:[#allocation2 + $0x1b3] sm:$0xff] }
 0x465   : > { %7214 = vmatmul.mubr.msk.bf16.gmra.mrb[96].mxu1 %vm222_vm0, %v3132_v10  ;;  %7350 = vmatmul.mubr.msk.bf16.gmra.mrb[96].mxu0 %vm222_vm0, %v5872_v22  ;;  %v852_v22 = vshrl.u32 %v851_v55, 7  ;;  %v3134_v56 = vpack.c.bf16 %v3097_v15, %v3096_v18  ;;  %v5838_v18 = vld [vmem:[#allocation2 + $0x1d6] sm:$0xff]  ;;  %v5839_v15 = vld [vmem:[#allocation2 + $0x1de] sm:$0xff] }
 0x466   : > { %3530 = vmatprep.mubr.bf16.mxu1 %v10711_v2  ;;  %6270 = vmatprep.mubr.bf16.mxu0 %v10711_v2 }
 0x467   : > { %v857_v55 = vsub.s32 1, %v852_v22 }
 0x468   : > { %v10159_v50 = vpop.f32.mrb[56].mxu1 }
 0x469   : > { %10728 = vst [vmem:[#allocation19_spill] sm:$0xff] %v10159_v50  ;;  %v10161_v43 = vpop.f32.mrb[57].mxu1  ;;  %v5836_v50 = vld [vmem:[#allocation2 + $0x1c6] sm:$0xff] }
 0x46a   : > { %10729 = vst [vmem:[#allocation20_spill] sm:$0xff] %v10161_v43  ;;  %v10163_v44 = vpop.f32.mrb[58].mxu1  ;;  %v853_v43 = vsub.s32 0, %v852_v22  ;;  %v3099_v22 = vld [vmem:[#allocation2 + $0x1cb] sm:$0xff] }
 0x46b   : > { %10730 = vst [vmem:[#allocation21_spill] sm:$0xff] %v10163_v44  ;;  %v10165_v10 = vpop.f32.mrb[59].mxu1 }
 0x46c   : > { %10731 = vst [vmem:[#allocation22_spill] sm:$0xff] %v10165_v10  ;;  %v10182_v44 = vrot.slane %v292_v25, %v853_v43 }
 0x46d   : > { %7215 = vmatmul.mubr.msk.bf16.gmra.mrb[100].mxu1 %vm222_vm0, %v3133_v21  ;;  %7351 = vmatmul.mubr.msk.bf16.gmra.mrb[100].mxu0 %vm222_vm0, %v5873_v58  ;;  %v5874_v58 = vpack.c.bf16 %v5837_v16, %v5836_v50 }
 0x46e   : > { %3540 = vmatprep.mubr.bf16.mxu1 %v10711_v2  ;;  %6280 = vmatprep.mubr.bf16.mxu0 %v10711_v2  ;;  %v10184_v2 = vrot.slane %v292_v25, %v857_v55  ;;  %v7430_v16 = vadd.f32 %v9987_v17, %v10182_v44  ;;  %v3135_v25 = vpack.c.bf16 %v3099_v22, %v3098_v53  ;;  %v5841_v22 = vld [vmem:[#allocation2 + $0x1ee] sm:$0xff] }
 0x46f   : > { %v7434_v55 = vadd.f32 %v9991_v33, %v10182_v44  ;;  %v3101_v33 = vld [vmem:[#allocation2 + $0x1db] sm:$0xff] }
 0x470   : > { %v10171_v30 = vpop.f32.mrb[60].mxu1  ;;  %v7432_v50 = vadd.f32 %v9989_v29, %v10184_v2  ;;  %v3100_v29 = vld [vmem:[#allocation2 + $0x1d3] sm:$0xff] }
 0x471   : > { %10732 = vst [vmem:[#allocation23_spill] sm:$0xff] %v10171_v30  ;;  %v10176_v6 = vpop.f32.mrb[61].mxu1  ;;  %v10736_v30 = vmov 0  }
 0x472   : > { %10733 = vst [vmem:[#allocation24_spill] sm:$0xff] %v10176_v6  ;;  %v10178_v21 = vpop.f32.mrb[62].mxu1 }
 0x473   : > { %10734 = vst [vmem:[#allocation25_spill] sm:$0xff] %v10178_v21  ;;  %v10180_v10 = vpop.f32.mrb[63].mxu1  ;;  %v7436_v21 = vadd.f32 %v9993_v54, %v10184_v2  ;;  %v5840_v54 = vld [vmem:[#allocation2 + $0x1e6] sm:$0xff] }
 0x474   : > { %10735 = vst [vmem:[#allocation26_spill] sm:$0xff] %v10180_v10  ;;  %v5875_v10 = vpack.c.bf16 %v5839_v15, %v5838_v18  ;;  %v3136_v18 = vpack.c.bf16 %v3101_v33, %v3100_v29  ;;  %v5843_v29 = vld [vmem:[#allocation2 + $0x1fe] sm:$0xff]  ;;  %v7446_v33 = vadd.f32 %v10013_v51, %v10182_v44 }
 0x475   : > { %7216 = vmatmul.mubr.msk.bf16.gmra.mrb[104].mxu1 %vm222_vm0, %v3134_v56  ;;  %7352 = vmatmul.mubr.msk.bf16.gmra.mrb[104].mxu0 %vm222_vm0, %v5874_v58 }
 0x476   : > { %3550 = vmatprep.mubr.bf16.mxu1 %v10736_v30  ;;  %6290 = vmatprep.mubr.bf16.mxu0 %v10736_v30 }
 0x478   : > { %v6022_v43 = vpop.f32.mrb[0].mxu0 }
 0x479   : > { %v10196_v56 = vadd.f32 %v7430_v16, %v6022_v43  ;;  %v6024_v58 = vpop.f32.mrb[1].mxu0  ;;  %v7444_v16 = vadd.f32 %v10006_v41, %v10184_v2  ;;  %v5842_v41 = vld [vmem:[#allocation2 + $0x1f6] sm:$0xff] }
 0x47a   : > { %v7433_v6 = vadd.f32 %v7432_v50, %v6024_v58  ;;  %v6026_v62 = vpop.f32.mrb[2].mxu0  ;;  %v3103_v58 = vld [vmem:[#allocation2 + $0x1eb] sm:$0xff] }
 0x47b   : > { %v10200_v19 = vadd.f32 %v7434_v55, %v6026_v62  ;;  %v6028_v17 = vpop.f32.mrb[3].mxu0  ;;  %v7438_v62 = vadd.f32 %v10000_v34, %v10182_v44 }
 0x47c   : > { %v7358_v60 = vmul.f32 -1.442695, %v7433_v6  ;;  %v7437_v3 = vadd.f32 %v7436_v21, %v6028_v17  ;;  %v7440_v6 = vadd.f32 %v10002_v35, %v10184_v2 }
 0x47d   : > { %7217 = vmatmul.mubr.msk.bf16.gmra.mrb[108].mxu1 %vm222_vm0, %v3135_v25  ;;  %7353 = vmatmul.mubr.msk.bf16.gmra.mrb[108].mxu0 %vm222_vm0, %v5875_v10  ;;  %v7442_v10 = vadd.f32 %v10004_v39, %v10182_v44  ;;  %v3102_v39 = vld [vmem:[#allocation2 + $0x1e3] sm:$0xff] }
 0x47e   : > { %3560 = vmatprep.mubr.bf16.mxu1 %v10736_v30  ;;  %8651 = vpow2.f32 %v7358_v60  ;;  %v7359_v53 = vmul.f32 -1.442695, %v7437_v3  ;;  %6300 = vmatprep.mubr.bf16.mxu0 %v10736_v30  ;;  %v5876_v3 = vpack.c.bf16 %v5841_v22, %v5840_v54  ;;  %v7448_v54 = vadd.f32 %v10015_v45, %v10184_v2 }
 0x480   : > { %8653 = vpow2.f32 %v7359_v53  ;;  %v6032_v21 = vpop.f32.mrb[4].mxu0 }
 0x481   : > { %v10212_v15 = vadd.f32 %v7438_v62, %v6032_v21  ;;  %v6034_v60 = vpop.f32.mrb[5].mxu0  ;;  %v3137_v62 = vpack.c.bf16 %v3103_v58, %v3102_v39  ;;  %v3105_v39 = vld [vmem:[#allocation2 + $0x1fb] sm:$0xff]  ;;  %v5844_v58 = vld [vmem:[#allocation2 + $0x206] sm:$0xff] }
 0x482   : > { %v7441_v50 = vadd.f32 %v7440_v6, %v6034_v60  ;;  %v6036_v43 = vpop.f32.mrb[6].mxu0  ;;  %v7450_v6 = vadd.f32 %v10017_v46, %v10182_v44  ;;  %v5877_v60 = vpack.c.bf16 %v5843_v29, %v5842_v41  ;;  %v3104_v46 = vld [vmem:[#allocation2 + $0x1f3] sm:$0xff]  ;;  %v7454_v41 = vadd.f32 %v10026_v8, %v10182_v44 }
 0x483   : > { %v10216_v25 = vadd.f32 %v7442_v10, %v6036_v43  ;;  %v6038_v34 = vpop.f32.mrb[7].mxu0  ;;  %v7460_v8 = vadd.f32 %v10032_v32, %v10184_v2  ;;  %v3106_v32 = vld [vmem:[#allocation2 + $0x203] sm:$0xff] }
 0x484   : > { %v7360_v55 = vmul.f32 -1.442695, %v7441_v50  ;;  %v7445_v35 = vadd.f32 %v7444_v16, %v6038_v34  ;;  %v7452_v16 = vadd.f32 %v10019_v49, %v10184_v2 }
 0x485   : > { %7218 = vmatmul.mubr.msk.bf16.gmra.mrb[112].mxu1 %vm222_vm0, %v3136_v18  ;;  %7354 = vmatmul.mubr.msk.bf16.gmra.mrb[112].mxu0 %vm222_vm0, %v5876_v3 }
 0x486   : > { %3570 = vmatprep.mubr.bf16.mxu1 %v10736_v30  ;;  %8655 = vpow2.f32 %v7360_v55  ;;  %v7361_v17 = vmul.f32 -1.442695, %v7445_v35  ;;  %6310 = vmatprep.mubr.bf16.mxu0 %v10736_v30 }
 0x488   : > { %v8652_v53 = vpop.eup %8651  ;;  %8657 = vpow2.f32 %v7361_v17  ;;  %v6042_v22 = vpop.f32.mrb[8].mxu0  ;;  %v5845_v17 = vld [vmem:[#allocation2 + $0x20e] sm:$0xff] }
 0x489   : > { %v6661_v21 = vadd.f32 1.0, %v8652_v53  ;;  %v10228_v18 = vadd.f32 %v7446_v33, %v6042_v22  ;;  %v6044_v10 = vpop.f32.mrb[9].mxu0  ;;  %v7456_v33 = vadd.f32 %v10028_v23, %v10184_v2  ;;  %v7458_v22 = vadd.f32 %v10030_v57, %v10182_v44 }
 0x48a   : > { %v8654_v3 = vpop.eup %8653  ;;  %v7449_v51 = vadd.f32 %v7448_v54, %v6044_v10  ;;  %v6046_v50 = vpop.f32.mrb[10].mxu0  ;;  %v3138_v54 = vpack.c.bf16 %v3105_v39, %v3104_v46  ;;  %v5878_v10 = vpack.c.bf16 %v5845_v17, %v5844_v58  ;;  %v5846_v39 = vld [vmem:[#allocation2 + $0x216] sm:$0xff]  ;;  %v7462_v17 = vadd.f32 %v10039_v1, %v10182_v44 }
 0x48b   : > { %8659 = vrcp.f32 %v6661_v21  ;;  %v6662_v43 = vadd.f32 1.0, %v8654_v3  ;;  %v10232_v45 = vadd.f32 %v7450_v6, %v6046_v50  ;;  %v6048_v34 = vpop.f32.mrb[11].mxu0 }
 0x48c   : > { %v7362_v55 = vmul.f32 -1.442695, %v7449_v51  ;;  %v7453_v35 = vadd.f32 %v7452_v16, %v6048_v34 }
 0x48d   : > { %7219 = vmatmul.mubr.msk.bf16.gmra.mrb[116].mxu1 %vm222_vm0, %v3137_v62  ;;  %8661 = vrcp.f32 %v6662_v43  ;;  %7355 = vmatmul.mubr.msk.bf16.gmra.mrb[116].mxu0 %vm222_vm0, %v5877_v60 }
 0x48e   : > { %3580 = vmatprep.mubr.bf16.mxu1 %v10736_v30  ;;  %8663 = vpow2.f32 %v7362_v55  ;;  %v7363_v49 = vmul.f32 -1.442695, %v7453_v35  ;;  %6320 = vmatprep.mubr.bf16.mxu0 %v10736_v30  ;;  %v3107_v55 = vld [vmem:[#allocation2 + $0x20b] sm:$0xff] }
 0x490   : > { %v8656_v29 = vpop.eup %8655  ;;  %8665 = vpow2.f32 %v7363_v49  ;;  %v6052_v53 = vpop.f32.mrb[12].mxu0  ;;  %v5847_v49 = vld [vmem:[#allocation2 + $0x21e] sm:$0xff] }
 0x491   : > { %v6663_v62 = vadd.f32 1.0, %v8656_v29  ;;  %v10245_v6 = vadd.f32 %v7454_v41, %v6052_v53  ;;  %v6054_v21 = vpop.f32.mrb[13].mxu0  ;;  %v7464_v29 = vadd.f32 %v10041_v5, %v10184_v2  ;;  %v7466_v53 = vadd.f32 %v10043_v59, %v10182_v44 }
 0x492   : > { %v8658_v60 = vpop.eup %8657  ;;  %v7457_v3 = vadd.f32 %v7456_v33, %v6054_v21  ;;  %v6056_v16 = vpop.f32.mrb[14].mxu0  ;;  %v7468_v5 = vadd.f32 %v10045_v4, %v10184_v2 }
 0x493   : > { %8667 = vrcp.f32 %v6663_v62  ;;  %v6664_v23 = vadd.f32 1.0, %v8658_v60  ;;  %v10251_v51 = vadd.f32 %v7458_v22, %v6056_v16  ;;  %v6058_v50 = vpop.f32.mrb[15].mxu0  ;;  %v5879_v62 = vpack.c.bf16 %v5847_v49, %v5846_v39 }
 0x494   : > { %v7364_v43 = vmul.f32 -1.442695, %v7457_v3  ;;  %v7461_v57 = vadd.f32 %v7460_v8, %v6058_v50 }
 0x495   : > { %7220 = vmatmul.mubr.msk.bf16.gmra.mrb[120].mxu1 %vm222_vm0, %v3138_v54  ;;  %v8660_v34 = vpop.eup %8659  ;;  %8669 = vrcp.f32 %v6664_v23  ;;  %7356 = vmatmul.mubr.msk.bf16.gmra.mrb[120].mxu0 %vm222_vm0, %v5878_v10 }
 0x496   : > { %3590 = vmatprep.mubr.bf16.mxu1 %v10736_v30  ;;  %v6853_v35 = vmul.f32 %v8660_v34, %v10196_v56  ;;  %8671 = vpow2.f32 %v7364_v43  ;;  %v7365_v46 = vmul.f32 -1.442695, %v7461_v57  ;;  %6330 = vmatprep.mubr.bf16.mxu0 %v10736_v30  ;;  %v3139_v30 = vpack.c.bf16 %v3107_v55, %v3106_v32 }
 0x497   : > { %v8662_v58 = vpop.eup %8661  ;;  %v7470_v57 = vadd.f32 %v10051_v63, %v10182_v44  ;;  %v7472_v32 = vadd.f32 %v10053_v7, %v10184_v2  ;;  %v7476_v63 = vadd.f32 %v10057_v47, %v10184_v2  ;;  %v7478_v47 = vadd.f32 %v10063_v31, %v10182_v44 }
 0x498   : > { %v8664_v41 = vpop.eup %8663  ;;  %6917 = vst [vmem:[%s10262_s10] sm:$0xff] %v6853_v35  ;;  %v6854_v56 = vmul.f32 %v8662_v58, %v10200_v19  ;;  %8673 = vpow2.f32 %v7365_v46  ;;  %v6062_v33 = vpop.f32.mrb[16].mxu0  ;;  %v7474_v46 = vadd.f32 %v10055_v13, %v10182_v44  ;;  %v7484_v31 = vadd.f32 %v10069_v36, %v10184_v2 }
 0x499   : > { %v6665_v54 = vadd.f32 1.0, %v8664_v41  ;;  %v10268_v22 = vadd.f32 %v7462_v17, %v6062_v33  ;;  %v6064_v1 = vpop.f32.mrb[17].mxu0  ;;  %v7486_v36 = vadd.f32 %v10075_v27, %v10182_v44  ;;  %v7492_v27 = vadd.f32 %v10081_v28, %v10184_v2 }
 0x49a   : > { %v8666_v21 = vpop.eup %8665  ;;  %6918 = vst [vmem:[%s10262_s10 + $0x8] sm:$0xff] %v6854_v56  ;;  %v7465_v10 = vadd.f32 %v7464_v29, %v6064_v1  ;;  %v6066_v60 = vpop.f32.mrb[18].mxu0  ;;  %v7494_v28 = vadd.f32 %v10087_v48, %v10182_v44  ;;  %v7500_v48 = vadd.f32 %v10093_v37, %v10184_v2  ;;  %v7502_v37 = vadd.f32 %v10099_v12, %v10182_v44 }
 0x49b   : > { %8675 = vrcp.f32 %v6665_v54  ;;  %v6666_v19 = vadd.f32 1.0, %v8666_v21  ;;  %v10273_v8 = vadd.f32 %v7466_v53, %v6066_v60  ;;  %v6068_v3 = vpop.f32.mrb[19].mxu0  ;;  %v7508_v12 = vadd.f32 %v10105_v24, %v10184_v2 }
 0x49c   : > { %v7366_v16 = vmul.f32 -1.442695, %v7465_v10  ;;  %v7469_v59 = vadd.f32 %v7468_v5, %v6068_v3  ;;  %v7482_v10 = vadd.f32 %v10067_v61, %v10182_v44  ;;  %v7510_v24 = vadd.f32 %v10111_v0, %v10182_v44 }
 0x49d   : > { %7221 = vmatmul.mubr.msk.bf16.gmra.mrb[124].mxu1 %vm222_vm0, %v3139_v30  ;;  %v8668_v23 = vpop.eup %8667  ;;  %8677 = vrcp.f32 %v6666_v19  ;;  %7357 = vmatmul.mubr.msk.bf16.gmra.mrb[124].mxu0 %vm222_vm0, %v5879_v62  ;;  %v7480_v62 = vadd.f32 %v10065_v20, %v10184_v2 }
 0x49e   : > { %v6855_v50 = vmul.f32 %v8668_v23, %v10212_v15  ;;  %8679 = vpow2.f32 %v7366_v16  ;;  %v7367_v4 = vmul.f32 -1.442695, %v7469_v59 }
 0x49f   : > { %v8670_v43 = vpop.eup %8669 }
 0x4a0   : > { %v8672_v34 = vpop.eup %8671  ;;  %6919 = vst [vmem:[%s10262_s10 + $0x10] sm:$0xff] %v6855_v50  ;;  %v6856_v55 = vmul.f32 %v8670_v43, %v10216_v25  ;;  %8681 = vpow2.f32 %v7367_v4  ;;  %v6072_v35 = vpop.f32.mrb[20].mxu0 }
 0x4a1   : > { %v6667_v15 = vadd.f32 1.0, %v8672_v34  ;;  %v10286_v39 = vadd.f32 %v7470_v57, %v6072_v35  ;;  %v6074_v49 = vpop.f32.mrb[21].mxu0 }
 0x4a2   : > { %v8674_v58 = vpop.eup %8673  ;;  %6920 = vst [vmem:[%s10262_s10 + $0x18] sm:$0xff] %v6856_v55  ;;  %v7473_v17 = vadd.f32 %v7472_v32, %v6074_v49  ;;  %v6076_v41 = vpop.f32.mrb[22].mxu0  ;;  %v7488_v55 = vadd.f32 %v10077_v42, %v10184_v2 }
 0x4a3   : > { %8683 = vrcp.f32 %v6667_v15  ;;  %v6668_v7 = vadd.f32 1.0, %v8674_v58  ;;  %v10291_v25 = vadd.f32 %v7474_v46, %v6076_v41  ;;  %v6078_v29 = vpop.f32.mrb[23].mxu0  ;;  %v7490_v15 = vadd.f32 %v10079_v26, %v10182_v44 }
 0x4a4   : > { %v7368_v56 = vmul.f32 -1.442695, %v7473_v17  ;;  %v7477_v33 = vadd.f32 %v7476_v63, %v6078_v29 }
 0x4a5   : > { %v8676_v13 = vpop.eup %8675  ;;  %8685 = vrcp.f32 %v6668_v7 }
 0x4a6   : > { %v6857_v30 = vmul.f32 %v8676_v13, %v10228_v18  ;;  %8687 = vpow2.f32 %v7368_v56  ;;  %v7369_v53 = vmul.f32 -1.442695, %v7477_v33 }
 0x4a7   : > { %v8678_v54 = vpop.eup %8677 }
 0x4a8   : > { %v8680_v1 = vpop.eup %8679  ;;  %6921 = vst [vmem:[%s10262_s10 + $0x20] sm:$0xff] %v6857_v30  ;;  %v6858_v21 = vmul.f32 %v8678_v54, %v10232_v45  ;;  %8689 = vpow2.f32 %v7369_v53  ;;  %v6082_v5 = vpop.f32.mrb[24].mxu0  ;;  %v7496_v54 = vadd.f32 %v10089_v52, %v10184_v2 }
 0x4a9   : > { %v6669_v18 = vadd.f32 1.0, %v8680_v1  ;;  %v10302_v60 = vadd.f32 %v7478_v47, %v6082_v5  ;;  %v6084_v19 = vpop.f32.mrb[25].mxu0 }
 0x4aa   : > { %v8682_v3 = vpop.eup %8681  ;;  %6922 = vst [vmem:[%s10262_s10 + $0x28] sm:$0xff] %v6858_v21  ;;  %v7481_v16 = vadd.f32 %v7480_v62, %v6084_v19  ;;  %v6086_v59 = vpop.f32.mrb[26].mxu0  ;;  %v7498_v62 = vadd.f32 %v10091_v38, %v10182_v44 }
 0x4ab   : > { %8691 = vrcp.f32 %v6669_v18  ;;  %v6670_v20 = vadd.f32 1.0, %v8682_v3  ;;  %v10307_v45 = vadd.f32 %v7482_v10, %v6086_v59  ;;  %v6088_v23 = vpop.f32.mrb[27].mxu0 }
 0x4ac   : > { %v7370_v50 = vmul.f32 -1.442695, %v7481_v16  ;;  %v7485_v4 = vadd.f32 %v7484_v31, %v6088_v23 }
 0x4ad   : > { %v8684_v61 = vpop.eup %8683  ;;  %8693 = vrcp.f32 %v6670_v20 }
 0x4ae   : > { %v6859_v43 = vmul.f32 %v8684_v61, %v10245_v6  ;;  %8695 = vpow2.f32 %v7370_v50  ;;  %v7371_v57 = vmul.f32 -1.442695, %v7485_v4  ;;  %v7504_v4 = vadd.f32 %v10101_v40, %v10184_v2 }
 0x4af   : > { %v8686_v34 = vpop.eup %8685 }
 0x4b0   : > { %v8688_v32 = vpop.eup %8687  ;;  %6923 = vst [vmem:[%s10262_s10 + $0x30] sm:$0xff] %v6859_v43  ;;  %v6860_v35 = vmul.f32 %v8686_v34, %v10251_v51  ;;  %8697 = vpow2.f32 %v7371_v57  ;;  %v6092_v46 = vpop.f32.mrb[28].mxu0  ;;  %v7506_v57 = vadd.f32 %v10103_v11, %v10182_v44 }
 0x4b1   : > { %v6671_v6 = vadd.f32 1.0, %v8688_v32  ;;  %v10318_v49 = vadd.f32 %v7486_v36, %v6092_v46  ;;  %v6094_v58 = vpop.f32.mrb[29].mxu0 }
 0x4b2   : > { %v8690_v63 = vpop.eup %8689  ;;  %6924 = vst [vmem:[%s10262_s10 + $0x38] sm:$0xff] %v6860_v35  ;;  %v7489_v17 = vadd.f32 %v7488_v55, %v6094_v58  ;;  %v6096_v41 = vpop.f32.mrb[30].mxu0 }
 0x4b3   : > { %8699 = vrcp.f32 %v6671_v6  ;;  %v6672_v42 = vadd.f32 1.0, %v8690_v63  ;;  %v10323_v51 = vadd.f32 %v7490_v15, %v6096_v41  ;;  %v6098_v7 = vpop.f32.mrb[31].mxu0  ;;  %v7512_v41 = vadd.f32 %v10113_v14, %v10184_v2 }
 0x4b4   : > { %v7372_v29 = vmul.f32 -1.442695, %v7489_v17  ;;  %v7493_v56 = vadd.f32 %v7492_v27, %v6098_v7 }
 0x4b5   : > { %v8692_v26 = vpop.eup %8691  ;;  %8701 = vrcp.f32 %v6672_v42 }
 0x4b6   : > { %v6861_v33 = vmul.f32 %v8692_v26, %v10268_v22  ;;  %8703 = vpow2.f32 %v7372_v29  ;;  %v7373_v13 = vmul.f32 -1.442695, %v7493_v56  ;;  %v7514_v29 = vadd.f32 %v10115_v9, %v10182_v44 }
 0x4b7   : > { %v8694_v30 = vpop.eup %8693 }
 0x4b8   : > { %v8696_v53 = vpop.eup %8695  ;;  %6925 = vst [vmem:[%s10262_s10 + $0x40] sm:$0xff] %v6861_v33  ;;  %v6862_v47 = vmul.f32 %v8694_v30, %v10273_v8  ;;  %8705 = vpow2.f32 %v7373_v13  ;;  %v6102_v1 = vpop.f32.mrb[32].mxu0  ;;  %v10737_v13 = vld [vmem:[#allocation6_spill] sm:$0xff] }
 0x4b9   : > { %v6673_v22 = vadd.f32 1.0, %v8696_v53  ;;  %v10334_v21 = vadd.f32 %v7494_v28, %v6102_v1  ;;  %v6104_v5 = vpop.f32.mrb[33].mxu0  ;;  %v7516_v0 = vadd.f32 %v10737_v13, %v10184_v2 }
 0x4ba   : > { %v8698_v10 = vpop.eup %8697  ;;  %6926 = vst [vmem:[%s10262_s10 + $0x48] sm:$0xff] %v6862_v47  ;;  %v7497_v18 = vadd.f32 %v7496_v54, %v6104_v5  ;;  %v6106_v19 = vpop.f32.mrb[34].mxu0  ;;  %v10738_v5 = vld [vmem:[#allocation7_spill] sm:$0xff] }
 0x4bb   : > { %8707 = vrcp.f32 %v6673_v22  ;;  %v6674_v52 = vadd.f32 1.0, %v8698_v10  ;;  %v10339_v8 = vadd.f32 %v7498_v62, %v6106_v19  ;;  %v6108_v3 = vpop.f32.mrb[35].mxu0  ;;  %v7518_v10 = vadd.f32 %v10738_v5, %v10182_v44 }
 0x4bc   : > { %v7374_v31 = vmul.f32 -1.442695, %v7497_v18  ;;  %v7501_v16 = vadd.f32 %v7500_v48, %v6108_v3  ;;  %v10739_v18 = vld [vmem:[#allocation8_spill] sm:$0xff] }
 0x4bd   : > { %v8700_v38 = vpop.eup %8699  ;;  %8709 = vrcp.f32 %v6674_v52  ;;  %v7520_v19 = vadd.f32 %v10739_v18, %v10184_v2 }
 0x4be   : > { %v6863_v59 = vmul.f32 %v8700_v38, %v10286_v39  ;;  %8711 = vpow2.f32 %v7374_v31  ;;  %v7375_v20 = vmul.f32 -1.442695, %v7501_v16  ;;  %v10740_v31 = vld [vmem:[#allocation9_spill] sm:$0xff] }
 0x4bf   : > { %v8702_v23 = vpop.eup %8701  ;;  %v7522_v16 = vadd.f32 %v10740_v31, %v10182_v44 }
 0x4c0   : > { %v8704_v50 = vpop.eup %8703  ;;  %6927 = vst [vmem:[%s10262_s10 + $0x50] sm:$0xff] %v6863_v59  ;;  %v6864_v61 = vmul.f32 %v8702_v23, %v10291_v25  ;;  %8713 = vpow2.f32 %v7375_v20  ;;  %v6112_v43 = vpop.f32.mrb[36].mxu0  ;;  %v10741_v23 = vld [vmem:[#allocation10_spill] sm:$0xff] }
 0x4c1   : > { %v6675_v39 = vadd.f32 1.0, %v8704_v50  ;;  %v10350_v34 = vadd.f32 %v7502_v37, %v6112_v43  ;;  %v6114_v36 = vpop.f32.mrb[37].mxu0  ;;  %v7524_v37 = vadd.f32 %v10741_v23, %v10184_v2 }
 0x4c2   : > { %v8706_v32 = vpop.eup %8705  ;;  %6928 = vst [vmem:[%s10262_s10 + $0x58] sm:$0xff] %v6864_v61  ;;  %v7505_v55 = vadd.f32 %v7504_v4, %v6114_v36  ;;  %v6116_v35 = vpop.f32.mrb[38].mxu0 }
 0x4c3   : > { %8715 = vrcp.f32 %v6675_v39  ;;  %v6676_v40 = vadd.f32 1.0, %v8706_v32  ;;  %v10355_v25 = vadd.f32 %v7506_v57, %v6116_v35  ;;  %v6118_v46 = vpop.f32.mrb[39].mxu0  ;;  %v10742_v35 = vld [vmem:[#allocation11_spill] sm:$0xff] }
 0x4c4   : > { %v7376_v15 = vmul.f32 -1.442695, %v7505_v55  ;;  %v7509_v6 = vadd.f32 %v7508_v12, %v6118_v46 }
 0x4c5   : > { %v8708_v11 = vpop.eup %8707  ;;  %8717 = vrcp.f32 %v6676_v40  ;;  %v7526_v40 = vadd.f32 %v10742_v35, %v10182_v44 }
 0x4c6   : > { %v6865_v58 = vmul.f32 %v8708_v11, %v10302_v60  ;;  %8719 = vpow2.f32 %v7376_v15  ;;  %v7377_v63 = vmul.f32 -1.442695, %v7509_v6  ;;  %v10743_v15 = vld [vmem:[#allocation12_spill] sm:$0xff] }
 0x4c7   : > { %v8710_v27 = vpop.eup %8709  ;;  %v7528_v6 = vadd.f32 %v10743_v15, %v10184_v2 }
 0x4c8   : > { %v8712_v17 = vpop.eup %8711  ;;  %6929 = vst [vmem:[%s10262_s10 + $0x60] sm:$0xff] %v6865_v58  ;;  %v6866_v42 = vmul.f32 %v8710_v27, %v10307_v45  ;;  %8721 = vpow2.f32 %v7377_v63  ;;  %v6122_v7 = vpop.f32.mrb[40].mxu0  ;;  %v10744_v63 = vld [vmem:[#allocation13_spill] sm:$0xff] }
 0x4c9   : > { %v6677_v60 = vadd.f32 1.0, %v8712_v17  ;;  %v10366_v56 = vadd.f32 %v7510_v24, %v6122_v7  ;;  %v6124_v26 = vpop.f32.mrb[41].mxu0  ;;  %v7530_v27 = vadd.f32 %v10744_v63, %v10182_v44 }
 0x4ca   : > { %v8714_v33 = vpop.eup %8713  ;;  %6930 = vst [vmem:[%s10262_s10 + $0x68] sm:$0xff] %v6866_v42  ;;  %v7513_v30 = vadd.f32 %v7512_v41, %v6124_v26  ;;  %v6126_v28 = vpop.f32.mrb[42].mxu0  ;;  %v10745_v42 = vld [vmem:[#allocation14_spill] sm:$0xff] }
 0x4cb   : > { %8723 = vrcp.f32 %v6677_v60  ;;  %v6678_v14 = vadd.f32 1.0, %v8714_v33  ;;  %v10371_v45 = vadd.f32 %v7514_v29, %v6126_v28  ;;  %v6128_v53 = vpop.f32.mrb[43].mxu0  ;;  %v7532_v7 = vadd.f32 %v10745_v42, %v10184_v2 }
 0x4cc   : > { %v7378_v54 = vmul.f32 -1.442695, %v7513_v30  ;;  %v7517_v47 = vadd.f32 %v7516_v0, %v6128_v53 }
 0x4cd   : > { %v8716_v9 = vpop.eup %8715  ;;  %8725 = vrcp.f32 %v6678_v14 }
 0x4ce   : > { %v6867_v1 = vmul.f32 %v8716_v9, %v10318_v49  ;;  %8727 = vpow2.f32 %v7378_v54  ;;  %v7379_v62 = vmul.f32 -1.442695, %v7517_v47  ;;  %v10746_v54 = vld [vmem:[#allocation15_spill] sm:$0xff] }
 0x4cf   : > { %v8718_v22 = vpop.eup %8717  ;;  %v7534_v47 = vadd.f32 %v10746_v54, %v10182_v44 }
 0x4d0   : > { %v8720_v48 = vpop.eup %8719  ;;  %6931 = vst [vmem:[%s10262_s10 + $0x70] sm:$0xff] %v6867_v1  ;;  %v6868_v52 = vmul.f32 %v8718_v22, %v10323_v51  ;;  %8729 = vpow2.f32 %v7379_v62  ;;  %v6132_v3 = vpop.f32.mrb[44].mxu0  ;;  %v10747_v1 = vld [vmem:[#allocation16_spill] sm:$0xff] }
 0x4d1   : > { %v6679_v49 = vadd.f32 1.0, %v8720_v48  ;;  %v10382_v38 = vadd.f32 %v7518_v10, %v6132_v3  ;;  %v6134_v59 = vpop.f32.mrb[45].mxu0  ;;  %v7536_v62 = vadd.f32 %v10747_v1, %v10184_v2  ;;  %v10748_v10 = vld [vmem:[#allocation17_spill] sm:$0xff]  ;;  %v10749_v3 = vld [vmem:[#allocation18_spill] sm:$0xff] }
 0x4d2   : > { %v8722_v20 = vpop.eup %8721  ;;  %6932 = vst [vmem:[%s10262_s10 + $0x78] sm:$0xff] %v6868_v52  ;;  %v7521_v50 = vadd.f32 %v7520_v19, %v6134_v59  ;;  %v6136_v4 = vpop.f32.mrb[46].mxu0  ;;  %v7538_v48 = vadd.f32 %v10748_v10, %v10182_v44  ;;  %v7540_v31 = vadd.f32 %v10749_v3, %v10184_v2 }
 0x4d3   : > { %8731 = vrcp.f32 %v6679_v49  ;;  %v6680_v61 = vadd.f32 1.0, %v8722_v20  ;;  %v10387_v51 = vadd.f32 %v7522_v16, %v6136_v4  ;;  %v6138_v43 = vpop.f32.mrb[47].mxu0 }
 0x4d4   : > { %v7380_v57 = vmul.f32 -1.442695, %v7521_v50  ;;  %v7525_v39 = vadd.f32 %v7524_v37, %v6138_v43 }
 0x4d5   : > { %v8724_v36 = vpop.eup %8723  ;;  %8733 = vrcp.f32 %v6680_v61 }
 0x4d6   : > { %v6869_v32 = vmul.f32 %v8724_v36, %v10334_v21  ;;  %8735 = vpow2.f32 %v7380_v57  ;;  %v7381_v12 = vmul.f32 -1.442695, %v7525_v39  ;;  %v10750_v57 = vld [vmem:[#allocation19_spill] sm:$0xff] }
 0x4d7   : > { %v8726_v55 = vpop.eup %8725  ;;  %v7542_v39 = vadd.f32 %v10750_v57, %v10182_v44 }
 0x4d8   : > { %v8728_v46 = vpop.eup %8727  ;;  %6933 = vst [vmem:[%s10262_s10 + $0x80] sm:$0xff] %v6869_v32  ;;  %v6870_v11 = vmul.f32 %v8726_v55, %v10339_v8  ;;  %8737 = vpow2.f32 %v7381_v12  ;;  %v6142_v58 = vpop.f32.mrb[48].mxu0  ;;  %v10751_v32 = vld [vmem:[#allocation20_spill] sm:$0xff] }
 0x4d9   : > { %v6681_v21 = vadd.f32 1.0, %v8728_v46  ;;  %v10398_v24 = vadd.f32 %v7526_v40, %v6142_v58  ;;  %v6144_v17 = vpop.f32.mrb[49].mxu0  ;;  %v7544_v12 = vadd.f32 %v10751_v32, %v10184_v2  ;;  %v10752_v40 = vld [vmem:[#allocation21_spill] sm:$0xff]  ;;  %v10753_v58 = vld [vmem:[#allocation22_spill] sm:$0xff] }
 0x4da   : > { %v8730_v41 = vpop.eup %8729  ;;  %6934 = vst [vmem:[%s10262_s10 + $0x88] sm:$0xff] %v6870_v11  ;;  %v7529_v29 = vadd.f32 %v7528_v6, %v6144_v17  ;;  %v6146_v60 = vpop.f32.mrb[50].mxu0  ;;  %v7546_v46 = vadd.f32 %v10752_v40, %v10182_v44  ;;  %v7548_v63 = vadd.f32 %v10753_v58, %v10184_v2 }
 0x4db   : > { %8739 = vrcp.f32 %v6681_v21  ;;  %v6682_v26 = vadd.f32 1.0, %v8730_v41  ;;  %v10403_v8 = vadd.f32 %v7530_v27, %v6146_v60  ;;  %v6148_v33 = vpop.f32.mrb[51].mxu0 }
 0x4dc   : > { %v7382_v13 = vmul.f32 -1.442695, %v7529_v29  ;;  %v7533_v0 = vadd.f32 %v7532_v7, %v6148_v33 }
 0x4dd   : > { %v8732_v30 = vpop.eup %8731  ;;  %8741 = vrcp.f32 %v6682_v26 }
 0x4de   : > { %v6871_v28 = vmul.f32 %v8732_v30, %v10350_v34  ;;  %8743 = vpow2.f32 %v7382_v13  ;;  %v7383_v14 = vmul.f32 -1.442695, %v7533_v0  ;;  %v10754_v13 = vld [vmem:[#allocation23_spill] sm:$0xff] }
 0x4df   : > { %v8734_v53 = vpop.eup %8733  ;;  %v7550_v0 = vadd.f32 %v10754_v13, %v10182_v44 }
 0x4e0   : > { %v8736_v9 = vpop.eup %8735  ;;  %6935 = vst [vmem:[%s10262_s10 + $0x90] sm:$0xff] %v6871_v28  ;;  %v6872_v22 = vmul.f32 %v8734_v53, %v10355_v25  ;;  %8745 = vpow2.f32 %v7383_v14  ;;  %v6152_v5 = vpop.f32.mrb[52].mxu0  ;;  %v10755_v28 = vld [vmem:[#allocation24_spill] sm:$0xff] }
 0x4e1   : > { %v6683_v34 = vadd.f32 1.0, %v8736_v9  ;;  %v10414_v18 = vadd.f32 %v7534_v47, %v6152_v5  ;;  %v6154_v19 = vpop.f32.mrb[53].mxu0  ;;  %v7552_v14 = vadd.f32 %v10755_v28, %v10184_v2  ;;  %v10756_v47 = vld [vmem:[#allocation25_spill] sm:$0xff]  ;;  %v10757_v5 = vld [vmem:[#allocation26_spill] sm:$0xff] }
 0x4e2   : > { %v8738_v52 = vpop.eup %8737  ;;  %6936 = vst [vmem:[%s10262_s10 + $0x98] sm:$0xff] %v6872_v22  ;;  %v7537_v16 = vadd.f32 %v7536_v62, %v6154_v19  ;;  %v6156_v49 = vpop.f32.mrb[54].mxu0  ;;  %v7554_v9 = vadd.f32 %v10756_v47, %v10182_v44  ;;  %v7556_v10 = vadd.f32 %v10757_v5, %v10184_v2 }
 0x4e3   : > { %8747 = vrcp.f32 %v6683_v34  ;;  %v6684_v59 = vadd.f32 1.0, %v8738_v52  ;;  %v10419_v25 = vadd.f32 %v7538_v48, %v6156_v49  ;;  %v6158_v20 = vpop.f32.mrb[55].mxu0 }
 0x4e4   : > { %v7384_v23 = vmul.f32 -1.442695, %v7537_v16  ;;  %v7541_v37 = vadd.f32 %v7540_v31, %v6158_v20 }
 0x4e5   : > { %v8740_v50 = vpop.eup %8739  ;;  %8749 = vrcp.f32 %v6684_v59 }
 0x4e6   : > { %v6873_v4 = vmul.f32 %v8740_v50, %v10366_v56  ;;  %8751 = vpow2.f32 %v7384_v23  ;;  %v7385_v61 = vmul.f32 -1.442695, %v7541_v37 }
 0x4e7   : > { %v8742_v43 = vpop.eup %8741 }
 0x4e8   : > { %v8744_v36 = vpop.eup %8743  ;;  %6937 = vst [vmem:[%s10262_s10 + $0xa0] sm:$0xff] %v6873_v4  ;;  %v6874_v55 = vmul.f32 %v8742_v43, %v10371_v45  ;;  %8753 = vpow2.f32 %v7385_v61  ;;  %v6162_v35 = vpop.f32.mrb[56].mxu0 }
 0x4e9   : > { %v6685_v56 = vadd.f32 1.0, %v8744_v36  ;;  %v10430_v15 = vadd.f32 %v7542_v39, %v6162_v35  ;;  %v6164_v6 = vpop.f32.mrb[57].mxu0 }
 0x4ea   : > { %v8746_v11 = vpop.eup %8745  ;;  %6938 = vst [vmem:[%s10262_s10 + $0xa8] sm:$0xff] %v6874_v55  ;;  %v7545_v27 = vadd.f32 %v7544_v12, %v6164_v6  ;;  %v6166_v21 = vpop.f32.mrb[58].mxu0 }
 0x4eb   : > { %8755 = vrcp.f32 %v6685_v56  ;;  %v6686_v17 = vadd.f32 1.0, %v8746_v11  ;;  %v10435_v45 = vadd.f32 %v7546_v46, %v6166_v21  ;;  %v6168_v41 = vpop.f32.mrb[59].mxu0 }
 0x4ec   : > { %v7386_v42 = vmul.f32 -1.442695, %v7545_v27  ;;  %v7549_v7 = vadd.f32 %v7548_v63, %v6168_v41 }
 0x4ed   : > { %v8748_v29 = vpop.eup %8747  ;;  %8757 = vrcp.f32 %v6686_v17 }
 0x4ee   : > { %v6875_v60 = vmul.f32 %v8748_v29, %v10382_v38  ;;  %8759 = vpow2.f32 %v7386_v42  ;;  %v7387_v26 = vmul.f32 -1.442695, %v7549_v7 }
 0x4ef   : > { %v8750_v33 = vpop.eup %8749 }
 0x4f0   : > { %v8752_v30 = vpop.eup %8751  ;;  %6939 = vst [vmem:[%s10262_s10 + $0xb0] sm:$0xff] %v6875_v60  ;;  %v6876_v53 = vmul.f32 %v8750_v33, %v10387_v51  ;;  %8761 = vpow2.f32 %v7387_v26  ;;  %v6172_v54 = vpop.f32.mrb[60].mxu0 }
 0x4f1   : > { %v6687_v38 = vadd.f32 1.0, %v8752_v30  ;;  %v10446_v1 = vadd.f32 %v7550_v0, %v6172_v54  ;;  %v6174_v62 = vpop.f32.mrb[61].mxu0 }
 0x4f2   : > { %v8754_v22 = vpop.eup %8753  ;;  %6940 = vst [vmem:[%s10262_s10 + $0xb8] sm:$0xff] %v6876_v53  ;;  %v7553_v48 = vadd.f32 %v7552_v14, %v6174_v62  ;;  %v6176_v34 = vpop.f32.mrb[62].mxu0 }
 0x4f3   : > { %8763 = vrcp.f32 %v6687_v38  ;;  %v6688_v19 = vadd.f32 1.0, %v8754_v22  ;;  %v10451_v51 = vadd.f32 %v7554_v9, %v6176_v34  ;;  %v6178_v52 = vpop.f32.mrb[63].mxu0 }
 0x4f4   : > { %v7388_v3 = vmul.f32 -1.442695, %v7553_v48  ;;  %v7557_v31 = vadd.f32 %v7556_v10, %v6178_v52 }
 0x4f5   : > { %v8756_v16 = vpop.eup %8755  ;;  %8765 = vrcp.f32 %v6688_v19 }
 0x4f6   : > { %v6877_v49 = vmul.f32 %v8756_v16, %v10398_v24  ;;  %8767 = vpow2.f32 %v7388_v3  ;;  %v7389_v59 = vmul.f32 -1.442695, %v7557_v31 }
 0x4f7   : > { %v8758_v20 = vpop.eup %8757 }
 0x4f8   : > { %v3442_v23 = vpop.f32.mrb[64].mxu1  ;;  %v8760_v37 = vpop.eup %8759  ;;  %6941 = vst [vmem:[%s10262_s10 + $0xc0] sm:$0xff] %v6877_v49  ;;  %v6878_v50 = vmul.f32 %v8758_v20, %v10403_v8  ;;  %8769 = vpow2.f32 %v7389_v59 }
 0x4f9   : > { %v7558_v4 = vadd.f32 %v3442_v23, %v10182_v44  ;;  %v6182_v61 = vpop.f32.mrb[64].mxu0  ;;  %v3444_v43 = vpop.f32.mrb[65].mxu1  ;;  %v6689_v57 = vadd.f32 1.0, %v8760_v37 }
 0x4fa   : > { %v7560_v39 = vadd.f32 %v3444_v43, %v10184_v2  ;;  %v6184_v36 = vpop.f32.mrb[65].mxu0  ;;  %v3446_v32 = vpop.f32.mrb[66].mxu1  ;;  %6942 = vst [vmem:[%s10262_s10 + $0xc8] sm:$0xff] %v6878_v50 }
 0x4fb   : > { %v8762_v24 = vpop.eup %8761  ;;  %v10459_v12 = vadd.f32 %v7558_v4, %v6182_v61  ;;  %v7562_v55 = vadd.f32 %v3446_v32, %v10182_v44  ;;  %v6186_v35 = vpop.f32.mrb[66].mxu0  ;;  %8771 = vrcp.f32 %v6689_v57 }
 0x4fc   : > { %v3448_v40 = vpop.f32.mrb[67].mxu1  ;;  %v6690_v8 = vadd.f32 1.0, %v8762_v24  ;;  %v7561_v46 = vadd.f32 %v7560_v39, %v6184_v36  ;;  %v6188_v6 = vpop.f32.mrb[67].mxu0 }
 0x4fd   : > { %v7564_v56 = vadd.f32 %v3448_v40, %v10184_v2  ;;  %v10463_v11 = vadd.f32 %v7562_v55, %v6186_v35  ;;  %v8764_v58 = vpop.eup %8763 }
 0x4fe   : > { %8773 = vrcp.f32 %v6690_v8  ;;  %v7390_v63 = vmul.f32 -1.442695, %v7561_v46  ;;  %v6879_v21 = vmul.f32 %v8764_v58, %v10414_v18 }
 0x4ff   : > { %v7565_v27 = vadd.f32 %v7564_v56, %v6188_v6  ;;  %v8766_v17 = vpop.eup %8765 }
 0x500   : > { %8775 = vpow2.f32 %v7390_v63  ;;  %v3452_v42 = vpop.f32.mrb[68].mxu1  ;;  %v8768_v7 = vpop.eup %8767  ;;  %6943 = vst [vmem:[%s10262_s10 + $0xd0] sm:$0xff] %v6879_v21  ;;  %v6880_v29 = vmul.f32 %v8766_v17, %v10419_v25 }
 0x501   : > { %v7391_v41 = vmul.f32 -1.442695, %v7565_v27  ;;  %v7566_v60 = vadd.f32 %v3452_v42, %v10182_v44  ;;  %v6192_v26 = vpop.f32.mrb[68].mxu0  ;;  %v3454_v33 = vpop.f32.mrb[69].mxu1  ;;  %v6691_v13 = vadd.f32 1.0, %v8768_v7 }
 0x502   : > { %v7568_v0 = vadd.f32 %v3454_v33, %v10184_v2  ;;  %v6194_v30 = vpop.f32.mrb[69].mxu0  ;;  %v3456_v28 = vpop.f32.mrb[70].mxu1  ;;  %6944 = vst [vmem:[%s10262_s10 + $0xd8] sm:$0xff] %v6880_v29 }
 0x503   : > { %8777 = vpow2.f32 %v7391_v41  ;;  %v8770_v18 = vpop.eup %8769  ;;  %v10471_v14 = vadd.f32 %v7566_v60, %v6192_v26  ;;  %v7570_v53 = vadd.f32 %v3456_v28, %v10182_v44  ;;  %v6196_v54 = vpop.f32.mrb[70].mxu0 }
 0x504   : > { %v3458_v47 = vpop.f32.mrb[71].mxu1  ;;  %8779 = vrcp.f32 %v6691_v13  ;;  %v6692_v25 = vadd.f32 1.0, %v8770_v18  ;;  %v7569_v9 = vadd.f32 %v7568_v0, %v6194_v30  ;;  %v6198_v62 = vpop.f32.mrb[71].mxu0 }
 0x505   : > { %v7572_v38 = vadd.f32 %v3458_v47, %v10184_v2  ;;  %v10475_v22 = vadd.f32 %v7570_v53, %v6196_v54  ;;  %v8772_v5 = vpop.eup %8771 }
 0x506   : > { %8781 = vrcp.f32 %v6692_v25  ;;  %v7392_v10 = vmul.f32 -1.442695, %v7569_v9  ;;  %v6881_v34 = vmul.f32 %v8772_v5, %v10430_v15 }
 0x507   : > { %v7573_v48 = vadd.f32 %v7572_v38, %v6198_v62 }
 0x508   : > { %v8774_v19 = vpop.eup %8773  ;;  %8783 = vpow2.f32 %v7392_v10  ;;  %v3462_v3 = vpop.f32.mrb[72].mxu1  ;;  %6945 = vst [vmem:[%s10262_s10 + $0xe0] sm:$0xff] %v6881_v34 }
 0x509   : > { %v7393_v52 = vmul.f32 -1.442695, %v7573_v48  ;;  %v6882_v31 = vmul.f32 %v8774_v19, %v10435_v45  ;;  %v7574_v16 = vadd.f32 %v3462_v3, %v10182_v44  ;;  %v6202_v49 = vpop.f32.mrb[72].mxu0  ;;  %v3464_v59 = vpop.f32.mrb[73].mxu1 }
 0x50a   : > { %v8776_v20 = vpop.eup %8775  ;;  %v7576_v23 = vadd.f32 %v3464_v59, %v10184_v2  ;;  %v6204_v37 = vpop.f32.mrb[73].mxu0 }
 0x50b   : > { %8785 = vpow2.f32 %v7393_v52  ;;  %v3466_v50 = vpop.f32.mrb[74].mxu1  ;;  %6946 = vst [vmem:[%s10262_s10 + $0xe8] sm:$0xff] %v6882_v31  ;;  %v6693_v4 = vadd.f32 1.0, %v8776_v20  ;;  %v10483_v15 = vadd.f32 %v7574_v16, %v6202_v49  ;;  %v6206_v43 = vpop.f32.mrb[74].mxu0 }
 0x50c   : > { %v7578_v61 = vadd.f32 %v3466_v50, %v10182_v44  ;;  %v3468_v57 = vpop.f32.mrb[75].mxu1  ;;  %v7577_v45 = vadd.f32 %v7576_v23, %v6204_v37  ;;  %v6208_v32 = vpop.f32.mrb[75].mxu0 }
 0x50d   : > { %v8778_v39 = vpop.eup %8777  ;;  %v7580_v36 = vadd.f32 %v3468_v57, %v10184_v2  ;;  %8787 = vrcp.f32 %v6693_v4 }
 0x50e   : > { %v6694_v24 = vadd.f32 1.0, %v8778_v39  ;;  %v10487_v55 = vadd.f32 %v7578_v61, %v6206_v43  ;;  %v8780_v35 = vpop.eup %8779  ;;  %v7394_v40 = vmul.f32 -1.442695, %v7577_v45 }
 0x50f   : > { %v7581_v8 = vadd.f32 %v7580_v36, %v6208_v32  ;;  %v6883_v46 = vmul.f32 %v8780_v35, %v10446_v1 }
 0x510   : > { %8789 = vrcp.f32 %v6694_v24  ;;  %v8782_v56 = vpop.eup %8781  ;;  %v3472_v58 = vpop.f32.mrb[76].mxu1 }
 0x511   : > { %8791 = vpow2.f32 %v7394_v40  ;;  %v7395_v6 = vmul.f32 -1.442695, %v7581_v8  ;;  %6947 = vst [vmem:[%s10262_s10 + $0xf0] sm:$0xff] %v6883_v46  ;;  %v6884_v63 = vmul.f32 %v8782_v56, %v10451_v51  ;;  %v7582_v27 = vadd.f32 %v3472_v58, %v10182_v44  ;;  %v6212_v21 = vpop.f32.mrb[76].mxu0  ;;  %v3474_v17 = vpop.f32.mrb[77].mxu1 }
 0x512   : > { %v8784_v41 = vpop.eup %8783  ;;  %v7584_v42 = vadd.f32 %v3474_v17, %v10184_v2  ;;  %v6214_v7 = vpop.f32.mrb[77].mxu0 }
 0x513   : > { %8793 = vpow2.f32 %v7395_v6  ;;  %v3476_v29 = vpop.f32.mrb[78].mxu1  ;;  %6948 = vst [vmem:[%s10262_s10 + $0xf8] sm:$0xff] %v6884_v63  ;;  %v6695_v1 = vadd.f32 1.0, %v8784_v41  ;;  %v10495_v60 = vadd.f32 %v7582_v27, %v6212_v21  ;;  %v6216_v33 = vpop.f32.mrb[78].mxu0 }
 0x514   : > { %v7586_v26 = vadd.f32 %v3476_v29, %v10182_v44  ;;  %v3478_v13 = vpop.f32.mrb[79].mxu1  ;;  %v7585_v51 = vadd.f32 %v7584_v42, %v6214_v7  ;;  %v6218_v28 = vpop.f32.mrb[79].mxu0 }
 0x515   : > { %v8786_v0 = vpop.eup %8785  ;;  %v7588_v30 = vadd.f32 %v3478_v13, %v10184_v2  ;;  %8795 = vrcp.f32 %v6695_v1 }
 0x516   : > { %v6696_v18 = vadd.f32 1.0, %v8786_v0  ;;  %v10499_v53 = vadd.f32 %v7586_v26, %v6216_v33  ;;  %v7396_v54 = vmul.f32 -1.442695, %v7585_v51 }
 0x517   : > { %v7589_v47 = vadd.f32 %v7588_v30, %v6218_v28  ;;  %v8788_v25 = vpop.eup %8787 }
 0x518   : > { %8797 = vrcp.f32 %v6696_v18  ;;  %v6885_v9 = vmul.f32 %v8788_v25, %v10459_v12  ;;  %v3482_v62 = vpop.f32.mrb[80].mxu1  ;;  %v6222_v48 = vpop.f32.mrb[80].mxu0 }
 0x519   : > { %8799 = vpow2.f32 %v7396_v54  ;;  %v7397_v38 = vmul.f32 -1.442695, %v7589_v47  ;;  %v7590_v10 = vadd.f32 %v3482_v62, %v10182_v44  ;;  %v3484_v34 = vpop.f32.mrb[81].mxu1  ;;  %v6224_v31 = vpop.f32.mrb[81].mxu0 }
 0x51a   : > { %v8790_v5 = vpop.eup %8789  ;;  %6949 = vst [vmem:[%s10262_s10 + $0x100] sm:$0xff] %v6885_v9  ;;  %v7592_v3 = vadd.f32 %v3484_v34, %v10184_v2  ;;  %v3486_v16 = vpop.f32.mrb[82].mxu1 }
 0x51b   : > { %v8792_v19 = vpop.eup %8791  ;;  %v6886_v52 = vmul.f32 %v8790_v5, %v10463_v11  ;;  %8801 = vpow2.f32 %v7397_v38  ;;  %v10506_v12 = vadd.f32 %v7590_v10, %v6222_v48  ;;  %v7594_v59 = vadd.f32 %v3486_v16, %v10182_v44  ;;  %v6226_v20 = vpop.f32.mrb[82].mxu0 }
 0x51c   : > { %v6697_v49 = vadd.f32 1.0, %v8792_v19  ;;  %v3488_v23 = vpop.f32.mrb[83].mxu1  ;;  %v7593_v50 = vadd.f32 %v7592_v3, %v6224_v31  ;;  %v6228_v61 = vpop.f32.mrb[83].mxu0 }
 0x51d   : > { %v8794_v37 = vpop.eup %8793  ;;  %6950 = vst [vmem:[%s10262_s10 + $0x108] sm:$0xff] %v6886_v52  ;;  %v7596_v4 = vadd.f32 %v3488_v23, %v10184_v2  ;;  %v10511_v43 = vadd.f32 %v7594_v59, %v6226_v20 }
 0x51e   : > { %8803 = vrcp.f32 %v6697_v49  ;;  %v6698_v11 = vadd.f32 1.0, %v8794_v37  ;;  %v7398_v57 = vmul.f32 -1.442695, %v7593_v50 }
 0x51f   : > { %v7597_v39 = vadd.f32 %v7596_v4, %v6228_v61  ;;  %v8796_v45 = vpop.eup %8795 }
 0x520   : > { %8805 = vrcp.f32 %v6698_v11  ;;  %v6887_v36 = vmul.f32 %v8796_v45, %v10471_v14  ;;  %v3492_v24 = vpop.f32.mrb[84].mxu1  ;;  %v6232_v8 = vpop.f32.mrb[84].mxu0 }
 0x521   : > { %8807 = vpow2.f32 %v7398_v57  ;;  %v7399_v32 = vmul.f32 -1.442695, %v7597_v39  ;;  %v7598_v40 = vadd.f32 %v3492_v24, %v10182_v44  ;;  %v3494_v46 = vpop.f32.mrb[85].mxu1  ;;  %v6234_v63 = vpop.f32.mrb[85].mxu0 }
 0x522   : > { %v8798_v35 = vpop.eup %8797  ;;  %6951 = vst [vmem:[%s10262_s10 + $0x110] sm:$0xff] %v6887_v36  ;;  %v7600_v58 = vadd.f32 %v3494_v46, %v10184_v2  ;;  %v3496_v27 = vpop.f32.mrb[86].mxu1 }
 0x523   : > { %v8800_v56 = vpop.eup %8799  ;;  %v6888_v6 = vmul.f32 %v8798_v35, %v10475_v22  ;;  %8809 = vpow2.f32 %v7399_v32  ;;  %v10518_v14 = vadd.f32 %v7598_v40, %v6232_v8  ;;  %v7602_v17 = vadd.f32 %v3496_v27, %v10182_v44  ;;  %v6236_v41 = vpop.f32.mrb[86].mxu0 }
 0x524   : > { %v6699_v21 = vadd.f32 1.0, %v8800_v56  ;;  %v3498_v42 = vpop.f32.mrb[87].mxu1  ;;  %v7601_v29 = vadd.f32 %v7600_v58, %v6234_v63  ;;  %v6238_v26 = vpop.f32.mrb[87].mxu0 }
 0x525   : > { %v8802_v7 = vpop.eup %8801  ;;  %6952 = vst [vmem:[%s10262_s10 + $0x118] sm:$0xff] %v6888_v6  ;;  %v7604_v1 = vadd.f32 %v3498_v42, %v10184_v2  ;;  %v10523_v33 = vadd.f32 %v7602_v17, %v6236_v41 }
 0x526   : > { %8811 = vrcp.f32 %v6699_v21  ;;  %v6700_v22 = vadd.f32 1.0, %v8802_v7  ;;  %v7400_v13 = vmul.f32 -1.442695, %v7601_v29 }
 0x527   : > { %v7605_v0 = vadd.f32 %v7604_v1, %v6238_v26 }
 0x528   : > { %v8804_v51 = vpop.eup %8803  ;;  %8813 = vrcp.f32 %v6700_v22  ;;  %v3502_v18 = vpop.f32.mrb[88].mxu1 }
 0x529   : > { %v6889_v30 = vmul.f32 %v8804_v51, %v10483_v15  ;;  %8815 = vpow2.f32 %v7400_v13  ;;  %v7401_v28 = vmul.f32 -1.442695, %v7605_v0  ;;  %v7606_v47 = vadd.f32 %v3502_v18, %v10182_v44  ;;  %v6242_v25 = vpop.f32.mrb[88].mxu0  ;;  %v3504_v9 = vpop.f32.mrb[89].mxu1 }
 0x52a   : > { %v8806_v54 = vpop.eup %8805  ;;  %v7608_v5 = vadd.f32 %v3504_v9, %v10184_v2  ;;  %v6244_v10 = vpop.f32.mrb[89].mxu0 }
 0x52b   : > { %v8808_v38 = vpop.eup %8807  ;;  %6953 = vst [vmem:[%s10262_s10 + $0x120] sm:$0xff] %v6889_v30  ;;  %v6890_v62 = vmul.f32 %v8806_v54, %v10487_v55  ;;  %8817 = vpow2.f32 %v7401_v28  ;;  %v3506_v48 = vpop.f32.mrb[90].mxu1  ;;  %v10530_v15 = vadd.f32 %v7606_v47, %v6242_v25 }
 0x52c   : > { %v6701_v34 = vadd.f32 1.0, %v8808_v38  ;;  %v7610_v19 = vadd.f32 %v3506_v48, %v10182_v44  ;;  %v6246_v52 = vpop.f32.mrb[90].mxu0  ;;  %v3508_v3 = vpop.f32.mrb[91].mxu1  ;;  %v7609_v16 = vadd.f32 %v7608_v5, %v6244_v10 }
 0x52d   : > { %v8810_v31 = vpop.eup %8809  ;;  %6954 = vst [vmem:[%s10262_s10 + $0x128] sm:$0xff] %v6890_v62  ;;  %v7612_v49 = vadd.f32 %v3508_v3, %v10184_v2  ;;  %v6248_v59 = vpop.f32.mrb[91].mxu0 }
 0x52e   : > { %8819 = vrcp.f32 %v6701_v34  ;;  %v6702_v55 = vadd.f32 1.0, %v8810_v31  ;;  %v10535_v20 = vadd.f32 %v7610_v19, %v6246_v52  ;;  %v7402_v23 = vmul.f32 -1.442695, %v7609_v16 }
 0x52f   : > { %v7613_v37 = vadd.f32 %v7612_v49, %v6248_v59 }
 0x530   : > { %v8812_v50 = vpop.eup %8811  ;;  %8821 = vrcp.f32 %v6702_v55  ;;  %v3512_v11 = vpop.f32.mrb[92].mxu1 }
 0x531   : > { %v6891_v4 = vmul.f32 %v8812_v50, %v10495_v60  ;;  %8823 = vpow2.f32 %v7402_v23  ;;  %v7403_v61 = vmul.f32 -1.442695, %v7613_v37  ;;  %v7614_v39 = vadd.f32 %v3512_v11, %v10182_v44  ;;  %v6252_v45 = vpop.f32.mrb[92].mxu0  ;;  %v3514_v36 = vpop.f32.mrb[93].mxu1 }
 0x532   : > { %v8814_v57 = vpop.eup %8813  ;;  %v7616_v35 = vadd.f32 %v3514_v36, %v10184_v2  ;;  %v6254_v40 = vpop.f32.mrb[93].mxu0 }
 0x533   : > { %v8816_v32 = vpop.eup %8815  ;;  %6955 = vst [vmem:[%s10262_s10 + $0x130] sm:$0xff] %v6891_v4  ;;  %v6892_v24 = vmul.f32 %v8814_v57, %v10499_v53  ;;  %8825 = vpow2.f32 %v7403_v61  ;;  %v3516_v8 = vpop.f32.mrb[94].mxu1  ;;  %v10542_v60 = vadd.f32 %v7614_v39, %v6252_v45 }
 0x534   : > { %v6703_v46 = vadd.f32 1.0, %v8816_v32  ;;  %v7618_v56 = vadd.f32 %v3516_v8, %v10182_v44  ;;  %v6256_v6 = vpop.f32.mrb[94].mxu0  ;;  %v3518_v58 = vpop.f32.mrb[95].mxu1  ;;  %v7617_v27 = vadd.f32 %v7616_v35, %v6254_v40 }
 0x535   : > { %v8818_v63 = vpop.eup %8817  ;;  %6956 = vst [vmem:[%s10262_s10 + $0x138] sm:$0xff] %v6892_v24  ;;  %v7620_v21 = vadd.f32 %v3518_v58, %v10184_v2  ;;  %v6258_v17 = vpop.f32.mrb[95].mxu0 }
 0x536   : > { %8827 = vrcp.f32 %v6703_v46  ;;  %v6704_v53 = vadd.f32 1.0, %v8818_v63  ;;  %v10547_v41 = vadd.f32 %v7618_v56, %v6256_v6  ;;  %v7404_v42 = vmul.f32 -1.442695, %v7617_v27 }
 0x537   : > { %v7621_v7 = vadd.f32 %v7620_v21, %v6258_v17 }
 0x538   : > { %v8820_v29 = vpop.eup %8819  ;;  %8829 = vrcp.f32 %v6704_v53  ;;  %v3522_v22 = vpop.f32.mrb[96].mxu1 }
 0x539   : > { %v6893_v1 = vmul.f32 %v8820_v29, %v10506_v12  ;;  %8831 = vpow2.f32 %v7404_v42  ;;  %v7405_v26 = vmul.f32 -1.442695, %v7621_v7  ;;  %v7622_v0 = vadd.f32 %v3522_v22, %v10182_v44  ;;  %v6262_v51 = vpop.f32.mrb[96].mxu0  ;;  %v3524_v30 = vpop.f32.mrb[97].mxu1 }
 0x53a   : > { %v8822_v13 = vpop.eup %8821  ;;  %v7624_v54 = vadd.f32 %v3524_v30, %v10184_v2  ;;  %v6264_v47 = vpop.f32.mrb[97].mxu0 }
 0x53b   : > { %v8824_v28 = vpop.eup %8823  ;;  %6957 = vst [vmem:[%s10262_s10 + $0x140] sm:$0xff] %v6893_v1  ;;  %v6894_v18 = vmul.f32 %v8822_v13, %v10511_v43  ;;  %8833 = vpow2.f32 %v7405_v26  ;;  %v3526_v25 = vpop.f32.mrb[98].mxu1  ;;  %v10554_v12 = vadd.f32 %v7622_v0, %v6262_v51 }
 0x53c   : > { %v6705_v9 = vadd.f32 1.0, %v8824_v28  ;;  %v7626_v38 = vadd.f32 %v3526_v25, %v10182_v44  ;;  %v6266_v62 = vpop.f32.mrb[98].mxu0  ;;  %v3528_v5 = vpop.f32.mrb[99].mxu1  ;;  %v7625_v48 = vadd.f32 %v7624_v54, %v6264_v47 }
 0x53d   : > { %v8826_v10 = vpop.eup %8825  ;;  %6958 = vst [vmem:[%s10262_s10 + $0x148] sm:$0xff] %v6894_v18  ;;  %v7628_v34 = vadd.f32 %v3528_v5, %v10184_v2  ;;  %v6268_v19 = vpop.f32.mrb[99].mxu0 }
 0x53e   : > { %8835 = vrcp.f32 %v6705_v9  ;;  %v6706_v43 = vadd.f32 1.0, %v8826_v10  ;;  %v10559_v52 = vadd.f32 %v7626_v38, %v6266_v62  ;;  %v7406_v3 = vmul.f32 -1.442695, %v7625_v48 }
 0x53f   : > { %v7629_v31 = vadd.f32 %v7628_v34, %v6268_v19 }
 0x540   : > { %v8828_v16 = vpop.eup %8827  ;;  %8837 = vrcp.f32 %v6706_v43  ;;  %v3532_v55 = vpop.f32.mrb[100].mxu1 }
 0x541   : > { %v6895_v49 = vmul.f32 %v8828_v16, %v10518_v14  ;;  %8839 = vpow2.f32 %v7406_v3  ;;  %v7407_v59 = vmul.f32 -1.442695, %v7629_v31  ;;  %v7630_v37 = vadd.f32 %v3532_v55, %v10182_v44  ;;  %v6272_v50 = vpop.f32.mrb[100].mxu0  ;;  %v3534_v4 = vpop.f32.mrb[101].mxu1 }
 0x542   : > { %v8830_v23 = vpop.eup %8829  ;;  %v7632_v57 = vadd.f32 %v3534_v4, %v10184_v2  ;;  %v6274_v39 = vpop.f32.mrb[101].mxu0 }
 0x543   : > { %v8832_v61 = vpop.eup %8831  ;;  %6959 = vst [vmem:[%s10262_s10 + $0x150] sm:$0xff] %v6895_v49  ;;  %v6896_v11 = vmul.f32 %v8830_v23, %v10523_v33  ;;  %8841 = vpow2.f32 %v7407_v59  ;;  %v3536_v45 = vpop.f32.mrb[102].mxu1  ;;  %v10566_v14 = vadd.f32 %v7630_v37, %v6272_v50 }
 0x544   : > { %v6707_v36 = vadd.f32 1.0, %v8832_v61  ;;  %v7634_v32 = vadd.f32 %v3536_v45, %v10182_v44  ;;  %v6276_v24 = vpop.f32.mrb[102].mxu0  ;;  %v3538_v35 = vpop.f32.mrb[103].mxu1  ;;  %v7633_v8 = vadd.f32 %v7632_v57, %v6274_v39 }
 0x545   : > { %v8834_v40 = vpop.eup %8833  ;;  %6960 = vst [vmem:[%s10262_s10 + $0x158] sm:$0xff] %v6896_v11  ;;  %v7636_v46 = vadd.f32 %v3538_v35, %v10184_v2  ;;  %v6278_v56 = vpop.f32.mrb[103].mxu0 }
 0x546   : > { %8843 = vrcp.f32 %v6707_v36  ;;  %v6708_v33 = vadd.f32 1.0, %v8834_v40  ;;  %v10571_v6 = vadd.f32 %v7634_v32, %v6276_v24  ;;  %v7408_v58 = vmul.f32 -1.442695, %v7633_v8 }
 0x547   : > { %v7637_v63 = vadd.f32 %v7636_v46, %v6278_v56 }
 0x548   : > { %v8836_v27 = vpop.eup %8835  ;;  %8845 = vrcp.f32 %v6708_v33  ;;  %v3542_v53 = vpop.f32.mrb[104].mxu1 }
 0x549   : > { %v6897_v21 = vmul.f32 %v8836_v27, %v10530_v15  ;;  %8847 = vpow2.f32 %v7408_v58  ;;  %v7409_v17 = vmul.f32 -1.442695, %v7637_v63  ;;  %v7638_v7 = vadd.f32 %v3542_v53, %v10182_v44  ;;  %v6282_v29 = vpop.f32.mrb[104].mxu0  ;;  %v3544_v1 = vpop.f32.mrb[105].mxu1 }
 0x54a   : > { %v8838_v42 = vpop.eup %8837  ;;  %v7640_v13 = vadd.f32 %v3544_v1, %v10184_v2  ;;  %v6284_v0 = vpop.f32.mrb[105].mxu0 }
 0x54b   : > { %v8840_v26 = vpop.eup %8839  ;;  %6961 = vst [vmem:[%s10262_s10 + $0x160] sm:$0xff] %v6897_v21  ;;  %v6898_v22 = vmul.f32 %v8838_v42, %v10535_v20  ;;  %8849 = vpow2.f32 %v7409_v17  ;;  %v3546_v51 = vpop.f32.mrb[106].mxu1  ;;  %v10578_v15 = vadd.f32 %v7638_v7, %v6282_v29 }
 0x54c   : > { %v6709_v30 = vadd.f32 1.0, %v8840_v26  ;;  %v7642_v28 = vadd.f32 %v3546_v51, %v10182_v44  ;;  %v6286_v18 = vpop.f32.mrb[106].mxu0  ;;  %v3548_v54 = vpop.f32.mrb[107].mxu1  ;;  %v7641_v25 = vadd.f32 %v7640_v13, %v6284_v0 }
 0x54d   : > { %v8842_v47 = vpop.eup %8841  ;;  %6962 = vst [vmem:[%s10262_s10 + $0x168] sm:$0xff] %v6898_v22  ;;  %v7644_v9 = vadd.f32 %v3548_v54, %v10184_v2  ;;  %v6288_v38 = vpop.f32.mrb[107].mxu0 }
 0x54e   : > { %8851 = vrcp.f32 %v6709_v30  ;;  %v6710_v20 = vadd.f32 1.0, %v8842_v47  ;;  %v10583_v62 = vadd.f32 %v7642_v28, %v6286_v18  ;;  %v7410_v5 = vmul.f32 -1.442695, %v7641_v25 }
 0x54f   : > { %v7645_v10 = vadd.f32 %v7644_v9, %v6288_v38 }
 0x550   : > { %v8844_v48 = vpop.eup %8843  ;;  %8853 = vrcp.f32 %v6710_v20  ;;  %v3552_v43 = vpop.f32.mrb[108].mxu1 }
 0x551   : > { %v6899_v34 = vmul.f32 %v8844_v48, %v10542_v60  ;;  %8855 = vpow2.f32 %v7410_v5  ;;  %v7411_v19 = vmul.f32 -1.442695, %v7645_v10  ;;  %v7646_v31 = vadd.f32 %v3552_v43, %v10182_v44  ;;  %v6292_v16 = vpop.f32.mrb[108].mxu0  ;;  %v3554_v49 = vpop.f32.mrb[109].mxu1 }
 0x552   : > { %v8846_v3 = vpop.eup %8845  ;;  %v7648_v23 = vadd.f32 %v3554_v49, %v10184_v2  ;;  %v6294_v37 = vpop.f32.mrb[109].mxu0 }
 0x553   : > { %v8848_v59 = vpop.eup %8847  ;;  %6963 = vst [vmem:[%s10262_s10 + $0x170] sm:$0xff] %v6899_v34  ;;  %v6900_v55 = vmul.f32 %v8846_v3, %v10547_v41  ;;  %8857 = vpow2.f32 %v7411_v19  ;;  %v3556_v50 = vpop.f32.mrb[110].mxu1  ;;  %v10590_v60 = vadd.f32 %v7646_v31, %v6292_v16 }
 0x554   : > { %v6711_v4 = vadd.f32 1.0, %v8848_v59  ;;  %v7650_v61 = vadd.f32 %v3556_v50, %v10182_v44  ;;  %v6296_v11 = vpop.f32.mrb[110].mxu0  ;;  %v3558_v57 = vpop.f32.mrb[111].mxu1  ;;  %v7649_v45 = vadd.f32 %v7648_v23, %v6294_v37 }
 0x555   : > { %v8850_v39 = vpop.eup %8849  ;;  %6964 = vst [vmem:[%s10262_s10 + $0x178] sm:$0xff] %v6900_v55  ;;  %v7652_v36 = vadd.f32 %v3558_v57, %v10184_v2  ;;  %v6298_v32 = vpop.f32.mrb[111].mxu0 }
 0x556   : > { %8859 = vrcp.f32 %v6711_v4  ;;  %v6712_v41 = vadd.f32 1.0, %v8850_v39  ;;  %v10595_v24 = vadd.f32 %v7650_v61, %v6296_v11  ;;  %v7412_v35 = vmul.f32 -1.442695, %v7649_v45 }
 0x557   : > { %v7653_v40 = vadd.f32 %v7652_v36, %v6298_v32 }
 0x558   : > { %v8852_v8 = vpop.eup %8851  ;;  %8861 = vrcp.f32 %v6712_v41  ;;  %v3562_v33 = vpop.f32.mrb[112].mxu1 }
 0x559   : > { %v6901_v46 = vmul.f32 %v8852_v8, %v10554_v12  ;;  %8863 = vpow2.f32 %v7412_v35  ;;  %v7413_v56 = vmul.f32 -1.442695, %v7653_v40  ;;  %v7654_v63 = vadd.f32 %v3562_v33, %v10182_v44  ;;  %v6302_v27 = vpop.f32.mrb[112].mxu0  ;;  %v3564_v21 = vpop.f32.mrb[113].mxu1 }
 0x55a   : > { %v8854_v58 = vpop.eup %8853  ;;  %v7656_v42 = vadd.f32 %v3564_v21, %v10184_v2  ;;  %v6304_v7 = vpop.f32.mrb[113].mxu0 }
 0x55b   : > { %v8856_v17 = vpop.eup %8855  ;;  %6965 = vst [vmem:[%s10262_s10 + $0x180] sm:$0xff] %v6901_v46  ;;  %v6902_v53 = vmul.f32 %v8854_v58, %v10559_v52  ;;  %8865 = vpow2.f32 %v7413_v56  ;;  %v3566_v29 = vpop.f32.mrb[114].mxu1  ;;  %v10602_v12 = vadd.f32 %v7654_v63, %v6302_v27 }
 0x55c   : > { %v6713_v1 = vadd.f32 1.0, %v8856_v17  ;;  %v7658_v26 = vadd.f32 %v3566_v29, %v10182_v44  ;;  %v6306_v22 = vpop.f32.mrb[114].mxu0  ;;  %v3568_v13 = vpop.f32.mrb[115].mxu1  ;;  %v7657_v51 = vadd.f32 %v7656_v42, %v6304_v7 }
 0x55d   : > { %v8858_v0 = vpop.eup %8857  ;;  %6966 = vst [vmem:[%s10262_s10 + $0x188] sm:$0xff] %v6902_v53  ;;  %v7660_v30 = vadd.f32 %v3568_v13, %v10184_v2  ;;  %v6308_v28 = vpop.f32.mrb[115].mxu0 }
 0x55e   : > { %8867 = vrcp.f32 %v6713_v1  ;;  %v6714_v52 = vadd.f32 1.0, %v8858_v0  ;;  %v10607_v18 = vadd.f32 %v7658_v26, %v6306_v22  ;;  %v7414_v54 = vmul.f32 -1.442695, %v7657_v51 }
 0x55f   : > { %v7661_v47 = vadd.f32 %v7660_v30, %v6308_v28 }
 0x560   : > { %v8860_v25 = vpop.eup %8859  ;;  %8869 = vrcp.f32 %v6714_v52  ;;  %v3572_v20 = vpop.f32.mrb[116].mxu1 }
 0x561   : > { %v6903_v9 = vmul.f32 %v8860_v25, %v10566_v14  ;;  %8871 = vpow2.f32 %v7414_v54  ;;  %v7415_v38 = vmul.f32 -1.442695, %v7661_v47  ;;  %v7662_v10 = vadd.f32 %v3572_v20, %v10182_v44  ;;  %v6312_v48 = vpop.f32.mrb[116].mxu0  ;;  %v3574_v34 = vpop.f32.mrb[117].mxu1 }
 0x562   : > { %v8862_v5 = vpop.eup %8861  ;;  %v7664_v3 = vadd.f32 %v3574_v34, %v10184_v2  ;;  %v6314_v31 = vpop.f32.mrb[117].mxu0 }
 0x563   : > { %v8864_v19 = vpop.eup %8863  ;;  %6967 = vst [vmem:[%s10262_s10 + $0x190] sm:$0xff] %v6903_v9  ;;  %v6904_v43 = vmul.f32 %v8862_v5, %v10571_v6  ;;  %8873 = vpow2.f32 %v7415_v38  ;;  %v3576_v16 = vpop.f32.mrb[118].mxu1  ;;  %v10614_v14 = vadd.f32 %v7662_v10, %v6312_v48 }
 0x564   : > { %v6715_v49 = vadd.f32 1.0, %v8864_v19  ;;  %v7666_v59 = vadd.f32 %v3576_v16, %v10182_v44  ;;  %v6316_v55 = vpop.f32.mrb[118].mxu0  ;;  %v3578_v23 = vpop.f32.mrb[119].mxu1  ;;  %v7665_v50 = vadd.f32 %v7664_v3, %v6314_v31 }
 0x565   : > { %v8866_v37 = vpop.eup %8865  ;;  %6968 = vst [vmem:[%s10262_s10 + $0x198] sm:$0xff] %v6904_v43  ;;  %v7668_v4 = vadd.f32 %v3578_v23, %v10184_v2  ;;  %v6318_v61 = vpop.f32.mrb[119].mxu0 }
 0x566   : > { %8875 = vrcp.f32 %v6715_v49  ;;  %v6716_v6 = vadd.f32 1.0, %v8866_v37  ;;  %v10619_v11 = vadd.f32 %v7666_v59, %v6316_v55  ;;  %v7416_v57 = vmul.f32 -1.442695, %v7665_v50 }
 0x567   : > { %v7669_v39 = vadd.f32 %v7668_v4, %v6318_v61 }
 0x568   : > { %v8868_v45 = vpop.eup %8867  ;;  %8877 = vrcp.f32 %v6716_v6  ;;  %v3582_v41 = vpop.f32.mrb[120].mxu1 }
 0x569   : > { %v6905_v36 = vmul.f32 %v8868_v45, %v10578_v15  ;;  %8879 = vpow2.f32 %v7416_v57  ;;  %v7417_v32 = vmul.f32 -1.442695, %v7669_v39  ;;  %v7670_v40 = vadd.f32 %v3582_v41, %v10182_v44  ;;  %v6322_v8 = vpop.f32.mrb[120].mxu0  ;;  %v3584_v46 = vpop.f32.mrb[121].mxu1 }
 0x56a   : > { %v8870_v35 = vpop.eup %8869  ;;  %v7672_v58 = vadd.f32 %v3584_v46, %v10184_v2  ;;  %v6324_v63 = vpop.f32.mrb[121].mxu0 }
 0x56b   : > { %v8872_v56 = vpop.eup %8871  ;;  %6969 = vst [vmem:[%s10262_s10 + $0x1a0] sm:$0xff] %v6905_v36  ;;  %v6906_v33 = vmul.f32 %v8870_v35, %v10583_v62  ;;  %8881 = vpow2.f32 %v7417_v32  ;;  %v3586_v27 = vpop.f32.mrb[122].mxu1  ;;  %v10626_v15 = vadd.f32 %v7670_v40, %v6322_v8 }
 0x56c   : > { %v6717_v21 = vadd.f32 1.0, %v8872_v56  ;;  %v7674_v17 = vadd.f32 %v3586_v27, %v10182_v44  ;;  %v6326_v53 = vpop.f32.mrb[122].mxu0  ;;  %v3588_v42 = vpop.f32.mrb[123].mxu1  ;;  %v7673_v29 = vadd.f32 %v7672_v58, %v6324_v63 }
 0x56d   : > { %v8874_v7 = vpop.eup %8873  ;;  %6970 = vst [vmem:[%s10262_s10 + $0x1a8] sm:$0xff] %v6906_v33  ;;  %v7676_v1 = vadd.f32 %v3588_v42, %v10184_v2  ;;  %v6328_v26 = vpop.f32.mrb[123].mxu0 }
 0x56e   : > { %8883 = vrcp.f32 %v6717_v21  ;;  %v6718_v62 = vadd.f32 1.0, %v8874_v7  ;;  %v10631_v22 = vadd.f32 %v7674_v17, %v6326_v53  ;;  %v7418_v13 = vmul.f32 -1.442695, %v7673_v29 }
 0x56f   : > { %v7677_v0 = vadd.f32 %v7676_v1, %v6328_v26 }
 0x570   : > { %v8876_v51 = vpop.eup %8875  ;;  %8885 = vrcp.f32 %v6718_v62  ;;  %v3592_v52 = vpop.f32.mrb[124].mxu1 }
 0x571   : > { %v6907_v30 = vmul.f32 %v8876_v51, %v10590_v60  ;;  %8887 = vpow2.f32 %v7418_v13  ;;  %v7419_v28 = vmul.f32 -1.442695, %v7677_v0  ;;  %v7678_v47 = vadd.f32 %v3592_v52, %v10182_v44  ;;  %v6332_v25 = vpop.f32.mrb[124].mxu0  ;;  %v3594_v9 = vpop.f32.mrb[125].mxu1 }
 0x572   : > { %v8878_v54 = vpop.eup %8877  ;;  %v7680_v5 = vadd.f32 %v3594_v9, %v10184_v2  ;;  %v6334_v10 = vpop.f32.mrb[125].mxu0 }
 0x573   : > { %v8880_v38 = vpop.eup %8879  ;;  %6971 = vst [vmem:[%s10262_s10 + $0x1b0] sm:$0xff] %v6907_v30  ;;  %v6908_v20 = vmul.f32 %v8878_v54, %v10595_v24  ;;  %8889 = vpow2.f32 %v7419_v28  ;;  %v3596_v48 = vpop.f32.mrb[126].mxu1  ;;  %v7679_v60 = vadd.f32 %v7678_v47, %v6332_v25 }
 0x574   : > { %v6719_v34 = vadd.f32 1.0, %v8880_v38  ;;  %v7682_v19 = vadd.f32 %v3596_v48, %v10182_v44  ;;  %v6336_v43 = vpop.f32.mrb[126].mxu0  ;;  %v3598_v3 = vpop.f32.mrb[127].mxu1  ;;  %v7681_v16 = vadd.f32 %v7680_v5, %v6334_v10 }
 0x575   : > { %v8882_v31 = vpop.eup %8881  ;;  %6972 = vst [vmem:[%s10262_s10 + $0x1b8] sm:$0xff] %v6908_v20  ;;  %v7684_v49 = vadd.f32 %v3598_v3, %v10184_v2  ;;  %v6338_v59 = vpop.f32.mrb[127].mxu0 }
 0x576   : > { %8891 = vrcp.f32 %v6719_v34  ;;  %v6720_v24 = vadd.f32 1.0, %v8882_v31  ;;  %v7683_v55 = vadd.f32 %v7682_v19, %v6336_v43  ;;  %v7420_v23 = vmul.f32 -1.442695, %v7681_v16 }
 0x577   : > { %v7685_v37 = vadd.f32 %v7684_v49, %v6338_v59 }
 0x578   : > { %v8884_v50 = vpop.eup %8883  ;;  %8893 = vrcp.f32 %v6720_v24 }
 0x579   : > { %v6909_v4 = vmul.f32 %v8884_v50, %v10602_v12  ;;  %8895 = vpow2.f32 %v7420_v23  ;;  %v7421_v44 = vmul.f32 -1.442695, %v7685_v37 }
 0x57a   : > { %v8886_v61 = vpop.eup %8885 }
 0x57b   : > { %v8888_v6 = vpop.eup %8887  ;;  %6973 = vst [vmem:[%s10262_s10 + $0x1c0] sm:$0xff] %v6909_v4  ;;  %v6910_v57 = vmul.f32 %v8886_v61, %v10607_v18  ;;  %8897 = vpow2.f32 %v7421_v44 }
 0x57c   : > { %v6721_v2 = vadd.f32 1.0, %v8888_v6 }
 0x57d   : > { %v8890_v39 = vpop.eup %8889  ;;  %6974 = vst [vmem:[%s10262_s10 + $0x1c8] sm:$0xff] %v6910_v57 }
 0x57e   : > { %8899 = vrcp.f32 %v6721_v2  ;;  %v6722_v45 = vadd.f32 1.0, %v8890_v39 }
 0x580   : > { %v8892_v36 = vpop.eup %8891  ;;  %8901 = vrcp.f32 %v6722_v45 }
 0x581   : > { %v6911_v12 = vmul.f32 %v8892_v36, %v10614_v14 }
 0x582   : > { %v8894_v32 = vpop.eup %8893 }
 0x583   : > { %v8896_v41 = vpop.eup %8895  ;;  %6975 = vst [vmem:[%s10262_s10 + $0x1d0] sm:$0xff] %v6911_v12  ;;  %v6912_v18 = vmul.f32 %v8894_v32, %v10619_v11 }
 0x584   : > { %v6723_v35 = vadd.f32 1.0, %v8896_v41 }
 0x585   : > { %v8898_v40 = vpop.eup %8897  ;;  %6976 = vst [vmem:[%s10262_s10 + $0x1d8] sm:$0xff] %v6912_v18 }
 0x586   : > { %8903 = vrcp.f32 %v6723_v35  ;;  %v6724_v8 = vadd.f32 1.0, %v8898_v40 }
 0x588   : > { %v8900_v46 = vpop.eup %8899  ;;  %8905 = vrcp.f32 %v6724_v8 }
 0x589   : > { %v6913_v14 = vmul.f32 %v8900_v46, %v10626_v15 }
 0x58a   : > { %v8902_v56 = vpop.eup %8901 }
 0x58b   : > { %6977 = vst [vmem:[%s10262_s10 + $0x1e0] sm:$0xff] %v6913_v14  ;;  %v6914_v33 = vmul.f32 %v8902_v56, %v10631_v22 }
 0x58d   : > { %6978 = vst [vmem:[%s10262_s10 + $0x1e8] sm:$0xff] %v6914_v33 }
 0x590   : > { %v8904_v11 = vpop.eup %8903 }
 0x591   : > { %v6915_v58 = vmul.f32 %v8904_v11, %v7679_v60 }
 0x592   : > { %v8906_v63 = vpop.eup %8905 }
 0x593   : > { %6979 = vst [vmem:[%s10262_s10 + $0x1f0] sm:$0xff] %v6915_v58  ;;  %v6916_v27 = vmul.f32 %v8906_v63, %v7683_v55 }
 0x595   : > { %6980 = vst [vmem:[%s10262_s10 + $0x1f8] sm:$0xff] %v6916_v27 }
 0x596   : > { %8922 = shalt.err (!%p8919_p2)
}
 0x597   : > { %s8923_s28 = scalar_lea.hbm %s10658_s20, 8192  ;;  %s8927_s5 = scalar_lea.hbm %s10710_s3, 16384 }
 0x598   : > { %p8924_p3 = scmp.ne.s32.totalorder %s10658_s20, %s8923_s28  ;;  %p8928_p8 = scmp.lt.u32.totalorder %s10658_s20, %s10710_s3 }
 0x599   : > { %p8929_p9 = scmp.lt.u32.totalorder %s8927_s5, %s8923_s28  ;;  %p8931_p11 = scmp.lt.u32.totalorder %s8923_s28, %s10658_s20 }
 0x59a   : > { %p8925_p4 = pnand %p8924_p3, %p9035_p5 }
 0x59b   : > { %p8930_p10 = por %p8929_p9, %p8928_p8 }
 0x59c   : > { %p8926_p7 = pneg %p8925_p4 }
 0x59d   : > { %p8932_p12 = por %p8931_p11, %p8930_p10 }
 0x59f   : > { %p8933_p13 = pnand %p8932_p12, %p8926_p7 }
 0x5a1   : > { %8936 = shalt.err (!%p8933_p13)
}
 0x5a2   : > { %s8975_s8 = smov 128   ;;  %s8976_s9 = smov 8  }
 0x5a3   : > { %8582 = dma.vmem_to_hbm [thread:$0]  (%p9035_p5), %s10660_s17, 8192, %s10658_s20, %s10666_s24, %s8975_s8, %s8975_s8, %s8976_s9  }
 0x5a4 PF: > { %p8588_p0 = scmp.ge.s32.totalorder %s8971_s15, 2  ;;  %s7010_s10 = sand.u32 1, %s8959_s12  }
 0x5a5   : > { %s7011_s11 = scalar_lea.sflag [#allocation4], %s7010_s10 }
 0x5a6   : > { %p8585_p1 = pnand %p8588_p0, %p9039_p6 }
 0x5a8   : > { %8954 = dma.done.wait (!%p8585_p1), %s7011_s11, 8192  }
 0x5a9   : > { %8956 = vsyncadd (!%p8585_p1), %s7011_s11, 4294959104  ;;  %p13_p2 = scmp.ge.s32.totalorder %s9022_s18, 4   ;;  %s10758_s12 = smov %s8963_s13 }
 0x5aa   : > { %s10759_s13 = smov %s8967_s14  ;;  %s10760_s14 = smov %s9033_s21 }
 0x5ab   : > { %s10761_s15 = smov %s9022_s18  ;;  %15 = sbr.rel (!%p13_p2) target bundleno = 3 (0x3), region = 65 }
 0x5b2   :  { %7016 = vsyncpa [#allocation4], 1 }
 0x5b3   :  { %7018 = vsyncpa [#allocation4 + $0x1], 1 }

</bundles_post_ra>
